<compile_context>
chip_gen: v7x
topology: tpu7x:2x2x1
jax: 0.10.0
libtpu: 0.0.40
codegen_flags: <defaults>
</compile_context>

<pallas_src>
import numpy as np
import jax
import jax.numpy as jnp
from jax import lax
from jax.experimental import pallas as pl
from jax.experimental.pallas import tpu as pltpu

EPS = 1e-5
NEG_SLOPE = 0.1


# ----------------------------------------------------------------------------
# Fused ResBlock kernel
# ----------------------------------------------------------------------------
def _make_resblock_kernel(D, H, W, Cmid, C, F, PAD):
    """Builds the fused kernel for fixed static shapes.

    F   : front-pad rows of the flat mid scratch (sublane aligned, >= W+1)
    PAD : total rows of the flat mid scratch ( = F + H*W + W + 1 )
    """
    HW = H * W

    def kernel(x_ref, w1_ref, b1_ref, w2_ref, b2_ref, o_ref, acc_ref, mp_ref):
        d = pl.program_id(1)
        k = pl.program_id(2)            # 0..2, innermost (sequential) grid axis
        kd = (2 * k) % 3                # tap order 0, 2, 1 -> center tap last
        dz = d + kd - 1                 # source depth slice of this tap

        # ---- init accumulator + zero the halo rows of the flat scratch ------
        @pl.when(k == 0)
        def _init():
            acc_ref[...] = jnp.zeros_like(acc_ref)
            mp_ref[0:F, :] = jnp.zeros((F, Cmid), jnp.float32)
            mp_ref[F + HW:PAD, :] = jnp.zeros((PAD - F - HW, Cmid), jnp.float32)

        # ---- one kd tap of the 3x3x3 conv (skipped outside the volume) ------
        @pl.when(jnp.logical_and(dz >= 0, dz < D))
        def _tap():
            xs = x_ref[0, 0]                                     # (HW, C) bf16
            # block1: 1x1x1 conv (+ folded BN) + LeakyReLU, f32 accumulation.
            m = jnp.dot(xs, w1_ref[...], preferred_element_type=jnp.float32)
            m = m + b1_ref[...]
            m = jnp.where(m >= 0, m, NEG_SLOPE * m)
            mp_ref[F:F + HW, :] = m                              # interior rows

            # block2: the 9 (kh, kw) taps of this kd slice. Each LHS is a
            # static row-offset window of the flat scratch; h-halo rows land in
            # the zeroed pad regions, w-halo rows are masked via iota.
            w_col = lax.broadcasted_iota(jnp.int32, (HW, 1), 0) % W
            for kh in range(3):
                for kw in range(3):
                    start = F + (kh - 1) * W + (kw - 1)
                    a = mp_ref[start:start + HW, :].astype(jnp.bfloat16)
                    if kw == 0:     # w-1 neighbour invalid at w == 0
                        a = jnp.where(w_col > 0, a, jnp.zeros_like(a))
                    elif kw == 2:   # w+1 neighbour invalid at w == W-1
                        a = jnp.where(w_col < W - 1, a, jnp.zeros_like(a))
                    tap = kh * 3 + kw
                    acc_ref[...] += jnp.dot(
                        a, w2_ref[0, tap * Cmid:(tap + 1) * Cmid, :],
                        preferred_element_type=jnp.float32)

        # ---- epilogue: bias + LeakyReLU + residual (f32), store once --------
        @pl.when(k == 2)
        def _finish():
            y = acc_ref[...] + b2_ref[...]
            y = jnp.where(y >= 0, y, NEG_SLOPE * y)
            y = y + x_ref[0, 0].astype(jnp.float32)   # x block at k==2 is x[n, d]
            o_ref[0, 0] = y.astype(o_ref.dtype)

    return kernel


def resblock_pallas(x, p):
    """ResBlock forward; x is NCDHW float32 like the PyTorch module."""
    N, C, D, H, W = x.shape
    assert C % 2 == 0
    Cmid = C // 2
    HW = H * W
    F = ((W + 1 + 7) // 8) * 8          # front pad rows (sublane aligned)
    PAD = F + HW + W + 1                # flat scratch rows incl. back pad

    # Fold inference-mode BN into the conv weights / biases; weights in bf16.
    s1 = p["g1"] / jnp.sqrt(p["v1"] + EPS)                           # (Cmid,)
    w1_mat = (p["w1"].reshape(Cmid, C).T * s1[None, :]).astype(jnp.bfloat16)
    b1_vec = ((p["b1"] - p["m1"]) * s1 + p["bt1"]).reshape(1, Cmid)

    s2 = p["g2"] / jnp.sqrt(p["v2"] + EPS)                           # (C,)
    w2_t = jnp.transpose(p["w2"], (2, 3, 4, 1, 0)) * s2              # (3,3,3,Cmid,C)
    w2_mat = w2_t.reshape(3, 9 * Cmid, C).astype(jnp.bfloat16)
    b2_vec = ((p["b2"] - p["m2"]) * s2 + p["bt2"]).reshape(1, C)

    # NCDHW -> (N, D, H*W, C) channels-last rows; bf16 activations for the MXU.
    x_rows = jnp.transpose(x, (0, 2, 3, 4, 1)).reshape(N, D, HW, C)
    x_bf = x_rows.astype(jnp.bfloat16)

    kernel = _make_resblock_kernel(D, H, W, Cmid, C, F, PAD)

    def x_index(n, d, k):
        kd = (2 * k) % 3
        return (n, jnp.clip(d + kd - 1, 0, D - 1), 0, 0)

    out = pl.pallas_call(
        kernel,
        out_shape=jax.ShapeDtypeStruct((N, D, HW, C), jnp.float32),
        grid_spec=pltpu.PrefetchScalarGridSpec(
            num_scalar_prefetch=0,
            grid=(N, D, 3),
            in_specs=[
                pl.BlockSpec((1, 1, HW, C), x_index),
                pl.BlockSpec((C, Cmid), lambda n, d, k: (0, 0)),
                pl.BlockSpec((1, Cmid), lambda n, d, k: (0, 0)),
                pl.BlockSpec((1, 9 * Cmid, C), lambda n, d, k: ((2 * k) % 3, 0, 0)),
                pl.BlockSpec((1, C), lambda n, d, k: (0, 0)),
            ],
            out_specs=pl.BlockSpec((1, 1, HW, C), lambda n, d, k: (n, d, 0, 0)),
            scratch_shapes=[
                pltpu.VMEM((HW, C), jnp.float32),      # kd-axis accumulator
                pltpu.VMEM((PAD, Cmid), jnp.float32),  # zero-padded flat mid slab
            ],
        ),
        compiler_params=pltpu.CompilerParams(
            dimension_semantics=("parallel", "parallel", "arbitrary"),
            vmem_limit_bytes=32 * 1024 * 1024,
        ),
    )(x_bf, w1_mat, b1_vec, w2_mat, b2_vec)

    out = out.reshape(N, D, H, W, C)
    return jnp.transpose(out, (0, 4, 1, 2, 3))        # back to NCDHW


# ----------------------------------------------------------------------------
# Pure-JAX reference (module math in f32, via lax.conv) for correctness check
# ----------------------------------------------------------------------------
def resblock_ref(x, p):
    def convblock(z, w, b, g, bt, m, v, pad):
        y = lax.conv_general_dilated(
            z, w, window_strides=(1, 1, 1),
            padding=[(pad, pad)] * 3,
            dimension_numbers=("NCDHW", "OIDHW", "NCDHW"))
        y = y + b[None, :, None, None, None]
        y = (g[None, :, None, None, None]
             * (y - m[None, :, None, None, None])
             / jnp.sqrt(v + EPS)[None, :, None, None, None]
             + bt[None, :, None, None, None])
        return jnp.where(y >= 0, y, NEG_SLOPE * y)

    out = convblock(x, p["w1"], p["b1"], p["g1"], p["bt1"], p["m1"], p["v1"], 0)
    out = convblock(out, p["w2"], p["b2"], p["g2"], p["bt2"], p["m2"], p["v2"], 1)
    return out + x


if __name__ == "__main__":
    # C = 128 keeps the output channel dim lane-dense (multiple of 128).
    N, C, D, H, W = 2, 128, 8, 16, 16
    Cmid = C // 2

    key = jax.random.PRNGKey(0)
    ks = jax.random.split(key, 13)
    x = jax.random.normal(ks[0], (N, C, D, H, W), jnp.float32)

    params = {
        # block1: Conv3d(C, C/2, k=1) + BN3d(C/2)
        "w1": 0.1 * jax.random.normal(ks[1], (Cmid, C, 1, 1, 1), jnp.float32),
        "b1": 0.1 * jax.random.normal(ks[2], (Cmid,), jnp.float32),
        "g1": 1.0 + 0.1 * jax.random.normal(ks[3], (Cmid,), jnp.float32),
        "bt1": 0.1 * jax.random.normal(ks[4], (Cmid,), jnp.float32),
        "m1": 0.1 * jax.random.normal(ks[5], (Cmid,), jnp.float32),
        "v1": jax.random.uniform(ks[6], (Cmid,), jnp.float32, 0.5, 1.5),
        # block2: Conv3d(C/2, C, k=3, pad=1) + BN3d(C)
        "w2": 0.04 * jax.random.normal(ks[7], (C, Cmid, 3, 3, 3), jnp.float32),
        "b2": 0.1 * jax.random.normal(ks[8], (C,), jnp.float32),
        "g2": 1.0 + 0.1 * jax.random.normal(ks[9], (C,), jnp.float32),
        "bt2": 0.1 * jax.random.normal(ks[10], (C,), jnp.float32),
        "m2": 0.1 * jax.random.normal(ks[11], (C,), jnp.float32),
        "v2": jax.random.uniform(ks[12], (C,), jnp.float32, 0.5, 1.5),
    }

    fwd = jax.jit(resblock_pallas)
    out = jax.block_until_ready(fwd(x, params))

    ref = jax.block_until_ready(resblock_ref(x, params))
    # bf16 matmul operands (f32 accumulation) -> compare against the f32
    # module reference with a tolerance that covers bf16 rounding but still
    # catches any structural / indexing bug (which would be O(1) off).
    np.testing.assert_allclose(np.asarray(out), np.asarray(ref),
                               rtol=2e-2, atol=8e-2)

    print("KERNEL_OK")
</pallas_src>

<mosaic_0001>
module attributes {stable_mosaic.version = 11 : i64} {
  func.func @kernel(%arg0: i32, %arg1: i32, %arg2: i32, %arg3: memref<1x1x256x128xbf16, #tpu.memory_space<vmem>>, %arg4: memref<128x64xbf16, #tpu.memory_space<vmem>>, %arg5: memref<1x64xf32, #tpu.memory_space<vmem>>, %arg6: memref<1x576x128xbf16, #tpu.memory_space<vmem>>, %arg7: memref<1x128xf32, #tpu.memory_space<vmem>>, %arg8: memref<1x1x256x128xf32, #tpu.memory_space<vmem>>, %arg9: memref<256x128xf32, #tpu.memory_space<vmem>>, %arg10: memref<297x64xf32, #tpu.memory_space<vmem>>) attributes {dimension_semantics = [#tpu.dimension_semantics<parallel>, #tpu.dimension_semantics<parallel>, #tpu.dimension_semantics<arbitrary>], iteration_bounds = array<i64: 2, 8, 3>, scalar_prefetch = 0 : i64, scratch_operands = 2 : i64, tpu.core_type = #tpu.core_type<tc>, window_params = [{transform_indices = @transform_0, window_bounds = array<i64: 1, 1, 256, 128>}, {pipeline_mode = #tpu.pipeline_mode<synchronous>, transform_indices = @transform_1, window_bounds = array<i64: 128, 64>}, {pipeline_mode = #tpu.pipeline_mode<synchronous>, transform_indices = @transform_2, window_bounds = array<i64: 1, 64>}, {transform_indices = @transform_3, window_bounds = array<i64: 1, 576, 128>}, {pipeline_mode = #tpu.pipeline_mode<synchronous>, transform_indices = @transform_4, window_bounds = array<i64: 1, 128>}, {transform_indices = @transform_5, window_bounds = array<i64: 1, 1, 256, 128>}]} {
    %c2_i32 = arith.constant 2 : i32
    %0 = arith.muli %c2_i32, %arg2 : i32
    %c3_i32 = arith.constant 3 : i32
    %c0_i32 = arith.constant 0 : i32
    %1 = arith.cmpi eq, %c3_i32, %c0_i32 : i32
    %c1_i32 = arith.constant 1 : i32
    %2 = arith.select %1, %c1_i32, %c3_i32 : i32
    %3 = arith.remsi %0, %2 : i32
    %c0_i32_0 = arith.constant 0 : i32
    %4 = arith.cmpi ne, %3, %c0_i32_0 : i32
    %c0_i32_1 = arith.constant 0 : i32
    %5 = arith.cmpi slt, %3, %c0_i32_1 : i32
    %c0_i32_2 = arith.constant 0 : i32
    %6 = arith.cmpi slt, %2, %c0_i32_2 : i32
    %7 = arith.xori %5, %6 : i1
    %8 = arith.andi %7, %4 : i1
    %9 = arith.addi %3, %2 : i32
    %10 = arith.select %8, %9, %3 : i32
    %11 = arith.addi %arg1, %10 : i32
    %c1_i32_3 = arith.constant 1 : i32
    %12 = arith.subi %11, %c1_i32_3 : i32
    %c0_i32_4 = arith.constant 0 : i32
    %13 = arith.cmpi eq, %arg2, %c0_i32_4 : i32
    %14 = arith.extui %13 : i1 to i32
    %c0_i32_5 = arith.constant 0 : i32
    %15 = arith.cmpi ne, %14, %c0_i32_5 : i32
    scf.if %15 {
      %cst = arith.constant 0.000000e+00 : f32
      %24 = vector.broadcast %cst : f32 to vector<256x128xf32>
      %c0 = arith.constant 0 : index
      %c0_10 = arith.constant 0 : index
      %25 = vector.load %arg9[%c0, %c0_10] : memref<256x128xf32, #tpu.memory_space<vmem>>, vector<256x128xf32>
      tpu.vector_store %arg9[%c0, %c0_10], %24 {strides = array<i32>} : memref<256x128xf32, #tpu.memory_space<vmem>>, vector<256x128xf32>,
      %cst_11 = arith.constant 0.000000e+00 : f32
      %26 = vector.broadcast %cst_11 : f32 to vector<24x64xf32>
      %c0_12 = arith.constant 0 : index
      %c0_13 = arith.constant 0 : index
      %27 = vector.load %arg10[%c0_12, %c0_13] : memref<297x64xf32, #tpu.memory_space<vmem>>, vector<24x64xf32>
      tpu.vector_store %arg10[%c0_12, %c0_13], %26 {strides = array<i32>} : memref<297x64xf32, #tpu.memory_space<vmem>>, vector<24x64xf32>,
      %cst_14 = arith.constant 0.000000e+00 : f32
      %28 = vector.broadcast %cst_14 : f32 to vector<17x64xf32>
      %c280 = arith.constant 280 : index
      %c0_15 = arith.constant 0 : index
      %29 = vector.load %arg10[%c280, %c0_15] : memref<297x64xf32, #tpu.memory_space<vmem>>, vector<17x64xf32>
      tpu.vector_store %arg10[%c280, %c0_15], %28 {strides = array<i32>} : memref<297x64xf32, #tpu.memory_space<vmem>>, vector<17x64xf32>,
    } else {
    }
    %c0_i32_6 = arith.constant 0 : i32
    %16 = arith.cmpi sge, %12, %c0_i32_6 : i32
    %c8_i32 = arith.constant 8 : i32
    %17 = arith.cmpi slt, %12, %c8_i32 : i32
    %18 = arith.andi %16, %17 : i1
    %19 = arith.extui %18 : i1 to i32
    %c0_i32_7 = arith.constant 0 : i32
    %20 = arith.cmpi ne, %19, %c0_i32_7 : i32
    scf.if %20 {
      %c0 = arith.constant 0 : index
      %c0_10 = arith.constant 0 : index
      %c0_11 = arith.constant 0 : index
      %c0_12 = arith.constant 0 : index
      %24 = vector.load %arg3[%c0, %c0_10, %c0_11, %c0_12] : memref<1x1x256x128xbf16, #tpu.memory_space<vmem>>, vector<1x1x256x128xbf16>
      %25 = vector.shape_cast %24 : vector<1x1x256x128xbf16> to vector<256x128xbf16>
      %c0_13 = arith.constant 0 : index
      %c0_14 = arith.constant 0 : index
      %26 = vector.load %arg4[%c0_13, %c0_14] : memref<128x64xbf16, #tpu.memory_space<vmem>>, vector<128x64xbf16>
      %cst = arith.constant dense<0.000000e+00> : vector<256x64xf32>
      %27 = tpu.matmul %25, %26, %cst {dimension_numbers = #tpu.dot_dimension_numbers<[1], [0], [0], [1], [0, 0, 1, 1], [], []>} : vector<256x128xbf16>, vector<128x64xbf16>, vector<256x64xf32> -> vector<256x64xf32>
      %c0_15 = arith.constant 0 : index
      %c0_16 = arith.constant 0 : index
      %28 = vector.load %arg5[%c0_15, %c0_16] : memref<1x64xf32, #tpu.memory_space<vmem>>, vector<1x64xf32>
      %29 = vector.broadcast %28 : vector<1x64xf32> to vector<256x64xf32>
      %30 = arith.addf %27, %29 : vector<256x64xf32>
      %cst_17 = arith.constant 0.000000e+00 : f32
      %31 = vector.broadcast %cst_17 : f32 to vector<256x64xf32>
      %32 = arith.cmpf oge, %30, %31 : vector<256x64xf32>
      %cst_18 = arith.constant 1.000000e-01 : f32
      %33 = vector.broadcast %cst_18 : f32 to vector<256x64xf32>
      %34 = arith.mulf %33, %30 : vector<256x64xf32>
      %35 = arith.select %32, %30, %34 : vector<256x64xi1>, vector<256x64xf32>
      %c24 = arith.constant 24 : index
      %c0_19 = arith.constant 0 : index
      %36 = vector.load %arg10[%c24, %c0_19] : memref<297x64xf32, #tpu.memory_space<vmem>>, vector<256x64xf32>
      tpu.vector_store %arg10[%c24, %c0_19], %35 {strides = array<i32>} : memref<297x64xf32, #tpu.memory_space<vmem>>, vector<256x64xf32>,
      %37 = tpu.iota {dimensions = array<i32: 0>} : vector<256x1xi32>
      %c16_i32 = arith.constant 16 : i32
      %c0_i32_20 = arith.constant 0 : i32
      %38 = arith.cmpi eq, %c16_i32, %c0_i32_20 : i32
      %c1_i32_21 = arith.constant 1 : i32
      %39 = arith.select %38, %c1_i32_21, %c16_i32 : i32
      %40 = vector.broadcast %39 : i32 to vector<256x1xi32>
      %41 = arith.remsi %37, %40 : vector<256x1xi32>
      %c0_i32_22 = arith.constant 0 : i32
      %42 = vector.broadcast %c0_i32_22 : i32 to vector<256x1xi32>
      %43 = arith.cmpi ne, %41, %42 : vector<256x1xi32>
      %c0_i32_23 = arith.constant 0 : i32
      %44 = vector.broadcast %c0_i32_23 : i32 to vector<256x1xi32>
      %45 = arith.cmpi slt, %41, %44 : vector<256x1xi32>
      %c0_i32_24 = arith.constant 0 : i32
      %46 = arith.cmpi slt, %39, %c0_i32_24 : i32
      %47 = vector.broadcast %46 : i1 to vector<256x1xi1>
      %48 = vector.broadcast %47 : vector<256x1xi1> to vector<256x1xi1>
      %49 = arith.xori %45, %48 : vector<256x1xi1>
      %50 = arith.andi %49, %43 : vector<256x1xi1>
      %51 = vector.broadcast %39 : i32 to vector<256x1xi32>
      %52 = arith.addi %41, %51 : vector<256x1xi32>
      %53 = arith.select %50, %52, %41 : vector<256x1xi1>, vector<256x1xi32>
      %c7 = arith.constant 7 : index
      %c0_25 = arith.constant 0 : index
      %54 = vector.load %arg10[%c7, %c0_25] : memref<297x64xf32, #tpu.memory_space<vmem>>, vector<256x64xf32>
      %55 = arith.truncf %54 : vector<256x64xf32> to vector<256x64xbf16>
      %c0_i32_26 = arith.constant 0 : i32
      %56 = vector.broadcast %c0_i32_26 : i32 to vector<256x1xi32>
      %57 = arith.cmpi sgt, %53, %56 : vector<256x1xi32>
      %cst_27 = arith.constant 0.000000e+00 : bf16
      %58 = vector.broadcast %cst_27 : bf16 to vector<256x64xbf16>
      %59 = vector.shape_cast %57 : vector<256x1xi1> to vector<256x1xi1>
      %60 = vector.broadcast %59 : vector<256x1xi1> to vector<256x64xi1>
      %61 = arith.select %60, %55, %58 : vector<256x64xi1>, vector<256x64xbf16>
      %c0_28 = arith.constant 0 : index
      %c0_29 = arith.constant 0 : index
      %62 = vector.load %arg9[%c0_28, %c0_29] : memref<256x128xf32, #tpu.memory_space<vmem>>, vector<256x128xf32>
      %c0_30 = arith.constant 0 : index
      %c0_31 = arith.constant 0 : index
      %c0_32 = arith.constant 0 : index
      %63 = vector.load %arg6[%c0_30, %c0_31, %c0_32] : memref<1x576x128xbf16, #tpu.memory_space<vmem>>, vector<1x64x128xbf16>
      %64 = vector.shape_cast %63 : vector<1x64x128xbf16> to vector<64x128xbf16>
      %cst_33 = arith.constant dense<0.000000e+00> : vector<256x128xf32>
      %65 = tpu.matmul %61, %64, %cst_33 {dimension_numbers = #tpu.dot_dimension_numbers<[1], [0], [0], [1], [0, 0, 1, 1], [], []>} : vector<256x64xbf16>, vector<64x128xbf16>, vector<256x128xf32> -> vector<256x128xf32>
      %66 = arith.addf %62, %65 : vector<256x128xf32>
      %c0_34 = arith.constant 0 : index
      %c0_35 = arith.constant 0 : index
      %67 = vector.load %arg9[%c0_34, %c0_35] : memref<256x128xf32, #tpu.memory_space<vmem>>, vector<256x128xf32>
      tpu.vector_store %arg9[%c0_34, %c0_35], %66 {strides = array<i32>} : memref<256x128xf32, #tpu.memory_space<vmem>>, vector<256x128xf32>,
      %c8 = arith.constant 8 : index
      %c0_36 = arith.constant 0 : index
      %68 = vector.load %arg10[%c8, %c0_36] : memref<297x64xf32, #tpu.memory_space<vmem>>, vector<256x64xf32>
      %69 = arith.truncf %68 : vector<256x64xf32> to vector<256x64xbf16>
      %c0_37 = arith.constant 0 : index
      %c0_38 = arith.constant 0 : index
      %70 = vector.load %arg9[%c0_37, %c0_38] : memref<256x128xf32, #tpu.memory_space<vmem>>, vector<256x128xf32>
      %c0_39 = arith.constant 0 : index
      %c64 = arith.constant 64 : index
      %c0_40 = arith.constant 0 : index
      %71 = vector.load %arg6[%c0_39, %c64, %c0_40] : memref<1x576x128xbf16, #tpu.memory_space<vmem>>, vector<1x64x128xbf16>
      %72 = vector.shape_cast %71 : vector<1x64x128xbf16> to vector<64x128xbf16>
      %cst_41 = arith.constant dense<0.000000e+00> : vector<256x128xf32>
      %73 = tpu.matmul %69, %72, %cst_41 {dimension_numbers = #tpu.dot_dimension_numbers<[1], [0], [0], [1], [0, 0, 1, 1], [], []>} : vector<256x64xbf16>, vector<64x128xbf16>, vector<256x128xf32> -> vector<256x128xf32>
      %74 = arith.addf %70, %73 : vector<256x128xf32>
      %c0_42 = arith.constant 0 : index
      %c0_43 = arith.constant 0 : index
      %75 = vector.load %arg9[%c0_42, %c0_43] : memref<256x128xf32, #tpu.memory_space<vmem>>, vector<256x128xf32>
      tpu.vector_store %arg9[%c0_42, %c0_43], %74 {strides = array<i32>} : memref<256x128xf32, #tpu.memory_space<vmem>>, vector<256x128xf32>,
      %c9 = arith.constant 9 : index
      %c0_44 = arith.constant 0 : index
      %76 = vector.load %arg10[%c9, %c0_44] : memref<297x64xf32, #tpu.memory_space<vmem>>, vector<256x64xf32>
      %77 = arith.truncf %76 : vector<256x64xf32> to vector<256x64xbf16>
      %c15_i32 = arith.constant 15 : i32
      %78 = vector.broadcast %c15_i32 : i32 to vector<256x1xi32>
      %79 = arith.cmpi slt, %53, %78 : vector<256x1xi32>
      %cst_45 = arith.constant 0.000000e+00 : bf16
      %80 = vector.broadcast %cst_45 : bf16 to vector<256x64xbf16>
      %81 = vector.shape_cast %79 : vector<256x1xi1> to vector<256x1xi1>
      %82 = vector.broadcast %81 : vector<256x1xi1> to vector<256x64xi1>
      %83 = arith.select %82, %77, %80 : vector<256x64xi1>, vector<256x64xbf16>
      %c0_46 = arith.constant 0 : index
      %c0_47 = arith.constant 0 : index
      %84 = vector.load %arg9[%c0_46, %c0_47] : memref<256x128xf32, #tpu.memory_space<vmem>>, vector<256x128xf32>
      %c0_48 = arith.constant 0 : index
      %c128 = arith.constant 128 : index
      %c0_49 = arith.constant 0 : index
      %85 = vector.load %arg6[%c0_48, %c128, %c0_49] : memref<1x576x128xbf16, #tpu.memory_space<vmem>>, vector<1x64x128xbf16>
      %86 = vector.shape_cast %85 : vector<1x64x128xbf16> to vector<64x128xbf16>
      %cst_50 = arith.constant dense<0.000000e+00> : vector<256x128xf32>
      %87 = tpu.matmul %83, %86, %cst_50 {dimension_numbers = #tpu.dot_dimension_numbers<[1], [0], [0], [1], [0, 0, 1, 1], [], []>} : vector<256x64xbf16>, vector<64x128xbf16>, vector<256x128xf32> -> vector<256x128xf32>
      %88 = arith.addf %84, %87 : vector<256x128xf32>
      %c0_51 = arith.constant 0 : index
      %c0_52 = arith.constant 0 : index
      %89 = vector.load %arg9[%c0_51, %c0_52] : memref<256x128xf32, #tpu.memory_space<vmem>>, vector<256x128xf32>
      tpu.vector_store %arg9[%c0_51, %c0_52], %88 {strides = array<i32>} : memref<256x128xf32, #tpu.memory_space<vmem>>, vector<256x128xf32>,
      %c23 = arith.constant 23 : index
      %c0_53 = arith.constant 0 : index
      %90 = vector.load %arg10[%c23, %c0_53] : memref<297x64xf32, #tpu.memory_space<vmem>>, vector<256x64xf32>
      %91 = arith.truncf %90 : vector<256x64xf32> to vector<256x64xbf16>
      %c0_i32_54 = arith.constant 0 : i32
      %92 = vector.broadcast %c0_i32_54 : i32 to vector<256x1xi32>
      %93 = arith.cmpi sgt, %53, %92 : vector<256x1xi32>
      %cst_55 = arith.constant 0.000000e+00 : bf16
      %94 = vector.broadcast %cst_55 : bf16 to vector<256x64xbf16>
      %95 = vector.shape_cast %93 : vector<256x1xi1> to vector<256x1xi1>
      %96 = vector.broadcast %95 : vector<256x1xi1> to vector<256x64xi1>
      %97 = arith.select %96, %91, %94 : vector<256x64xi1>, vector<256x64xbf16>
      %c0_56 = arith.constant 0 : index
      %c0_57 = arith.constant 0 : index
      %98 = vector.load %arg9[%c0_56, %c0_57] : memref<256x128xf32, #tpu.memory_space<vmem>>, vector<256x128xf32>
      %c0_58 = arith.constant 0 : index
      %c192 = arith.constant 192 : index
      %c0_59 = arith.constant 0 : index
      %99 = vector.load %arg6[%c0_58, %c192, %c0_59] : memref<1x576x128xbf16, #tpu.memory_space<vmem>>, vector<1x64x128xbf16>
      %100 = vector.shape_cast %99 : vector<1x64x128xbf16> to vector<64x128xbf16>
      %cst_60 = arith.constant dense<0.000000e+00> : vector<256x128xf32>
      %101 = tpu.matmul %97, %100, %cst_60 {dimension_numbers = #tpu.dot_dimension_numbers<[1], [0], [0], [1], [0, 0, 1, 1], [], []>} : vector<256x64xbf16>, vector<64x128xbf16>, vector<256x128xf32> -> vector<256x128xf32>
      %102 = arith.addf %98, %101 : vector<256x128xf32>
      %c0_61 = arith.constant 0 : index
      %c0_62 = arith.constant 0 : index
      %103 = vector.load %arg9[%c0_61, %c0_62] : memref<256x128xf32, #tpu.memory_space<vmem>>, vector<256x128xf32>
      tpu.vector_store %arg9[%c0_61, %c0_62], %102 {strides = array<i32>} : memref<256x128xf32, #tpu.memory_space<vmem>>, vector<256x128xf32>,
      %c24_63 = arith.constant 24 : index
      %c0_64 = arith.constant 0 : index
      %104 = vector.load %arg10[%c24_63, %c0_64] : memref<297x64xf32, #tpu.memory_space<vmem>>, vector<256x64xf32>
      %105 = arith.truncf %104 : vector<256x64xf32> to vector<256x64xbf16>
      %c0_65 = arith.constant 0 : index
      %c0_66 = arith.constant 0 : index
      %106 = vector.load %arg9[%c0_65, %c0_66] : memref<256x128xf32, #tpu.memory_space<vmem>>, vector<256x128xf32>
      %c0_67 = arith.constant 0 : index
      %c256 = arith.constant 256 : index
      %c0_68 = arith.constant 0 : index
      %107 = vector.load %arg6[%c0_67, %c256, %c0_68] : memref<1x576x128xbf16, #tpu.memory_space<vmem>>, vector<1x64x128xbf16>
      %108 = vector.shape_cast %107 : vector<1x64x128xbf16> to vector<64x128xbf16>
      %cst_69 = arith.constant dense<0.000000e+00> : vector<256x128xf32>
      %109 = tpu.matmul %105, %108, %cst_69 {dimension_numbers = #tpu.dot_dimension_numbers<[1], [0], [0], [1], [0, 0, 1, 1], [], []>} : vector<256x64xbf16>, vector<64x128xbf16>, vector<256x128xf32> -> vector<256x128xf32>
      %110 = arith.addf %106, %109 : vector<256x128xf32>
      %c0_70 = arith.constant 0 : index
      %c0_71 = arith.constant 0 : index
      %111 = vector.load %arg9[%c0_70, %c0_71] : memref<256x128xf32, #tpu.memory_space<vmem>>, vector<256x128xf32>
      tpu.vector_store %arg9[%c0_70, %c0_71], %110 {strides = array<i32>} : memref<256x128xf32, #tpu.memory_space<vmem>>, vector<256x128xf32>,
      %c25 = arith.constant 25 : index
      %c0_72 = arith.constant 0 : index
      %112 = vector.load %arg10[%c25, %c0_72] : memref<297x64xf32, #tpu.memory_space<vmem>>, vector<256x64xf32>
      %113 = arith.truncf %112 : vector<256x64xf32> to vector<256x64xbf16>
      %c15_i32_73 = arith.constant 15 : i32
      %114 = vector.broadcast %c15_i32_73 : i32 to vector<256x1xi32>
      %115 = arith.cmpi slt, %53, %114 : vector<256x1xi32>
      %cst_74 = arith.constant 0.000000e+00 : bf16
      %116 = vector.broadcast %cst_74 : bf16 to vector<256x64xbf16>
      %117 = vector.shape_cast %115 : vector<256x1xi1> to vector<256x1xi1>
      %118 = vector.broadcast %117 : vector<256x1xi1> to vector<256x64xi1>
      %119 = arith.select %118, %113, %116 : vector<256x64xi1>, vector<256x64xbf16>
      %c0_75 = arith.constant 0 : index
      %c0_76 = arith.constant 0 : index
      %120 = vector.load %arg9[%c0_75, %c0_76] : memref<256x128xf32, #tpu.memory_space<vmem>>, vector<256x128xf32>
      %c0_77 = arith.constant 0 : index
      %c320 = arith.constant 320 : index
      %c0_78 = arith.constant 0 : index
      %121 = vector.load %arg6[%c0_77, %c320, %c0_78] : memref<1x576x128xbf16, #tpu.memory_space<vmem>>, vector<1x64x128xbf16>
      %122 = vector.shape_cast %121 : vector<1x64x128xbf16> to vector<64x128xbf16>
      %cst_79 = arith.constant dense<0.000000e+00> : vector<256x128xf32>
      %123 = tpu.matmul %119, %122, %cst_79 {dimension_numbers = #tpu.dot_dimension_numbers<[1], [0], [0], [1], [0, 0, 1, 1], [], []>} : vector<256x64xbf16>, vector<64x128xbf16>, vector<256x128xf32> -> vector<256x128xf32>
      %124 = arith.addf %120, %123 : vector<256x128xf32>
      %c0_80 = arith.constant 0 : index
      %c0_81 = arith.constant 0 : index
      %125 = vector.load %arg9[%c0_80, %c0_81] : memref<256x128xf32, #tpu.memory_space<vmem>>, vector<256x128xf32>
      tpu.vector_store %arg9[%c0_80, %c0_81], %124 {strides = array<i32>} : memref<256x128xf32, #tpu.memory_space<vmem>>, vector<256x128xf32>,
      %c39 = arith.constant 39 : index
      %c0_82 = arith.constant 0 : index
      %126 = vector.load %arg10[%c39, %c0_82] : memref<297x64xf32, #tpu.memory_space<vmem>>, vector<256x64xf32>
      %127 = arith.truncf %126 : vector<256x64xf32> to vector<256x64xbf16>
      %c0_i32_83 = arith.constant 0 : i32
      %128 = vector.broadcast %c0_i32_83 : i32 to vector<256x1xi32>
      %129 = arith.cmpi sgt, %53, %128 : vector<256x1xi32>
      %cst_84 = arith.constant 0.000000e+00 : bf16
      %130 = vector.broadcast %cst_84 : bf16 to vector<256x64xbf16>
      %131 = vector.shape_cast %129 : vector<256x1xi1> to vector<256x1xi1>
      %132 = vector.broadcast %131 : vector<256x1xi1> to vector<256x64xi1>
      %133 = arith.select %132, %127, %130 : vector<256x64xi1>, vector<256x64xbf16>
      %c0_85 = arith.constant 0 : index
      %c0_86 = arith.constant 0 : index
      %134 = vector.load %arg9[%c0_85, %c0_86] : memref<256x128xf32, #tpu.memory_space<vmem>>, vector<256x128xf32>
      %c0_87 = arith.constant 0 : index
      %c384 = arith.constant 384 : index
      %c0_88 = arith.constant 0 : index
      %135 = vector.load %arg6[%c0_87, %c384, %c0_88] : memref<1x576x128xbf16, #tpu.memory_space<vmem>>, vector<1x64x128xbf16>
      %136 = vector.shape_cast %135 : vector<1x64x128xbf16> to vector<64x128xbf16>
      %cst_89 = arith.constant dense<0.000000e+00> : vector<256x128xf32>
      %137 = tpu.matmul %133, %136, %cst_89 {dimension_numbers = #tpu.dot_dimension_numbers<[1], [0], [0], [1], [0, 0, 1, 1], [], []>} : vector<256x64xbf16>, vector<64x128xbf16>, vector<256x128xf32> -> vector<256x128xf32>
      %138 = arith.addf %134, %137 : vector<256x128xf32>
      %c0_90 = arith.constant 0 : index
      %c0_91 = arith.constant 0 : index
      %139 = vector.load %arg9[%c0_90, %c0_91] : memref<256x128xf32, #tpu.memory_space<vmem>>, vector<256x128xf32>
      tpu.vector_store %arg9[%c0_90, %c0_91], %138 {strides = array<i32>} : memref<256x128xf32, #tpu.memory_space<vmem>>, vector<256x128xf32>,
      %c40 = arith.constant 40 : index
      %c0_92 = arith.constant 0 : index
      %140 = vector.load %arg10[%c40, %c0_92] : memref<297x64xf32, #tpu.memory_space<vmem>>, vector<256x64xf32>
      %141 = arith.truncf %140 : vector<256x64xf32> to vector<256x64xbf16>
      %c0_93 = arith.constant 0 : index
      %c0_94 = arith.constant 0 : index
      %142 = vector.load %arg9[%c0_93, %c0_94] : memref<256x128xf32, #tpu.memory_space<vmem>>, vector<256x128xf32>
      %c0_95 = arith.constant 0 : index
      %c448 = arith.constant 448 : index
      %c0_96 = arith.constant 0 : index
      %143 = vector.load %arg6[%c0_95, %c448, %c0_96] : memref<1x576x128xbf16, #tpu.memory_space<vmem>>, vector<1x64x128xbf16>
      %144 = vector.shape_cast %143 : vector<1x64x128xbf16> to vector<64x128xbf16>
      %cst_97 = arith.constant dense<0.000000e+00> : vector<256x128xf32>
      %145 = tpu.matmul %141, %144, %cst_97 {dimension_numbers = #tpu.dot_dimension_numbers<[1], [0], [0], [1], [0, 0, 1, 1], [], []>} : vector<256x64xbf16>, vector<64x128xbf16>, vector<256x128xf32> -> vector<256x128xf32>
      %146 = arith.addf %142, %145 : vector<256x128xf32>
      %c0_98 = arith.constant 0 : index
      %c0_99 = arith.constant 0 : index
      %147 = vector.load %arg9[%c0_98, %c0_99] : memref<256x128xf32, #tpu.memory_space<vmem>>, vector<256x128xf32>
      tpu.vector_store %arg9[%c0_98, %c0_99], %146 {strides = array<i32>} : memref<256x128xf32, #tpu.memory_space<vmem>>, vector<256x128xf32>,
      %c41 = arith.constant 41 : index
      %c0_100 = arith.constant 0 : index
      %148 = vector.load %arg10[%c41, %c0_100] : memref<297x64xf32, #tpu.memory_space<vmem>>, vector<256x64xf32>
      %149 = arith.truncf %148 : vector<256x64xf32> to vector<256x64xbf16>
      %c15_i32_101 = arith.constant 15 : i32
      %150 = vector.broadcast %c15_i32_101 : i32 to vector<256x1xi32>
      %151 = arith.cmpi slt, %53, %150 : vector<256x1xi32>
      %cst_102 = arith.constant 0.000000e+00 : bf16
      %152 = vector.broadcast %cst_102 : bf16 to vector<256x64xbf16>
      %153 = vector.shape_cast %151 : vector<256x1xi1> to vector<256x1xi1>
      %154 = vector.broadcast %153 : vector<256x1xi1> to vector<256x64xi1>
      %155 = arith.select %154, %149, %152 : vector<256x64xi1>, vector<256x64xbf16>
      %c0_103 = arith.constant 0 : index
      %c0_104 = arith.constant 0 : index
      %156 = vector.load %arg9[%c0_103, %c0_104] : memref<256x128xf32, #tpu.memory_space<vmem>>, vector<256x128xf32>
      %c0_105 = arith.constant 0 : index
      %c512 = arith.constant 512 : index
      %c0_106 = arith.constant 0 : index
      %157 = vector.load %arg6[%c0_105, %c512, %c0_106] : memref<1x576x128xbf16, #tpu.memory_space<vmem>>, vector<1x64x128xbf16>
      %158 = vector.shape_cast %157 : vector<1x64x128xbf16> to vector<64x128xbf16>
      %cst_107 = arith.constant dense<0.000000e+00> : vector<256x128xf32>
      %159 = tpu.matmul %155, %158, %cst_107 {dimension_numbers = #tpu.dot_dimension_numbers<[1], [0], [0], [1], [0, 0, 1, 1], [], []>} : vector<256x64xbf16>, vector<64x128xbf16>, vector<256x128xf32> -> vector<256x128xf32>
      %160 = arith.addf %156, %159 : vector<256x128xf32>
      %c0_108 = arith.constant 0 : index
      %c0_109 = arith.constant 0 : index
      %161 = vector.load %arg9[%c0_108, %c0_109] : memref<256x128xf32, #tpu.memory_space<vmem>>, vector<256x128xf32>
      tpu.vector_store %arg9[%c0_108, %c0_109], %160 {strides = array<i32>} : memref<256x128xf32, #tpu.memory_space<vmem>>, vector<256x128xf32>,
    } else {
    }
    %c2_i32_8 = arith.constant 2 : i32
    %21 = arith.cmpi eq, %arg2, %c2_i32_8 : i32
    %22 = arith.extui %21 : i1 to i32
    %c0_i32_9 = arith.constant 0 : i32
    %23 = arith.cmpi ne, %22, %c0_i32_9 : i32
    scf.if %23 {
      %c0 = arith.constant 0 : index
      %c0_10 = arith.constant 0 : index
      %24 = vector.load %arg9[%c0, %c0_10] : memref<256x128xf32, #tpu.memory_space<vmem>>, vector<256x128xf32>
      %c0_11 = arith.constant 0 : index
      %c0_12 = arith.constant 0 : index
      %25 = vector.load %arg7[%c0_11, %c0_12] : memref<1x128xf32, #tpu.memory_space<vmem>>, vector<1x128xf32>
      %26 = vector.broadcast %25 : vector<1x128xf32> to vector<256x128xf32>
      %27 = arith.addf %24, %26 : vector<256x128xf32>
      %cst = arith.constant 0.000000e+00 : f32
      %28 = vector.broadcast %cst : f32 to vector<256x128xf32>
      %29 = arith.cmpf oge, %27, %28 : vector<256x128xf32>
      %cst_13 = arith.constant 1.000000e-01 : f32
      %30 = vector.broadcast %cst_13 : f32 to vector<256x128xf32>
      %31 = arith.mulf %30, %27 : vector<256x128xf32>
      %32 = arith.select %29, %27, %31 : vector<256x128xi1>, vector<256x128xf32>
      %c0_14 = arith.constant 0 : index
      %c0_15 = arith.constant 0 : index
      %c0_16 = arith.constant 0 : index
      %c0_17 = arith.constant 0 : index
      %33 = vector.load %arg3[%c0_14, %c0_15, %c0_16, %c0_17] : memref<1x1x256x128xbf16, #tpu.memory_space<vmem>>, vector<1x1x256x128xbf16>
      %34 = vector.shape_cast %33 : vector<1x1x256x128xbf16> to vector<256x128xbf16>
      %35 = arith.extf %34 : vector<256x128xbf16> to vector<256x128xf32>
      %36 = arith.addf %32, %35 : vector<256x128xf32>
      %c0_18 = arith.constant 0 : index
      %c0_19 = arith.constant 0 : index
      %c0_20 = arith.constant 0 : index
      %c0_21 = arith.constant 0 : index
      %37 = vector.load %arg8[%c0_18, %c0_19, %c0_20, %c0_21] : memref<1x1x256x128xf32, #tpu.memory_space<vmem>>, vector<1x1x256x128xf32>
      %38 = vector.shape_cast %37 : vector<1x1x256x128xf32> to vector<256x128xf32>
      %39 = vector.shape_cast %36 : vector<256x128xf32> to vector<1x1x256x128xf32>
      tpu.vector_store %arg8[%c0_18, %c0_19, %c0_20, %c0_21], %39 {strides = array<i32>} : memref<1x1x256x128xf32, #tpu.memory_space<vmem>>, vector<1x1x256x128xf32>,
    } else {
    }
    return
  }
  func.func @transform_0(%arg0: i32, %arg1: i32, %arg2: i32) -> (i32, i32, i32, i32) {
    %c2_i32 = arith.constant 2 : i32
    %0 = arith.muli %c2_i32, %arg2 : i32
    %c3_i32 = arith.constant 3 : i32
    %c0_i32 = arith.constant 0 : i32
    %1 = arith.cmpi eq, %c3_i32, %c0_i32 : i32
    %c1_i32 = arith.constant 1 : i32
    %2 = arith.select %1, %c1_i32, %c3_i32 : i32
    %3 = arith.remsi %0, %2 : i32
    %c0_i32_0 = arith.constant 0 : i32
    %4 = arith.cmpi ne, %3, %c0_i32_0 : i32
    %c0_i32_1 = arith.constant 0 : i32
    %5 = arith.cmpi slt, %3, %c0_i32_1 : i32
    %c0_i32_2 = arith.constant 0 : i32
    %6 = arith.cmpi slt, %2, %c0_i32_2 : i32
    %7 = arith.xori %5, %6 : i1
    %8 = arith.andi %7, %4 : i1
    %9 = arith.addi %3, %2 : i32
    %10 = arith.select %8, %9, %3 : i32
    %11 = arith.addi %arg1, %10 : i32
    %c1_i32_3 = arith.constant 1 : i32
    %12 = arith.subi %11, %c1_i32_3 : i32
    %c0_i32_4 = arith.constant 0 : i32
    %c7_i32 = arith.constant 7 : i32
    %13 = arith.maxsi %c0_i32_4, %12 : i32
    %14 = arith.minsi %c7_i32, %13 : i32
    %c0_i32_5 = arith.constant 0 : i32
    %c0_i32_6 = arith.constant 0 : i32
    %c0_i32_7 = arith.constant 0 : i32
    return %arg0, %14, %c0_i32_5, %c0_i32_6 : i32, i32, i32, i32
  }
  func.func @transform_1(%arg0: i32, %arg1: i32, %arg2: i32) -> (i32, i32) {
    %c0_i32 = arith.constant 0 : i32
    %c0_i32_0 = arith.constant 0 : i32
    %c0_i32_1 = arith.constant 0 : i32
    return %c0_i32, %c0_i32_0 : i32, i32
  }
  func.func @transform_2(%arg0: i32, %arg1: i32, %arg2: i32) -> (i32, i32) {
    %c0_i32 = arith.constant 0 : i32
    %c0_i32_0 = arith.constant 0 : i32
    %c0_i32_1 = arith.constant 0 : i32
    return %c0_i32, %c0_i32_0 : i32, i32
  }
  func.func @transform_3(%arg0: i32, %arg1: i32, %arg2: i32) -> (i32, i32, i32) {
    %c2_i32 = arith.constant 2 : i32
    %0 = arith.muli %c2_i32, %arg2 : i32
    %c3_i32 = arith.constant 3 : i32
    %c0_i32 = arith.constant 0 : i32
    %1 = arith.cmpi eq, %c3_i32, %c0_i32 : i32
    %c1_i32 = arith.constant 1 : i32
    %2 = arith.select %1, %c1_i32, %c3_i32 : i32
    %3 = arith.remsi %0, %2 : i32
    %c0_i32_0 = arith.constant 0 : i32
    %4 = arith.cmpi ne, %3, %c0_i32_0 : i32
    %c0_i32_1 = arith.constant 0 : i32
    %5 = arith.cmpi slt, %3, %c0_i32_1 : i32
    %c0_i32_2 = arith.constant 0 : i32
    %6 = arith.cmpi slt, %2, %c0_i32_2 : i32
    %7 = arith.xori %5, %6 : i1
    %8 = arith.andi %7, %4 : i1
    %9 = arith.addi %3, %2 : i32
    %10 = arith.select %8, %9, %3 : i32
    %c0_i32_3 = arith.constant 0 : i32
    %c0_i32_4 = arith.constant 0 : i32
    %c0_i32_5 = arith.constant 0 : i32
    return %10, %c0_i32_3, %c0_i32_4 : i32, i32, i32
  }
  func.func @transform_4(%arg0: i32, %arg1: i32, %arg2: i32) -> (i32, i32) {
    %c0_i32 = arith.constant 0 : i32
    %c0_i32_0 = arith.constant 0 : i32
    %c0_i32_1 = arith.constant 0 : i32
    return %c0_i32, %c0_i32_0 : i32, i32
  }
  func.func @transform_5(%arg0: i32, %arg1: i32, %arg2: i32) -> (i32, i32, i32, i32) {
    %c0_i32 = arith.constant 0 : i32
    %c0_i32_0 = arith.constant 0 : i32
    %c0_i32_1 = arith.constant 0 : i32
    return %arg0, %arg1, %c0_i32, %c0_i32_0 : i32, i32, i32, i32
  }
}

</mosaic_0001>

<bundles_post_ra>
// kernel: resblock_pallas.1
= control target key start
LH: loop header
LB: loop body
LE: loop exit
PB: predicated region body
PF: predicated region fallthrough
CT: control target
= control target key end

     0   :  { %10 = vsyncpa [#allocation5], 0  ;;  %s9181_s0 = inlined_call_operand.vmem [shape: bf16[2,8,256,128], index: 0, kind: input, shape index: {}]   ;;  %s9182_s1 = inlined_call_operand.vmem [shape: bf16[128,64], index: 1, kind: input, shape index: {}]   ;;  %s9183_s2 = inlined_call_operand.vmem [shape: f32[1,64], index: 2, kind: input, shape index: {}]   ;;  %s9184_s3 = inlined_call_operand.vmem [shape: bf16[3,576,128], index: 3, kind: input, shape index: {}]   ;;  %s9185_s4 = inlined_call_operand.vmem [shape: f32[1,128], index: 4, kind: input, shape index: {}]   ;;  %s9186_s5 = inlined_call_operand.hbm [shape: f32[2,8,256,128], index: 5, kind: output, shape index: {}]  }
   0x1   :  { %12 = vsyncpa [#allocation5 + $0x1], 0  ;;  %s7702_s18 = smov 0   ;;  %s7704_s19 = smov 0  }
   0x2   :  { %s7706_s20 = smov 0   ;;  %s7708_s21 = smov 0  }
   0x3   :  { %s7710_s22 = smov 0   ;;  %s7712_s23 = smov 0  }
   0x4   :  { %s7714_s24 = smov 0   ;;  %s7716_s25 = smov 0  }
   0x5   :  { %s7718_s26 = smov 0   ;;  %s7720_s27 = smov 0  }
   0x6 LB: > { %9211 = sst [smem:[#allocation7_spill]] %s7636_s20  ;;  %s5918_s28 = sadd.s32 4294967295, %s7664_s27   ;;  %s7664_s27 = sphi %s7720_s27, %s18_s27   ;;  %s7660_s26 = sphi %s7718_s26, %s9366_s26   ;;  %s7656_s25 = sphi %s7716_s25, %s9365_s25   ;;  %s7652_s24 = sphi %s7714_s24, %s9364_s24   ;;  %s7648_s23 = sphi %s7712_s23, %s9363_s23   ;;  %s7644_s22 = sphi %s7710_s22, %s9362_s22   ;;  %s7640_s21 = sphi %s7708_s21, %s9361_s21   ;;  %s7636_s20 = sphi %s7706_s20, %s9360_s20   ;;  %s7632_s19 = sphi %s7704_s19, %s9368_s19   ;;  %s7628_s18 = sphi %s7702_s18, %s9367_s18  }
   0x7   : > { %9212 = sst [smem:[#allocation8_spill]] %s7652_s24  ;;  %s5919_s29 = sadd.s32 4294967294, %s7664_s27  }
   0x8   : > { %9213 = sst [smem:[#allocation9_spill]] %s7656_s25  ;;  %s30_s30 = sadd.s32 1, %s7652_s24 }
   0x9   : > { %9214 = sst [smem:[#allocation10_spill]] %s7660_s26  ;;  %p31_p0 = scmp.ge.s32.totalorder %s30_s30, 3 }
   0xa   : > { %s33_s6 = sadd.s32 1, %s7656_s25  ;;  %s37_s7 = sadd.s32 1, %s7660_s26 }
   0xb   : > { %p241_p1 = scmp.ne.s32.totalorder %s7636_s20, %s7632_s19  ;;  %s9370_s30 = smov (%p31_p0, %s30_s30), 0 }
   0xc   : > { %9215 = sst [smem:[#allocation11_spill]] %s9370_s30  ;;  %s9372_s6 = smov (!%p31_p0, %s33_s6), %s7656_s25 }
   0xd   : > { %p242_p2 = scmp.eq.s32.totalorder %s5918_s28, 47  ;;  %p247_p3 = scmp.ne.s32.totalorder %s7632_s19, %s7628_s18 }
   0xe   : > { %p35_p4 = scmp.ge.s32.totalorder %s9372_s6, 8  ;;  %p248_p5 = scmp.eq.s32.totalorder %s5919_s29, 47 }
   0xf   : > { %p7764_p6 = por %p242_p2, %p241_p1  ;;  %p5950_p8 = scmp.ge.s32.totalorder %s7664_s27, 1 }
  0x10   : > { %s9374_s6 = smov (%p35_p4, %s9372_s6), 0  ;;  %s9376_s7 = smov (!%p35_p4, %s37_s7), %s7660_s26 }
  0x11   : > { %9217 = sst [smem:[#allocation12_spill]] %s9374_s6  ;;  %p7771_p7 = por %p248_p5, %p247_p3 }
  0x12   : > { %p39_p9 = scmp.ge.s32.totalorder %s9376_s7, 2  ;;  %p363_p10 = scmp.lt.s32.totalorder %s7664_s27, 49 }
  0x13   : > { %s227_s10 = ssub.s32 %s7656_s25, %s9374_s6  ;;  %s231_s13 = sadd.s32 1, %s7636_s20 }
  0x14   : > { %s9378_s7 = smov (%p39_p9, %s9376_s7), 0  ;;  %p364_p11 = pnand %p5950_p8, %p363_p10 }
  0x15   : > { %9219 = sst [smem:[#allocation13_spill]] %s9378_s7  ;;  %s226_s11 = ssub.s32 %s7660_s26, %s9378_s7 }
  0x16   : > { %s228_s12 = sor.u32 %s227_s10, %s226_s11  ;;  %367 = sbr.rel (%p364_p11) target bundleno = 960 (0x3c0), region = 40 }
  0x17   : > { %p229_p12 = scmp.eq.s32.totalorder %s228_s12, 0  ;;  %s9189_s15 = sand.u32 (!%p364_p11), 1, %s7632_s19  }
  0x18   : > { %s5952_s16 = sshll.u32 (!%p364_p11), %s7640_s21, 1  ;;  %s7791_s17 = sshll.u32 (!%p364_p11), %s9189_s15, 8 }
  0x19   : > { %s7785_s14 = scalar_select %p229_p12, %s7636_s20, %s231_s13  }
  0x1a   : > { %s436_s28 = ssub.s32 (!%p364_p11), 0, %s5952_s16  ;;  %p435_p13 = scmp.lt.s32.totalorder (!%p364_p11), %s5952_s16, 0 }
  0x1b   : > { %9220 = sst [smem:[#allocation14_spill]] %s7785_s14  ;;  %s5953_s29 = smin.u32 (!%p364_p11), %s5952_s16, %s436_s28 }
  0x1c   : > { %7492 = sdivrem.u32 (!%p364_p11), %s5953_s29, 3  ;;  %p454_p0 = scmp.lt.s32.totalorder (!%p364_p11), %s7648_s23, 1 }
  0x1d   : > { %s7812_s20 = scalar_lea.vmem [#allocation4], %s7791_s17  ;;  %p5975_p8 = scmp.ne.s32.totalorder %s7640_s21, 0 }
  0x1e   : > { %s455_s13 = scalar_select %p454_p0, %s7648_s23, 1 }
  0x1f   : > { %vm571_vm0 = vcmask (!%p5975_p8), 523264   ;;  %vm577_vm1 = vcmask (!%p5975_p8), 516096   ;;  %v7666_v0 = vmov (!%p5975_p8), 0.0  }
  0x20   : > { %539 = vst [vmem:[#allocation2] sm:$0xff] (!%p5975_p8), %v7666_v0  ;;  %540 = vst [vmem:[#allocation2 + $0x8] sm:$0xff] (!%p5975_p8), %v7666_v0 }
  0x21   : > { %541 = vst [vmem:[#allocation2 + $0x10] sm:$0xff] (!%p5975_p8), %v7666_v0  ;;  %542 = vst [vmem:[#allocation2 + $0x18] sm:$0xff] (!%p5975_p8), %v7666_v0 }
  0x22   : > { %543 = vst [vmem:[#allocation2 + $0x20] sm:$0xff] (!%p5975_p8), %v7666_v0  ;;  %544 = vst [vmem:[#allocation2 + $0x28] sm:$0xff] (!%p5975_p8), %v7666_v0 }
  0x23   : > { %545 = vst [vmem:[#allocation2 + $0x30] sm:$0xff] (!%p5975_p8), %v7666_v0  ;;  %546 = vst [vmem:[#allocation2 + $0x38] sm:$0xff] (!%p5975_p8), %v7666_v0 }
  0x24   : > { %547 = vst [vmem:[#allocation2 + $0x40] sm:$0xff] (!%p5975_p8), %v7666_v0  ;;  %548 = vst [vmem:[#allocation2 + $0x48] sm:$0xff] (!%p5975_p8), %v7666_v0 }
  0x25   : > { %s7493_s10 = spop.drf %7492  ;;  %549 = vst [vmem:[#allocation2 + $0x50] sm:$0xff] (!%p5975_p8), %v7666_v0  ;;  %550 = vst [vmem:[#allocation2 + $0x58] sm:$0xff] (!%p5975_p8), %v7666_v0 }
  0x26   : > { %s440_s11 = ssub.s32 0, %s7493_s10  ;;  %551 = vst [vmem:[#allocation2 + $0x60] sm:$0xff] (!%p5975_p8), %v7666_v0  ;;  %552 = vst [vmem:[#allocation2 + $0x68] sm:$0xff] (!%p5975_p8), %v7666_v0 }
  0x27   : > { %s9380_s11 = smov (!%p435_p13, %s440_s11), %s7493_s10  ;;  %553 = vst [vmem:[#allocation2 + $0x70] sm:$0xff] (!%p5975_p8), %v7666_v0  ;;  %554 = vst [vmem:[#allocation2 + $0x78] sm:$0xff] (!%p5975_p8), %v7666_v0 }
  0x28   : > { %p5955_p1 = scmp.lt.s32.totalorder %s9380_s11, 0  ;;  %s446_s12 = sadd.s32 3, %s9380_s11  ;;  %555 = vst [vmem:[#allocation2 + $0x80] sm:$0xff] (!%p5975_p8), %v7666_v0  ;;  %556 = vst [vmem:[#allocation2 + $0x88] sm:$0xff] (!%p5975_p8), %v7666_v0 }
  0x29   : > { %557 = vst [vmem:[#allocation2 + $0x90] sm:$0xff] (!%p5975_p8), %v7666_v0  ;;  %558 = vst [vmem:[#allocation2 + $0x98] sm:$0xff] (!%p5975_p8), %v7666_v0 }
  0x2a   : > { %s9382_s12 = smov (!%p5955_p1, %s446_s12), %s9380_s11  ;;  %s5963_s11 = sshll.u32 %s455_s13, 8  ;;  %559 = vst [vmem:[#allocation2 + $0xa0] sm:$0xff] (!%p5975_p8), %v7666_v0  ;;  %560 = vst [vmem:[#allocation2 + $0xa8] sm:$0xff] (!%p5975_p8), %v7666_v0 }
  0x2b   : > { %s448_s7 = sadd.s32 %s7644_s22, %s9382_s12  ;;  %p497_p2 = scmp.lt.s32.totalorder %s9382_s12, 2  ;;  %561 = vst [vmem:[#allocation2 + $0xb0] sm:$0xff] (!%p5975_p8), %v7666_v0  ;;  %562 = vst [vmem:[#allocation2 + $0xb8] sm:$0xff] (!%p5975_p8), %v7666_v0 }
  0x2c   : > { %s7796_s6 = sadd.s32 4294967295, %s448_s7  ;;  %563 = vst [vmem:[#allocation2 + $0xc0] sm:$0xff] (!%p5975_p8), %v7666_v0  ;;  %564 = vst [vmem:[#allocation2 + $0xc8] sm:$0xff] (!%p5975_p8), %v7666_v0 }
  0x2d   : > { %p450_p3 = scmp.gt.s32.totalorder %s7796_s6, 0  ;;  %p5957_p4 = scmp.lt.s32.totalorder %s7796_s6, 7  ;;  %565 = vst [vmem:[#allocation2 + $0xd0] sm:$0xff] (!%p5975_p8), %v7666_v0  ;;  %566 = vst [vmem:[#allocation2 + $0xd8] sm:$0xff] (!%p5975_p8), %v7666_v0 }
  0x2e   : > { %s9384_s12 = smov (!%p497_p2, %s9382_s12), 2  ;;  %567 = vst [vmem:[#allocation2 + $0xe0] sm:$0xff] (!%p5975_p8), %v7666_v0  ;;  %568 = vst [vmem:[#allocation2 + $0xe8] sm:$0xff] (!%p5975_p8), %v7666_v0 }
  0x2f   : > { %s451_s16 = scalar_select %p450_p3, %s7796_s6, 0 }
  0x30   : > { %s7398_s28 = smul.u32 288, %s9384_s12  ;;  %569 = vst [vmem:[#allocation2 + $0xf0] sm:$0xff] (!%p5975_p8), %v7666_v0  ;;  %570 = vst [vmem:[#allocation2 + $0xf8] sm:$0xff] (!%p5975_p8), %v7666_v0 }
  0x31   : > { %s9386_s16 = smov (!%p5957_p4, %s451_s16), 7  ;;  %572 = vst.msk [vmem:[#allocation3] sm:$0xff] (!%p5975_p8), %vm571_vm0, %v7666_v0  ;;  %573 = vst.msk [vmem:[#allocation3 + $0x8] sm:$0xff] (!%p5975_p8), %vm571_vm0, %v7666_v0 }
  0x32   : > { %s7804_s15 = scalar_lea.vmem %s9184_s3, %s7398_s28  ;;  %p456_p5 = scmp.lt.s32.totalorder %s9386_s16, 7  ;;  %574 = vst.msk [vmem:[#allocation3 + $0x10] sm:$0xff] (!%p5975_p8), %vm571_vm0, %v7666_v0  ;;  %575 = vst.msk [vmem:[#allocation3 + $0x118] sm:$0xff] (!%p5975_p8), %vm571_vm0, %v7666_v0 }
  0x33   : > { %538 = sbr.rel (%p5975_p8) target bundleno = 58 (0x3a), region = 44  ;;  %576 = vst.msk [vmem:[#allocation3 + $0x120] sm:$0xff] (!%p5975_p8), %vm571_vm0, %v7666_v0 }
  0x34   : > { %s9388_s16 = smov (!%p456_p5, %s9386_s16), 7  ;;  %578 = vst.msk [vmem:[#allocation3 + $0x128] sm:$0x1] (!%p5975_p8), %vm577_vm1, %v7666_v0 }
  0x35   : > { %s5962_s30 = sshll.u32 %s9388_s16, 5 }
  0x36   : > { %s460_s7 = sadd.s32 %s5963_s11, %s5962_s30 }
  0x37   : > { %s5964_s26 = sshll.u32 %s460_s7, 2 }
  0x38   : > { %s7809_s14 = scalar_lea.vmem %s9181_s0, %s5964_s26 }
  0x3a PF: > { %p579_p9 = scmp.ge.s32.totalorder %s7796_s6, 0  ;;  %p580_p10 = scmp.lt.s32.totalorder %s7796_s6, 8 }
  0x3c   : > { %p581_p11 = pnand %p580_p10, %p579_p9 }
  0x3e   : > { %584 = sbr.rel (%p581_p11) target bundleno = 878 (0x36e), region = 48 }
  0x45   : > { %v7494_v1 = vld [vmem:[%s9182_s1] sm:$0xff]   ;;  %v7495_v2 = vld [vmem:[%s9182_s1 + $0x8] sm:$0xff]   ;;  %v7496_v3 = vld [vmem:[%s9182_s1 + $0x10] sm:$0xff]   ;;  %v1074_v27 = vlaneseq  ;;  %vm7667_vm3 = vmmov 1   ;;  %v7668_v40 = vmov 0   ;;  %vm1041_vm14 = vcmask 523264  }
  0x46   : > { %6510 = vmatprep.subr.bf16.mxu0 %v7494_v1  ;;  %v7497_v4 = vld [vmem:[%s9182_s1 + $0x18] sm:$0xff]   ;;  %v7502_v5 = vld [vmem:[%s7809_s14] sm:$0xff]   ;;  %v7499_v7 = vld [vmem:[%s9182_s1 + $0x28] sm:$0xff]  }
  0x47   : > { %6511 = vmatpush3.bf16.msra.mxu0 %v7494_v1  ;;  %6526 = vmatprep.mubr.bf16.mxu0 %v7502_v5  ;;  %v7498_v6 = vld [vmem:[%s9182_s1 + $0x20] sm:$0xff]   ;;  %v7500_v8 = vld [vmem:[%s9182_s1 + $0x30] sm:$0xff]   ;;  %v7501_v9 = vld [vmem:[%s9182_s1 + $0x38] sm:$0xff]   ;;  %v7866_v29 = vshrl.u32 %v1074_v27, 7 }
  0x48   : > { %6512 = vmatprep.subr.bf16.mxu0 %v7495_v2  ;;  %v7503_v10 = vld [vmem:[%s7809_s14 + $0x8] sm:$0xff]   ;;  %v7504_v11 = vld [vmem:[%s7809_s14 + $0x10] sm:$0xff]   ;;  %v7505_v12 = vld [vmem:[%s7809_s14 + $0x18] sm:$0xff]  }
  0x49   : > { %v7506_v13 = vld [vmem:[%s7809_s14 + $0x20] sm:$0xff]   ;;  %v7507_v14 = vld [vmem:[%s7809_s14 + $0x28] sm:$0xff]   ;;  %v7508_v15 = vld [vmem:[%s7809_s14 + $0x30] sm:$0xff]   ;;  %v1077_v31 = vadd.s32 16, %v7866_v29  ;;  %v1111_v33 = vand.u32 15, %v7866_v29  ;;  %v1079_v34 = vadd.s32 32, %v7866_v29 }
  0x4a   : > { %v7509_v16 = vld [vmem:[%s7809_s14 + $0x38] sm:$0xff]   ;;  %v7510_v17 = vld [vmem:[%s7809_s14 + $0x40] sm:$0xff]   ;;  %v7511_v18 = vld [vmem:[%s7809_s14 + $0x48] sm:$0xff]   ;;  %v1076_v35 = vadd.s32 8, %v7866_v29  ;;  %v1078_v42 = vadd.s32 24, %v7866_v29  ;;  %v1080_v62 = vadd.s32 40, %v7866_v29 }
  0x4b   : > { %6513 = vmatpush3.bf16.msra.mxu0 %v7495_v2  ;;  %v7512_v19 = vld [vmem:[%s7809_s14 + $0x50] sm:$0xff]   ;;  %v7513_v20 = vld [vmem:[%s7809_s14 + $0x58] sm:$0xff]   ;;  %v7514_v21 = vld [vmem:[%s7809_s14 + $0x60] sm:$0xff]   ;;  %v1125_v37 = vand.u32 15, %v1077_v31  ;;  %vm1539_vm2 = vcmp.gt.s32.totalorder %v1111_v33, 0  ;;  %v1139_v38 = vand.u32 15, %v1079_v34 }
  0x4c   : > { %6514 = vmatprep.subr.bf16.mxu0 %v7496_v3  ;;  %v7515_v22 = vld [vmem:[%s7809_s14 + $0x68] sm:$0xff]   ;;  %v7516_v23 = vld [vmem:[%s7809_s14 + $0x70] sm:$0xff]   ;;  %v7517_v24 = vld [vmem:[%s7809_s14 + $0x78] sm:$0xff]   ;;  %v1118_v39 = vand.u32 15, %v1076_v35  ;;  %v1132_v52 = vand.u32 15, %v1078_v42  ;;  %v1081_v63 = vadd.s32 48, %v7866_v29 }
  0x4d   : > { %v7518_v25 = vld [vmem:[%s7804_s15] sm:$0xff]   ;;  %v7520_v28 = vld [vmem:[%s7804_s15 + $0x8] sm:$0xff]   ;;  %v7522_v32 = vld [vmem:[%s7804_s15 + $0x10] sm:$0xff]   ;;  %vm1541_vm6 = vcmp.gt.s32.totalorder %v1125_v37, 0  ;;  %vm7881_vm8 = vcmp.gt.s32.totalorder %v1139_v38, 0  ;;  %v1083_v0 = vadd.s32 64, %v7866_v29 }
  0x4e   : > { %v7519_v26 = vld [vmem:[%s7804_s15 + $0x60] sm:$0xff]   ;;  %v7521_v30 = vld [vmem:[%s7804_s15 + $0x68] sm:$0xff]   ;;  %v7523_v36 = vld [vmem:[%s7804_s15 + $0x70] sm:$0xff]   ;;  %vm7885_vm9 = vcmp.lt.s32.totalorder %v1118_v39, 15  ;;  %vm2552_vm13 = vcmp.lt.s32.totalorder %v1132_v52, 15  ;;  %v1146_v2 = vand.u32 15, %v1080_v62 }
  0x4f   : > { %6515 = vmatpush3.bf16.msra.mxu0 %v7496_v3  ;;  %6678 = vmatprep.subr.bf16.mxu1 %v7519_v26  ;;  %vm1636_vm4 = vmpackc.low %vm7667_vm3, %vm7667_vm3  ;;  %v7524_v43 = vld [vmem:[%s7804_s15 + $0x18] sm:$0xff]   ;;  %v1491_v48 = vld [vmem:[#allocation3 + $0x7] sm:$0xff]  ;;  %v1153_v3 = vand.u32 15, %v1081_v63  ;;  %v1082_v5 = vadd.s32 56, %v7866_v29  ;;  %v1088_v35 = vadd.s32 104, %v7866_v29  ;;  %v1090_v39 = vadd.s32 120, %v7866_v29 }
  0x50   : > { %6516 = vmatprep.subr.bf16.mxu0 %v7497_v4  ;;  %6679 = vmatpush3.bf16.msra.mxu1 %v7519_v26  ;;  %vm1635_vm5 = vmpackc.low %vm1539_vm2, %vm1539_vm2  ;;  %v7876_v41 = vsel %vm1636_vm4, 65537, %v7668_v40  ;;  %v7525_v47 = vld [vmem:[%s7804_s15 + $0x78] sm:$0xff]   ;;  %v1492_v49 = vld [vmem:[#allocation3 + $0xf] sm:$0xff]  ;;  %vm2554_vm0 = vcmp.lt.s32.totalorder %v1146_v2, 15  ;;  %v1094_v2 = vadd.s32 152, %v7866_v29 }
  0x51   : > { %6680 = vmatprep.subr.bf16.mxu1 %v7521_v30  ;;  %v1667_v44 = vsel %vm1635_vm5, 65537, %v7668_v40  ;;  %vm1637_vm7 = vmpackc.low %vm1541_vm6, %vm1541_vm6  ;;  %v1523_v53 = vpack.c.bf16 %v1492_v49, %v1491_v48  ;;  %vm1545_vm1 = vcmp.gt.s32.totalorder %v1153_v3, 0  ;;  %v1202_v38 = vand.u32 15, %v1088_v35 }
  0x52   : > { %v6001_v50 = vcombine.low %v1667_v44, %v7876_v41  ;;  %v7892_v51 = vsel %vm1637_vm7, 65537, %v7668_v40  ;;  %vm1639_vm10 = vmpackc.low %vm7881_vm8, %vm7881_vm8  ;;  %v1216_v45 = vand.u32 15, %v1090_v39  ;;  %v1095_v48 = vadd.s32 160, %v7866_v29 }
  0x53   : > { %6517 = vmatpush3.bf16.msra.mxu0 %v7497_v4  ;;  %v6002_v54 = vcombine.low %v7892_v51, %v7876_v41  ;;  %v7904_v56 = vsel %vm1639_vm10, 65537, %v7668_v40  ;;  %vm2646_vm12 = vmpackc.low %vm7885_vm9, %vm7885_vm9  ;;  %v1167_v4 = vand.u32 15, %v1083_v0 }
  0x54   : > { %6518 = vmatprep.subr.bf16.mxu0 %v7498_v6  ;;  %6681 = vmatpush3.bf16.msra.mxu1 %v7521_v30  ;;  %vm7899_vm11 = vcmp.ne.s16.totalorder %v6001_v50, 0  ;;  %v6003_v58 = vcombine.low %v7904_v56, %v7876_v41  ;;  %v7914_v59 = vsel %vm2646_vm12, 65537, %v7668_v40  ;;  %vm2648_vm15 = vmpackc.low %vm2552_vm13, %vm2552_vm13  ;;  %v1091_v30 = vadd.s32 128, %v7866_v29 }
  0x55   : > { %6682 = vmatprep.subr.bf16.mxu1 %v7523_v36  ;;  %v1763_v57 = vsel %vm7899_vm11, %v1523_v53, 0  ;;  %v7920_v61 = vsel %vm2648_vm15, 65537, %v7668_v40  ;;  %vm1547_vm2 = vcmp.gt.s32.totalorder %v1167_v4, 0  ;;  %vm2650_vm3 = vmpackc.low %vm2554_vm0, %vm2554_vm0  ;;  %v1251_v53 = vand.u32 15, %v1095_v48 }
  0x56   : > { %vm1641_vm4 = vmpackc.low %vm1545_vm1, %vm1545_vm1  ;;  %v1223_v34 = vand.u32 15, %v1091_v30  ;;  %v1101_v48 = vadd.s32 208, %v7866_v29 }
  0x57   : > { %6519 = vmatpush3.bf16.msra.mxu0 %v7498_v6  ;;  %v7929_v6 = vld [vmem:[%s7804_s15 + $0x80] sm:$0xff]   ;;  %vm1643_vm5 = vmpackc.low %vm1547_vm2, %vm1547_vm2 }
  0x58   : > { %6520 = vmatprep.subr.bf16.mxu0 %v7499_v7  ;;  %6683 = vmatpush3.bf16.msra.mxu1 %v7523_v36 }
  0x59   : > { %6684 = vmatprep.subr.bf16.mxu1 %v7525_v47 }
  0x5b   : > { %6521 = vmatpush3.bf16.msra.mxu0 %v7499_v7  ;;  %v7932_v7 = vsel %vm2650_vm3, 65537, %v7668_v40  ;;  %vm1555_vm3 = vcmp.gt.s32.totalorder %v1223_v34, 0  ;;  %v1098_v34 = vadd.s32 184, %v7866_v29 }
  0x5c   : > { %6522 = vmatprep.subr.bf16.mxu0 %v7500_v8  ;;  %6685 = vmatpush3.bf16.msra.mxu1 %v7525_v47  ;;  %v1093_v47 = vadd.s32 144, %v7866_v29 }
  0x5d   : > { %6718 = vmatprep.subr.bf16.mxu1 %v7929_v6 }
  0x5e   : > { %v1237_v52 = vand.u32 15, %v1093_v47 }
  0x5f   : > { %6523 = vmatpush3.bf16.msra.mxu0 %v7500_v8  ;;  %v7935_v8 = vsel %vm1641_vm4, 65537, %v7668_v40 }
  0x60   : > { %6524 = vmatprep.subr.bf16.mxu0 %v7501_v9 }
  0x63   : > { %6525 = vmatpush3.bf16.msra.mxu0 %v7501_v9 }
  0x64   : > { %6558 = vmatprep.subr.bf16.mxu0 %v7518_v25 }
  0x66   : > { %6527 = vmatmul.mubr.bf16.vlgmr.msra.gmra.mrb[0].mxu0 %v7503_v10  ;;  %v1160_v10 = vand.u32 15, %v1082_v5 }
  0x67   : > { %6530 = vmatprep.mubr.bf16.mxu0 %v7504_v11  ;;  %6559 = vmatpush3.bf16.msra.mxu0 %v7518_v25  ;;  %v6004_v11 = vcombine.low %v7935_v8, %v7876_v41 }
  0x68   : > { %6560 = vmatprep.subr.bf16.mxu0 %v7520_v28  ;;  %vm2556_vm6 = vcmp.lt.s32.totalorder %v1160_v10, 15  ;;  %v1244_v10 = vand.u32 15, %v1094_v2 }
  0x69   : > { %vm2652_vm7 = vmpackc.low %vm2556_vm6, %vm2556_vm6  ;;  %vm2562_vm6 = vcmp.lt.s32.totalorder %v1202_v38, 15 }
  0x6b   : > { %6561 = vmatpush3.bf16.msra.mxu0 %v7520_v28  ;;  %v1089_v28 = vadd.s32 112, %v7866_v29 }
  0x6c   : > { %6562 = vmatprep.subr.bf16.mxu0 %v7522_v32 }
  0x6d   : > { %v1209_v33 = vand.u32 15, %v1089_v28 }
  0x6e   : > { %6531 = vmatmul.mubr.bf16.gmra.mrb[4].mxu0 %v7505_v12  ;;  %v7943_v12 = vsel %vm1643_vm5, 65537, %v7668_v40  ;;  %vm1651_vm5 = vmpackc.low %vm1555_vm3, %vm1555_vm3 }
  0x6f   : > { %6534 = vmatprep.mubr.bf16.mxu0 %v7506_v13  ;;  %6563 = vmatpush3.bf16.msra.mxu0 %v7522_v32  ;;  %v6005_v13 = vcombine.low %v7943_v12, %v7876_v41  ;;  %vm1553_vm2 = vcmp.gt.s32.totalorder %v1209_v33, 0  ;;  %v7986_v44 = vsel %vm1651_vm5, 65537, %v7668_v40 }
  0x70   : > { %6564 = vmatprep.subr.bf16.mxu0 %v7524_v43  ;;  %vm1649_vm4 = vmpackc.low %vm1553_vm2, %vm1553_vm2  ;;  %v6009_v46 = vcombine.low %v7986_v44, %v7876_v41  ;;  %vm2568_vm2 = vcmp.lt.s32.totalorder %v1244_v10, 15  ;;  %v1100_v10 = vadd.s32 200, %v7866_v29 }
  0x71   : > { %v7981_v42 = vsel %vm1649_vm4, 65537, %v7668_v40  ;;  %vm2664_vm3 = vmpackc.low %vm2568_vm2, %vm2568_vm2 }
  0x72   : > { %v8023_v28 = vsel %vm2664_vm3, 65537, %v7668_v40 }
  0x73   : > { %6565 = vmatpush3.bf16.msra.mxu0 %v7524_v43  ;;  %v6008_v43 = vcombine.low %v7981_v42, %v7876_v41  ;;  %v9241_v42 = vmov 0 }
  0x76   : > { %6535 = vmatmul.mubr.bf16.gmra.mrb[8].mxu0 %v7507_v14  ;;  %v1085_v14 = vadd.s32 80, %v7866_v29 }
  0x77   : > { %6538 = vmatprep.mubr.bf16.mxu0 %v7508_v15  ;;  %v1087_v15 = vadd.s32 96, %v7866_v29 }
  0x7e   : > { %6539 = vmatmul.mubr.bf16.gmra.mrb[12].mxu0 %v7509_v16  ;;  %v1181_v16 = vand.u32 15, %v1085_v14 }
  0x7f   : > { %6542 = vmatprep.mubr.bf16.mxu0 %v7510_v17  ;;  %v1195_v17 = vand.u32 15, %v1087_v15  ;;  %v1097_v15 = vadd.s32 176, %v7866_v29 }
  0x80   : > { %vm1549_vm8 = vcmp.gt.s32.totalorder %v1181_v16, 0  ;;  %v1099_v16 = vadd.s32 192, %v7866_v29 }
  0x81   : > { %vm1551_vm9 = vcmp.gt.s32.totalorder %v1195_v17, 0  ;;  %vm1645_vm10 = vmpackc.low %vm1549_vm8, %vm1549_vm8  ;;  %vm2564_vm8 = vcmp.lt.s32.totalorder %v1216_v45, 15  ;;  %v1272_v45 = vand.u32 15, %v1098_v34 }
  0x82   : > { %vm1647_vm12 = vmpackc.low %vm1551_vm9, %vm1551_vm9 }
  0x83   : > { %v7962_v25 = vsel %vm1647_vm12, 65537, %v7668_v40  ;;  %vm2660_vm9 = vmpackc.low %vm2564_vm8, %vm2564_vm8  ;;  %vm1559_vm12 = vcmp.gt.s32.totalorder %v1251_v53, 0 }
  0x84   : > { %v6007_v27 = vcombine.low %v7962_v25, %v7876_v41  ;;  %v7999_v62 = vsel %vm2660_vm9, 65537, %v7668_v40 }
  0x86   : > { %6543 = vmatmul.mubr.bf16.gmra.mrb[16].mxu0 %v7511_v18  ;;  %v1084_v18 = vadd.s32 72, %v7866_v29 }
  0x87   : > { %6546 = vmatprep.mubr.bf16.mxu0 %v7512_v19  ;;  %v7951_v19 = vsel %vm2652_vm7, 65537, %v7668_v40  ;;  %vm2658_vm7 = vmpackc.low %vm2562_vm6, %vm2562_vm6 }
  0x88   : > { %v7993_v49 = vsel %vm2658_vm7, 65537, %v7668_v40 }
  0x8e   : > { %6547 = vmatmul.mubr.bf16.gmra.mrb[20].mxu0 %v7513_v20 }
  0x8f   : > { %6550 = vmatprep.mubr.bf16.mxu0 %v7514_v21  ;;  %v1174_v21 = vand.u32 15, %v1084_v18 }
  0x91   : > { %vm2558_vm13 = vcmp.lt.s32.totalorder %v1174_v21, 15  ;;  %v1265_v21 = vand.u32 15, %v1097_v15 }
  0x92   : > { %vm2654_vm15 = vmpackc.low %vm2558_vm13, %vm2558_vm13 }
  0x93   : > { %v7969_v31 = vsel %vm2654_vm15, 65537, %v7668_v40  ;;  %vm1655_vm15 = vmpackc.low %vm1559_vm12, %vm1559_vm12  ;;  %vm1561_vm4 = vcmp.gt.s32.totalorder %v1265_v21, 0  ;;  %v1286_v21 = vand.u32 15, %v1100_v10 }
  0x94   : > { %v8010_v5 = vsel %vm1655_vm15, 65537, %v7668_v40  ;;  %vm1657_vm6 = vmpackc.low %vm1561_vm4, %vm1561_vm4 }
  0x95   : > { %v6011_v14 = vcombine.low %v8010_v5, %v7876_v41  ;;  %v8029_v35 = vsel %vm1657_vm6, 65537, %v7668_v40  ;;  %vm2574_vm2 = vcmp.lt.s32.totalorder %v1286_v21, 15 }
  0x96   : > { %6551 = vmatmul.mubr.bf16.gmra.mrb[24].mxu0 %v7515_v22  ;;  %v1086_v22 = vadd.s32 88, %v7866_v29  ;;  %v6012_v38 = vcombine.low %v8029_v35, %v7876_v41  ;;  %vm2670_vm3 = vmpackc.low %vm2574_vm2, %vm2574_vm2  ;;  %v9250_v35 = vmov 0 }
  0x97   : > { %6554 = vmatprep.mubr.bf16.mxu0 %v7516_v23  ;;  %v7957_v23 = vsel %vm1645_vm10, 65537, %v7668_v40  ;;  %vm1557_vm10 = vcmp.gt.s32.totalorder %v1237_v52, 0  ;;  %v1103_v52 = vadd.s32 224, %v7866_v29 }
  0x98   : > { %v1188_v26 = vand.u32 15, %v1086_v22  ;;  %vm1653_vm13 = vmpackc.low %vm1557_vm10, %vm1557_vm10  ;;  %v1279_v22 = vand.u32 15, %v1099_v16  ;;  %vm2572_vm10 = vcmp.lt.s32.totalorder %v1272_v45, 15  ;;  %v1105_v45 = vadd.s32 240, %v7866_v29 }
  0x99   : > { %v8005_v3 = vsel %vm1653_vm13, 65537, %v7668_v40  ;;  %v1307_v2 = vand.u32 15, %v1103_v52  ;;  %vm2668_vm12 = vmpackc.low %vm2572_vm10, %vm2572_vm10  ;;  %v8062_v52 = vld [vmem:[%s7804_s15 + $0x20] sm:$0xff]   ;;  %v1104_v16 = vadd.s32 232, %v7866_v29 }
  0x9a   : > { %vm2560_vm0 = vcmp.lt.s32.totalorder %v1188_v26, 15  ;;  %v6010_v4 = vcombine.low %v8005_v3, %v7876_v41  ;;  %v1096_v26 = vadd.s32 168, %v7866_v29  ;;  %vm1563_vm5 = vcmp.gt.s32.totalorder %v1279_v22, 0  ;;  %6598 = vmatprep.subr.bf16.mxu0 %v8062_v52 }
  0x9b   : > { %vm2656_vm1 = vmpackc.low %vm2560_vm0, %vm2560_vm0  ;;  %v8047_v15 = vsel %vm2668_vm12, 65537, %v7668_v40  ;;  %vm1567_vm15 = vcmp.gt.s32.totalorder %v1307_v2, 0  ;;  %v1102_v22 = vadd.s32 216, %v7866_v29  ;;  %v8067_v2 = vsel %vm2670_vm3, 65537, %v7668_v40 }
  0x9c   : > { %v7975_v36 = vsel %vm2656_vm1, 65537, %v7668_v40  ;;  %v1258_v33 = vand.u32 15, %v1096_v26  ;;  %vm1659_vm7 = vmpackc.low %vm1563_vm5, %vm1563_vm5  ;;  %v1321_v10 = vand.u32 15, %v1105_v45  ;;  %v1314_v45 = vand.u32 15, %v1104_v16 }
  0x9d   : > { %v8034_v39 = vsel %vm1659_vm7, 65537, %v7668_v40  ;;  %v9245_v3 = vmov 0 }
  0x9e   : > { %6555 = vmatmul.mubr.bf16.gmra.mrb[28].mxu0 %v7517_v24  ;;  %v6006_v24 = vcombine.low %v7957_v23, %v7876_v41  ;;  %vm2570_vm8 = vcmp.lt.s32.totalorder %v1258_v33, 15  ;;  %vm1569_vm6 = vcmp.gt.s32.totalorder %v1321_v10, 0  ;;  %v9237_v23 = vmov 0 }
  0x9f   : > { %6566 = vmatprep.mubr.msk.bf16.mxu0 %vm1041_vm14, %v1763_v57  ;;  %v1092_v57 = vadd.s32 136, %v7866_v29  ;;  %vm2666_vm9 = vmpackc.low %vm2570_vm8, %vm2570_vm8  ;;  %vm2578_vm8 = vcmp.lt.s32.totalorder %v1314_v45, 15 }
  0xa0   : > { %v8041_v53 = vsel %vm2666_vm9, 65537, %v7668_v40  ;;  %vm1665_vm7 = vmpackc.low %vm1569_vm6, %vm1569_vm6  ;;  %vm8117_vm6 = vcmp.ne.s16.totalorder %v6002_v54, 0  ;;  %v7531_v54 = vld [vmem:[%s7804_s15 + $0x28] sm:$0xff]  }
  0xa1   : > { %v1230_v0 = vand.u32 15, %v1092_v57  ;;  %v1106_v57 = vadd.s32 248, %v7866_v29  ;;  %v8080_v18 = vsel %vm1665_vm7, 65537, %v7668_v40  ;;  %vm2674_vm9 = vmpackc.low %vm2578_vm8, %vm2578_vm8  ;;  %vm8127_vm7 = vcmp.ne.s16.totalorder %v6003_v58, 0 }
  0xa2   : > { %v8085_v10 = vsel %vm2674_vm9, 65537, %v7668_v40 }
  0xa3   : > { %vm2566_vm0 = vcmp.lt.s32.totalorder %v1230_v0, 15  ;;  %v1293_v0 = vand.u32 15, %v1101_v48  ;;  %v1300_v48 = vand.u32 15, %v1102_v22 }
  0xa4   : > { %vm2662_vm1 = vmpackc.low %vm2566_vm0, %vm2566_vm0 }
  0xa5   : > { %v8017_v17 = vsel %vm2662_vm1, 65537, %v7668_v40  ;;  %vm1565_vm13 = vcmp.gt.s32.totalorder %v1293_v0, 0  ;;  %vm1663_vm1 = vmpackc.low %vm1567_vm15, %vm1567_vm15  ;;  %vm2576_vm4 = vcmp.lt.s32.totalorder %v1300_v48, 15  ;;  %v1328_v48 = vand.u32 15, %v1106_v57  ;;  %v8097_v57 = vld [vmem:[%s9183_s2] ss:$0 sm:$0xff] }
  0xa6   : > { %vm1661_vm0 = vmpackc.low %vm1565_vm13, %vm1565_vm13  ;;  %v8058_v34 = vsel %vm1663_vm1, 65537, %v7668_v40 }
  0xa7   : > { %v8053_v26 = vsel %vm1661_vm0, 65537, %v7668_v40  ;;  %vm2672_vm5 = vmpackc.low %vm2576_vm4, %vm2576_vm4  ;;  %vm2580_vm10 = vcmp.lt.s32.totalorder %v1328_v48, 15 }
  0xa8   : > { %v8074_v22 = vsel %vm2672_vm5, 65537, %v7668_v40  ;;  %vm2676_vm12 = vmpackc.low %vm2580_vm10, %vm2580_vm10 }
  0xa9   : > { %v8090_v30 = vsel %vm2676_vm12, 65537, %v7668_v40 }
 0x139   : > { %v6528_v45 = vpop.f32.mrb[0].mxu0 }
 0x13a   : > { %v827_v48 = vadd.f32 %v6528_v45, %v8097_v57  ;;  %v818_v63 = vpop.f32.mrb[1].mxu0 }
 0x13b   : > { %v819_v50 = vadd.f32 %v8097_v57, %v818_v63  ;;  %v6529_v37 = vpop.f32.mrb[2].mxu0 }
 0x13c   : > { %vm947_vm13 = vcmp.ge.f32.partialorder %v827_v48, 0.0  ;;  %v979_v32 = vmul.f32 0.1, %v827_v48  ;;  %v830_v40 = vadd.f32 %v6529_v37, %v8097_v57  ;;  %v821_v20 = vpop.f32.mrb[3].mxu0 }
 0x13d   : > { %vm945_vm15 = vcmp.ge.f32.partialorder %v819_v50, 0.0  ;;  %v977_v9 = vmul.f32 0.1, %v819_v50  ;;  %v822_v16 = vadd.f32 %v8097_v57, %v821_v20 }
 0x13e   : > { %v1011_v1 = vsel %vm947_vm13, %v827_v48, %v979_v32  ;;  %vm948_vm0 = vcmp.ge.f32.partialorder %v830_v40, 0.0  ;;  %v980_v60 = vmul.f32 0.1, %v830_v40  ;;  %vm8156_vm13 = vcmp.ne.s16.totalorder %v6004_v11, 0 }
 0x13f   : > { %1044 = vst.msk [vmem:[#allocation3 + $0x28] sm:$0xff] %vm1041_vm14, %v1011_v1  ;;  %v1009_v29 = vsel %vm945_vm15, %v819_v50, %v977_v9  ;;  %vm946_vm1 = vcmp.ge.f32.partialorder %v822_v16, 0.0  ;;  %v978_v45 = vmul.f32 0.1, %v822_v16  ;;  %vm8167_vm15 = vcmp.ne.s16.totalorder %v6005_v13, 0 }
 0x140   : > { %1042 = vst.msk [vmem:[#allocation3 + $0x18] sm:$0xff] %vm1041_vm14, %v1009_v29  ;;  %v1012_v63 = vsel %vm948_vm0, %v830_v40, %v980_v60 }
 0x141   : > { %1045 = vst.msk [vmem:[#allocation3 + $0x30] sm:$0xff] %vm1041_vm14, %v1012_v63  ;;  %v1010_v21 = vsel %vm946_vm1, %v822_v16, %v978_v45  ;;  %v6532_v37 = vpop.f32.mrb[4].mxu0 }
 0x142   : > { %1043 = vst.msk [vmem:[#allocation3 + $0x20] sm:$0xff] %vm1041_vm14, %v1010_v21  ;;  %v843_v0 = vadd.f32 %v6532_v37, %v8097_v57  ;;  %v834_v20 = vpop.f32.mrb[5].mxu0 }
 0x143   : > { %v835_v32 = vadd.f32 %v8097_v57, %v834_v20  ;;  %v6533_v48 = vpop.f32.mrb[6].mxu0 }
 0x144   : > { %vm951_vm2 = vcmp.ge.f32.partialorder %v843_v0, 0.0  ;;  %v983_v1 = vmul.f32 0.1, %v843_v0  ;;  %v846_v9 = vadd.f32 %v6533_v48, %v8097_v57  ;;  %v837_v50 = vpop.f32.mrb[7].mxu0 }
 0x145   : > { %vm949_vm3 = vcmp.ge.f32.partialorder %v835_v32, 0.0  ;;  %v981_v29 = vmul.f32 0.1, %v835_v32  ;;  %v838_v60 = vadd.f32 %v8097_v57, %v837_v50 }
 0x146   : > { %v1015_v40 = vsel %vm951_vm2, %v843_v0, %v983_v1  ;;  %vm952_vm4 = vcmp.ge.f32.partialorder %v846_v9, 0.0  ;;  %v984_v16 = vmul.f32 0.1, %v846_v9 }
 0x147   : > { %1048 = vst.msk [vmem:[#allocation3 + $0x48] sm:$0xff] %vm1041_vm14, %v1015_v40  ;;  %v1013_v21 = vsel %vm949_vm3, %v835_v32, %v981_v29  ;;  %vm950_vm5 = vcmp.ge.f32.partialorder %v838_v60, 0.0  ;;  %v982_v45 = vmul.f32 0.1, %v838_v60  ;;  %v1493_v33 = vld [vmem:[#allocation3 + $0x17] sm:$0xff] }
 0x148   : > { %1046 = vst.msk [vmem:[#allocation3 + $0x38] sm:$0xff] %vm1041_vm14, %v1013_v21  ;;  %v1016_v63 = vsel %vm952_vm4, %v846_v9, %v984_v16  ;;  %v1496_v37 = vld [vmem:[#allocation3 + $0x2f] sm:$0xff]  ;;  %vm8196_vm4 = vcmp.ne.s16.totalorder %v6006_v24, 0 }
 0x149   : > { %1049 = vst.msk [vmem:[#allocation3 + $0x50] sm:$0xff] %vm1041_vm14, %v1016_v63  ;;  %v1014_v20 = vsel %vm950_vm5, %v838_v60, %v982_v45  ;;  %v6536_v48 = vpop.f32.mrb[8].mxu0  ;;  %v1494_v47 = vld [vmem:[#allocation3 + $0x1f] sm:$0xff]  ;;  %v1495_v32 = vld [vmem:[#allocation3 + $0x27] sm:$0xff]  ;;  %vm8209_vm5 = vcmp.ne.s16.totalorder %v6007_v27, 0 }
 0x14a   : > { %1047 = vst.msk [vmem:[#allocation3 + $0x40] sm:$0xff] %vm1041_vm14, %v1014_v20  ;;  %v859_v1 = vadd.f32 %v6536_v48, %v8097_v57  ;;  %v850_v9 = vpop.f32.mrb[9].mxu0  ;;  %v1524_v50 = vpack.c.bf16 %v1494_v47, %v1493_v33  ;;  %v1525_v29 = vpack.c.bf16 %v1496_v37, %v1495_v32  ;;  %v7527_v48 = vld [vmem:[%s7804_s15 + $0x88] sm:$0xff]   ;;  %v9238_v23 = vsel %vm8209_vm5, 4294967295, %v9237_v23 }
 0x14b   : > { %v851_v60 = vadd.f32 %v8097_v57, %v850_v9  ;;  %v6537_v40 = vpop.f32.mrb[10].mxu0 }
 0x14c   : > { %vm955_vm8 = vcmp.ge.f32.partialorder %v859_v1, 0.0  ;;  %v987_v16 = vmul.f32 0.1, %v859_v1  ;;  %v862_v21 = vadd.f32 %v6537_v40, %v8097_v57  ;;  %v853_v45 = vpop.f32.mrb[11].mxu0  ;;  %v1764_v47 = vsel %vm8117_vm6, %v1524_v50, 0 }
 0x14d   : > { %vm953_vm9 = vcmp.ge.f32.partialorder %v851_v60, 0.0  ;;  %v985_v33 = vmul.f32 0.1, %v851_v60  ;;  %v854_v63 = vadd.f32 %v8097_v57, %v853_v45  ;;  %6567 = vmatmul.mubr.msk.bf16.vlgmr.msra.gmra.mrb[32].mxu0 %vm1041_vm14, %v1764_v47  ;;  %v3174_v56 = vsel %vm7899_vm11, %v1524_v50, 0  ;;  %v7532_v50 = vld [vmem:[%s7804_s15 + $0x30] sm:$0xff]  }
 0x14e   : > { %v1019_v58 = vsel %vm955_vm8, %v859_v1, %v987_v16  ;;  %vm956_vm10 = vcmp.ge.f32.partialorder %v862_v21, 0.0  ;;  %v988_v37 = vmul.f32 0.1, %v862_v21  ;;  %6686 = vmatprep.mubr.msk.bf16.mxu1 %vm1041_vm14, %v3174_v56  ;;  %v1765_v20 = vsel %vm8127_vm7, %v1525_v29, 0  ;;  %6599 = vmatpush3.bf16.msra.mxu0 %v8062_v52 }
 0x14f   : > { %1052 = vst.msk [vmem:[#allocation3 + $0x68] sm:$0xff] %vm1041_vm14, %v1019_v58  ;;  %v1017_v32 = vsel %vm953_vm9, %v851_v60, %v985_v33  ;;  %vm954_vm12 = vcmp.ge.f32.partialorder %v854_v63, 0.0  ;;  %v986_v9 = vmul.f32 0.1, %v854_v63  ;;  %6570 = vmatprep.mubr.msk.bf16.mxu0 %vm1041_vm14, %v1765_v20  ;;  %v3175_v1 = vsel %vm8117_vm6, %v1525_v29, 0  ;;  %6600 = vmatprep.subr.bf16.mxu0 %v7531_v54  ;;  %v1497_v45 = vld [vmem:[#allocation3 + $0x37] sm:$0xff] }
 0x150   : > { %1050 = vst.msk [vmem:[#allocation3 + $0x58] sm:$0xff] %vm1041_vm14, %v1017_v32  ;;  %v1020_v40 = vsel %vm956_vm10, %v862_v21, %v988_v37  ;;  %6687 = vmatmul.mubr.msk.bf16.vlgmr.msra.gmra.mrb[0].mxu1 %vm1041_vm14, %v3175_v1  ;;  %v1500_v16 = vld [vmem:[#allocation3 + $0x4f] sm:$0xff]  ;;  %v7533_v1 = vld [vmem:[%s7804_s15 + $0x38] sm:$0xff]  }
 0x151   : > { %1053 = vst.msk [vmem:[#allocation3 + $0x70] sm:$0xff] %vm1041_vm14, %v1020_v40  ;;  %v1018_v52 = vsel %vm954_vm12, %v854_v63, %v986_v9  ;;  %6719 = vmatpush3.bf16.msra.mxu1 %v7929_v6  ;;  %v6540_v60 = vpop.f32.mrb[12].mxu0  ;;  %v1498_v47 = vld [vmem:[#allocation3 + $0x3f] sm:$0xff]  ;;  %v1499_v21 = vld [vmem:[#allocation3 + $0x47] sm:$0xff]  ;;  %v7528_v6 = vld [vmem:[%s7804_s15 + $0x90] sm:$0xff]  }
 0x152   : > { %1051 = vst.msk [vmem:[#allocation3 + $0x60] sm:$0xff] %vm1041_vm14, %v1018_v52  ;;  %v875_v33 = vadd.f32 %v6540_v60, %v8097_v57  ;;  %v866_v56 = vpop.f32.mrb[13].mxu0  ;;  %v1526_v63 = vpack.c.bf16 %v1498_v47, %v1497_v45  ;;  %v1527_v58 = vpack.c.bf16 %v1500_v16, %v1499_v21  ;;  %6720 = vmatprep.subr.bf16.mxu1 %v7527_v48  ;;  %v7530_v45 = vld [vmem:[%s7804_s15 + $0x98] sm:$0xff]  }
 0x153   : > { %6601 = vmatpush3.bf16.msra.mxu0 %v7531_v54  ;;  %v867_v37 = vadd.f32 %v8097_v57, %v866_v56  ;;  %v6541_v20 = vpop.f32.mrb[14].mxu0 }
 0x154   : > { %6602 = vmatprep.subr.bf16.mxu0 %v7532_v50  ;;  %vm959_vm0 = vcmp.ge.f32.partialorder %v875_v33, 0.0  ;;  %v991_v11 = vmul.f32 0.1, %v875_v33  ;;  %v878_v32 = vadd.f32 %v6541_v20, %v8097_v57  ;;  %v869_v9 = vpop.f32.mrb[15].mxu0  ;;  %v1766_v54 = vsel %vm8156_vm13, %v1526_v63, 0 }
 0x155   : > { %vm957_vm1 = vcmp.ge.f32.partialorder %v867_v37, 0.0  ;;  %v989_v40 = vmul.f32 0.1, %v867_v37  ;;  %v870_v16 = vadd.f32 %v8097_v57, %v869_v9  ;;  %6571 = vmatmul.mubr.msk.bf16.gmra.mrb[36].mxu0 %vm1041_vm14, %v1766_v54  ;;  %v3176_v12 = vsel %vm8127_vm7, %v1526_v63, 0  ;;  %6721 = vmatpush3.bf16.msra.mxu1 %v7527_v48  ;;  %v8190_v63 = vld [vmem:[%s7804_s15 + $0x40] sm:$0xff]  }
 0x156   : > { %v1023_v13 = vsel %vm959_vm0, %v875_v33, %v991_v11  ;;  %vm960_vm2 = vcmp.ge.f32.partialorder %v878_v32, 0.0  ;;  %v992_v52 = vmul.f32 0.1, %v878_v32  ;;  %6690 = vmatprep.mubr.msk.bf16.mxu1 %vm1041_vm14, %v3176_v12  ;;  %v1767_v60 = vsel %vm8167_vm15, %v1527_v58, 0  ;;  %6722 = vmatprep.subr.bf16.mxu1 %v7528_v6 }
 0x157   : > { %1056 = vst.msk [vmem:[#allocation3 + $0x88] sm:$0xff] %vm1041_vm14, %v1023_v13  ;;  %v1021_v47 = vsel %vm957_vm1, %v867_v37, %v989_v40  ;;  %vm958_vm3 = vcmp.ge.f32.partialorder %v870_v16, 0.0  ;;  %v990_v21 = vmul.f32 0.1, %v870_v16  ;;  %6574 = vmatprep.mubr.msk.bf16.mxu0 %vm1041_vm14, %v1767_v60  ;;  %v3177_v48 = vsel %vm8156_vm13, %v1527_v58, 0  ;;  %6603 = vmatpush3.bf16.msra.mxu0 %v7532_v50  ;;  %v1501_v11 = vld [vmem:[#allocation3 + $0x57] sm:$0xff] }
 0x158   : > { %1054 = vst.msk [vmem:[#allocation3 + $0x78] sm:$0xff] %vm1041_vm14, %v1021_v47  ;;  %v1024_v33 = vsel %vm960_vm2, %v878_v32, %v992_v52  ;;  %6691 = vmatmul.mubr.msk.bf16.gmra.mrb[4].mxu1 %vm1041_vm14, %v3177_v48  ;;  %v1504_v56 = vld [vmem:[#allocation3 + $0x6f] sm:$0xff]  ;;  %6604 = vmatprep.subr.bf16.mxu0 %v7533_v1  ;;  %v9235_v50 = vmov 0  ;;  %vm8235_vm0 = vcmp.ne.s16.totalorder %v6008_v43, 0  ;;  %vm8245_vm1 = vcmp.ne.s16.totalorder %v6009_v46, 0 }
 0x159   : > { %1057 = vst.msk [vmem:[#allocation3 + $0x90] sm:$0xff] %vm1041_vm14, %v1024_v33  ;;  %v1022_v37 = vsel %vm958_vm3, %v870_v16, %v990_v21  ;;  %v6544_v20 = vpop.f32.mrb[16].mxu0  ;;  %v1502_v9 = vld [vmem:[#allocation3 + $0x5f] sm:$0xff]  ;;  %v9236_v50 = vsel %vm8196_vm4, 4294967295, %v9235_v50  ;;  %v1503_v58 = vld [vmem:[#allocation3 + $0x67] sm:$0xff]  ;;  %6723 = vmatpush3.bf16.msra.mxu1 %v7528_v6  ;;  %v9242_v42 = vsel %vm8245_vm1, 4294967295, %v9241_v42 }
 0x15a   : > { %1055 = vst.msk [vmem:[#allocation3 + $0x80] sm:$0xff] %vm1041_vm14, %v1022_v37  ;;  %v891_v32 = vadd.f32 %v6544_v20, %v8097_v57  ;;  %v882_v54 = vpop.f32.mrb[17].mxu0  ;;  %v1528_v40 = vpack.c.bf16 %v1502_v9, %v1501_v11  ;;  %v1529_v12 = vpack.c.bf16 %v1504_v56, %v1503_v58  ;;  %6724 = vmatprep.subr.bf16.mxu1 %v7530_v45  ;;  %v8203_v16 = vld [vmem:[%s7804_s15 + $0xa0] sm:$0xff]  }
 0x15b   : > { %v883_v13 = vadd.f32 %v8097_v57, %v882_v54  ;;  %v6545_v52 = vpop.f32.mrb[18].mxu0  ;;  %6605 = vmatpush3.bf16.msra.mxu0 %v7533_v1 }
 0x15c   : > { %vm963_vm8 = vcmp.ge.f32.partialorder %v891_v32, 0.0  ;;  %v995_v24 = vmul.f32 0.1, %v891_v32  ;;  %v894_v6 = vadd.f32 %v6545_v52, %v8097_v57  ;;  %v885_v60 = vpop.f32.mrb[19].mxu0  ;;  %v1768_v47 = vsel %vm8196_vm4, %v1528_v40, 0  ;;  %6638 = vmatprep.subr.bf16.mxu0 %v8190_v63 }
 0x15d   : > { %vm961_vm9 = vcmp.ge.f32.partialorder %v883_v13, 0.0  ;;  %v993_v21 = vmul.f32 0.1, %v883_v13  ;;  %v886_v48 = vadd.f32 %v8097_v57, %v885_v60  ;;  %6575 = vmatmul.mubr.msk.bf16.gmra.mrb[40].mxu0 %vm1041_vm14, %v1768_v47  ;;  %v3178_v25 = vsel %vm8167_vm15, %v1528_v40, 0  ;;  %6725 = vmatpush3.bf16.msra.mxu1 %v7530_v45 }
 0x15e   : > { %v1027_v27 = vsel %vm963_vm8, %v891_v32, %v995_v24  ;;  %vm964_vm10 = vcmp.ge.f32.partialorder %v894_v6, 0.0  ;;  %v996_v1 = vmul.f32 0.1, %v894_v6  ;;  %6694 = vmatprep.mubr.msk.bf16.mxu1 %vm1041_vm14, %v3178_v25  ;;  %v1769_v33 = vsel %vm8209_vm5, %v1529_v12, 0  ;;  %6758 = vmatprep.subr.bf16.mxu1 %v8203_v16 }
 0x15f   : > { %1060 = vst.msk [vmem:[#allocation3 + $0xa8] sm:$0xff] %vm1041_vm14, %v1027_v27  ;;  %v1025_v56 = vsel %vm961_vm9, %v883_v13, %v993_v21  ;;  %vm962_vm12 = vcmp.ge.f32.partialorder %v886_v48, 0.0  ;;  %v994_v37 = vmul.f32 0.1, %v886_v48  ;;  %6578 = vmatprep.mubr.msk.bf16.mxu0 %vm1041_vm14, %v1769_v33  ;;  %v3179_v45 = vsel %vm8196_vm4, %v1529_v12, 0  ;;  %v1505_v32 = vld [vmem:[#allocation3 + $0x77] sm:$0xff] }
 0x160   : > { %1058 = vst.msk [vmem:[#allocation3 + $0x98] sm:$0xff] %vm1041_vm14, %v1025_v56  ;;  %v1028_v20 = vsel %vm964_vm10, %v894_v6, %v996_v1  ;;  %6695 = vmatmul.mubr.msk.bf16.gmra.mrb[8].mxu1 %vm1041_vm14, %v3179_v45  ;;  %v1508_v11 = vld [vmem:[#allocation3 + $0x8f] sm:$0xff]  ;;  %v9239_v40 = vmov 0  ;;  %vm8269_vm10 = vcmp.ne.s16.totalorder %v6010_v4, 0 }
 0x161   : > { %1061 = vst.msk [vmem:[#allocation3 + $0xb0] sm:$0xff] %vm1041_vm14, %v1028_v20  ;;  %v1026_v9 = vsel %vm962_vm12, %v886_v48, %v994_v37  ;;  %v6548_v58 = vpop.f32.mrb[20].mxu0  ;;  %v1506_v54 = vld [vmem:[#allocation3 + $0x7f] sm:$0xff]  ;;  %v9240_v40 = vsel %vm8235_vm0, 4294967295, %v9239_v40  ;;  %v1507_v12 = vld [vmem:[#allocation3 + $0x87] sm:$0xff]  ;;  %vm8279_vm12 = vcmp.ne.s16.totalorder %v6011_v14, 0 }
 0x162   : > { %1059 = vst.msk [vmem:[#allocation3 + $0xa0] sm:$0xff] %vm1041_vm14, %v1026_v9  ;;  %v907_v13 = vadd.f32 %v6548_v58, %v8097_v57  ;;  %v898_v52 = vpop.f32.mrb[21].mxu0  ;;  %v1530_v24 = vpack.c.bf16 %v1506_v54, %v1505_v32  ;;  %v1531_v6 = vpack.c.bf16 %v1508_v11, %v1507_v12  ;;  %v9246_v3 = vsel %vm8279_vm12, 4294967295, %v9245_v3 }
 0x163   : > { %v899_v60 = vadd.f32 %v8097_v57, %v898_v52  ;;  %v6549_v47 = vpop.f32.mrb[22].mxu0 }
 0x164   : > { %vm967_vm2 = vcmp.ge.f32.partialorder %v907_v13, 0.0  ;;  %v999_v43 = vmul.f32 0.1, %v907_v13  ;;  %v910_v21 = vadd.f32 %v6549_v47, %v8097_v57  ;;  %v901_v48 = vpop.f32.mrb[23].mxu0  ;;  %v1770_v25 = vsel %vm8235_vm0, %v1530_v24, 0 }
 0x165   : > { %vm965_vm3 = vcmp.ge.f32.partialorder %v899_v60, 0.0  ;;  %v997_v27 = vmul.f32 0.1, %v899_v60  ;;  %v902_v1 = vadd.f32 %v8097_v57, %v901_v48  ;;  %6579 = vmatmul.mubr.msk.bf16.gmra.mrb[44].mxu0 %vm1041_vm14, %v1770_v25  ;;  %v3180_v44 = vsel %vm8209_vm5, %v1530_v24, 0 }
 0x166   : > { %v1031_v46 = vsel %vm967_vm2, %v907_v13, %v999_v43  ;;  %vm968_vm8 = vcmp.ge.f32.partialorder %v910_v21, 0.0  ;;  %v1000_v33 = vmul.f32 0.1, %v910_v21  ;;  %6698 = vmatprep.mubr.msk.bf16.mxu1 %vm1041_vm14, %v3180_v44  ;;  %v1771_v56 = vsel %vm8245_vm1, %v1531_v6, 0 }
 0x167   : > { %1064 = vst.msk [vmem:[#allocation3 + $0xc8] sm:$0xff] %vm1041_vm14, %v1031_v46  ;;  %v1029_v37 = vsel %vm965_vm3, %v899_v60, %v997_v27  ;;  %vm966_vm9 = vcmp.ge.f32.partialorder %v902_v1, 0.0  ;;  %v998_v45 = vmul.f32 0.1, %v902_v1  ;;  %6582 = vmatprep.mubr.msk.bf16.mxu0 %vm1041_vm14, %v1771_v56  ;;  %v3181_v20 = vsel %vm8235_vm0, %v1531_v6, 0  ;;  %v1509_v54 = vld [vmem:[#allocation3 + $0x97] sm:$0xff] }
 0x168   : > { %1062 = vst.msk [vmem:[#allocation3 + $0xb8] sm:$0xff] %vm1041_vm14, %v1029_v37  ;;  %v1032_v11 = vsel %vm968_vm8, %v910_v21, %v1000_v33  ;;  %6699 = vmatmul.mubr.msk.bf16.gmra.mrb[12].mxu1 %vm1041_vm14, %v3181_v20  ;;  %v1512_v9 = vld [vmem:[#allocation3 + $0xaf] sm:$0xff]  ;;  %v9243_v13 = vmov 0 }
 0x169   : > { %1065 = vst.msk [vmem:[#allocation3 + $0xd0] sm:$0xff] %vm1041_vm14, %v1032_v11  ;;  %v1030_v58 = vsel %vm966_vm9, %v902_v1, %v998_v45  ;;  %v6552_v32 = vpop.f32.mrb[24].mxu0  ;;  %v1510_v12 = vld [vmem:[#allocation3 + $0x9f] sm:$0xff]  ;;  %v9244_v13 = vsel %vm8269_vm10, 4294967295, %v9243_v13  ;;  %v1511_v52 = vld [vmem:[#allocation3 + $0xa7] sm:$0xff] }
 0x16a   : > { %1063 = vst.msk [vmem:[#allocation3 + $0xc0] sm:$0xff] %vm1041_vm14, %v1030_v58  ;;  %v923_v24 = vadd.f32 %v6552_v32, %v8097_v57  ;;  %v914_v6 = vpop.f32.mrb[25].mxu0  ;;  %v1532_v60 = vpack.c.bf16 %v1510_v12, %v1509_v54  ;;  %v1533_v47 = vpack.c.bf16 %v1512_v9, %v1511_v52  ;;  %v9247_v12 = vmov 0 }
 0x16b   : > { %v915_v43 = vadd.f32 %v8097_v57, %v914_v6  ;;  %v6553_v21 = vpop.f32.mrb[26].mxu0 }
 0x16c   : > { %vm971_vm2 = vcmp.ge.f32.partialorder %v923_v24, 0.0  ;;  %v1003_v4 = vmul.f32 0.1, %v923_v24  ;;  %v926_v48 = vadd.f32 %v6553_v21, %v8097_v57  ;;  %v917_v25 = vpop.f32.mrb[27].mxu0  ;;  %v1772_v27 = vsel %vm8269_vm10, %v1532_v60, 0 }
 0x16d   : > { %vm969_vm3 = vcmp.ge.f32.partialorder %v915_v43, 0.0  ;;  %v1001_v1 = vmul.f32 0.1, %v915_v43  ;;  %v918_v44 = vadd.f32 %v8097_v57, %v917_v25  ;;  %6583 = vmatmul.mubr.msk.bf16.gmra.mrb[48].mxu0 %vm1041_vm14, %v1772_v27  ;;  %v3182_v5 = vsel %vm8245_vm1, %v1532_v60, 0 }
 0x16e   : > { %v1035_v14 = vsel %vm971_vm2, %v923_v24, %v1003_v4  ;;  %vm972_vm8 = vcmp.ge.f32.partialorder %v926_v48, 0.0  ;;  %v1004_v46 = vmul.f32 0.1, %v926_v48  ;;  %6702 = vmatprep.mubr.msk.bf16.mxu1 %vm1041_vm14, %v3182_v5  ;;  %v1773_v33 = vsel %vm8279_vm12, %v1533_v47, 0 }
 0x16f   : > { %1068 = vst.msk [vmem:[#allocation3 + $0xe8] sm:$0xff] %vm1041_vm14, %v1035_v14  ;;  %v1033_v56 = vsel %vm969_vm3, %v915_v43, %v1001_v1  ;;  %vm970_vm9 = vcmp.ge.f32.partialorder %v918_v44, 0.0  ;;  %v1002_v37 = vmul.f32 0.1, %v918_v44  ;;  %6586 = vmatprep.mubr.msk.bf16.mxu0 %vm1041_vm14, %v1773_v33  ;;  %v3183_v45 = vsel %vm8269_vm10, %v1533_v47, 0  ;;  %v1513_v32 = vld [vmem:[#allocation3 + $0xb7] sm:$0xff] }
 0x170   : > { %1066 = vst.msk [vmem:[#allocation3 + $0xd8] sm:$0xff] %vm1041_vm14, %v1033_v56  ;;  %v1036_v20 = vsel %vm972_vm8, %v926_v48, %v1004_v46  ;;  %6703 = vmatmul.mubr.msk.bf16.gmra.mrb[16].mxu1 %vm1041_vm14, %v3183_v45  ;;  %v1516_v11 = vld [vmem:[#allocation3 + $0xcf] sm:$0xff]  ;;  %vm8303_vm2 = vcmp.ne.s16.totalorder %v6012_v38, 0  ;;  %v9249_v4 = vcombine.low %v8034_v39, %v7876_v41 }
 0x171   : > { %1069 = vst.msk [vmem:[#allocation3 + $0xf0] sm:$0xff] %vm1041_vm14, %v1036_v20  ;;  %v1034_v9 = vsel %vm970_vm9, %v918_v44, %v1002_v37  ;;  %v6556_v58 = vpop.f32.mrb[28].mxu0  ;;  %v1514_v54 = vld [vmem:[#allocation3 + $0xbf] sm:$0xff]  ;;  %v9248_v12 = vsel %vm8303_vm2, 4294967295, %v9247_v12  ;;  %v1515_v52 = vld [vmem:[#allocation3 + $0xc7] sm:$0xff] }
 0x172   : > { %1067 = vst.msk [vmem:[#allocation3 + $0xe0] sm:$0xff] %vm1041_vm14, %v1034_v9  ;;  %v939_v24 = vadd.f32 %v6556_v58, %v8097_v57  ;;  %v930_v6 = vpop.f32.mrb[29].mxu0  ;;  %v1534_v60 = vpack.c.bf16 %v1514_v54, %v1513_v32  ;;  %v1535_v47 = vpack.c.bf16 %v1516_v11, %v1515_v52  ;;  %vm8313_vm3 = vcmp.ne.s16.totalorder %v9249_v4, 0  ;;  %v2117_v4 = vld [vmem:[#allocation3 + $0x10] sm:$0xff] }
 0x173   : > { %v931_v43 = vadd.f32 %v8097_v57, %v930_v6  ;;  %v6557_v21 = vpop.f32.mrb[30].mxu0  ;;  %v9251_v35 = vsel %vm8313_vm3, 4294967295, %v9250_v35  ;;  %v9252_v58 = vcombine.low %v8053_v26, %v7876_v41  ;;  %v9253_v32 = vmov 0 }
 0x174   : > { %vm975_vm8 = vcmp.ge.f32.partialorder %v939_v24, 0.0  ;;  %v1007_v38 = vmul.f32 0.1, %v939_v24  ;;  %v942_v48 = vadd.f32 %v6557_v21, %v8097_v57  ;;  %v933_v25 = vpop.f32.mrb[31].mxu0  ;;  %v1774_v27 = vsel %vm8303_vm2, %v1534_v60, 0  ;;  %v2116_v21 = vld [vmem:[#allocation3 + $0x8] sm:$0xff] }
 0x175   : > { %vm973_vm9 = vcmp.ge.f32.partialorder %v931_v43, 0.0  ;;  %v1005_v1 = vmul.f32 0.1, %v931_v43  ;;  %v934_v44 = vadd.f32 %v8097_v57, %v933_v25  ;;  %6587 = vmatmul.mubr.msk.bf16.gmra.mrb[52].mxu0 %vm1041_vm14, %v1774_v27  ;;  %v3184_v39 = vsel %vm8279_vm12, %v1534_v60, 0 }
 0x176   : > { %v1039_v5 = vsel %vm975_vm8, %v939_v24, %v1007_v38  ;;  %vm976_vm10 = vcmp.ge.f32.partialorder %v942_v48, 0.0  ;;  %v1008_v14 = vmul.f32 0.1, %v942_v48  ;;  %6706 = vmatprep.mubr.msk.bf16.mxu1 %vm1041_vm14, %v3184_v39  ;;  %v1775_v46 = vsel %vm8313_vm3, %v1535_v47, 0 }
 0x177   : > { %1072 = vst.msk [vmem:[#allocation3 + $0x108] sm:$0xff] %vm1041_vm14, %v1039_v5  ;;  %v1037_v33 = vsel %vm973_vm9, %v931_v43, %v1005_v1  ;;  %vm974_vm1 = vcmp.ge.f32.partialorder %v934_v44, 0.0  ;;  %v1006_v56 = vmul.f32 0.1, %v934_v44  ;;  %6590 = vmatprep.mubr.msk.bf16.mxu0 %vm1041_vm14, %v1775_v46  ;;  %v3185_v57 = vsel %vm8303_vm2, %v1535_v47, 0  ;;  %v1517_v11 = vld [vmem:[#allocation3 + $0xd7] sm:$0xff] }
 0x178   : > { %1070 = vst.msk [vmem:[#allocation3 + $0xf8] sm:$0xff] %vm1041_vm14, %v1037_v33  ;;  %v1040_v37 = vsel %vm976_vm10, %v942_v48, %v1008_v14  ;;  %6707 = vmatmul.mubr.msk.bf16.gmra.mrb[20].mxu1 %vm1041_vm14, %v3185_v57  ;;  %v1520_v45 = vld [vmem:[#allocation3 + $0xef] sm:$0xff]  ;;  %vm8337_vm8 = vcmp.ne.s16.totalorder %v9252_v58, 0  ;;  %v9255_v52 = vcombine.low %v8058_v34, %v7876_v41  ;;  %v9256_v24 = vmov 0  ;;  %v3527_v57 = vld [vmem:[#allocation3 + $0x18] sm:$0xff] }
 0x179   : > { %1073 = vst.msk [vmem:[#allocation3 + $0x110] sm:$0xff] %vm1041_vm14, %v1040_v37  ;;  %v1038_v20 = vsel %vm974_vm1, %v934_v44, %v1006_v56  ;;  %v1518_v9 = vld [vmem:[#allocation3 + $0xdf] sm:$0xff]  ;;  %v9254_v32 = vsel %vm8337_vm8, 4294967295, %v9253_v32  ;;  %v1519_v54 = vld [vmem:[#allocation3 + $0xe7] sm:$0xff]  ;;  %v9258_v27 = vcombine.low %v8080_v18, %v7876_v41  ;;  %v9259_v1 = vmov 0 }
 0x17a   : > { %vm8344_vm10 = vcmp.ne.s16.totalorder %v9255_v52, 0  ;;  %1071 = vst.msk [vmem:[#allocation3 + $0x100] sm:$0xff] %vm1041_vm14, %v1038_v20  ;;  %v1536_v6 = vpack.c.bf16 %v1518_v9, %v1517_v11  ;;  %v1537_v60 = vpack.c.bf16 %v1520_v45, %v1519_v54  ;;  %v2148_v14 = vpack.c.bf16 %v2117_v4, %v2116_v21  ;;  %v3528_v56 = vld [vmem:[#allocation3 + $0x20] sm:$0xff]  ;;  %v2121_v11 = vld [vmem:[#allocation3 + $0x30] sm:$0xff]  ;;  %v2120_v52 = vld [vmem:[#allocation3 + $0x28] sm:$0xff] }
 0x17b   : > { %v9257_v24 = vsel %vm8344_vm10, 4294967295, %v9256_v24  ;;  %vm8364_vm1 = vcmp.ne.s16.totalorder %v9258_v27, 0  ;;  %v3559_v20 = vpack.c.bf16 %v3528_v56, %v3527_v57  ;;  %v9261_v58 = vcombine.low %v7876_v41, %v8085_v10  ;;  %v7540_v21 = vld [vmem:[%s7804_s15 + $0x50] sm:$0xff]   ;;  %v3536_v27 = vld [vmem:[#allocation3 + $0x60] sm:$0xff]  ;;  %v3539_v57 = vld [vmem:[#allocation3 + $0x78] sm:$0xff] }
 0x17c   : > { %v1776_v47 = vsel %vm8337_vm8, %v1536_v6, 0  ;;  %v3186_v26 = vsel %vm8313_vm3, %v1536_v6, 0  ;;  %v1777_v43 = vsel %vm8344_vm10, %v1537_v60, 0  ;;  %v3187_v34 = vsel %vm8337_vm8, %v1537_v60, 0  ;;  %v7539_v6 = vld [vmem:[%s7804_s15 + $0x48] sm:$0xff]   ;;  %v2125_v4 = vld [vmem:[#allocation3 + $0x50] sm:$0xff] }
 0x17d   : > { %6591 = vmatmul.mubr.msk.bf16.gmra.mrb[56].mxu0 %vm1041_vm14, %v1776_v47  ;;  %6710 = vmatprep.mubr.msk.bf16.mxu1 %vm1041_vm14, %v3186_v26  ;;  %v9260_v1 = vsel %vm8364_vm1, 4294967295, %v9259_v1  ;;  %vm8384_vm9 = vcmp.ne.s16.totalorder %v9261_v58, 0  ;;  %v2150_v60 = vpack.c.bf16 %v2121_v11, %v2120_v52  ;;  %v3532_v47 = vld [vmem:[#allocation3 + $0x40] sm:$0xff]  ;;  %v3543_v52 = vld [vmem:[#allocation3 + $0x98] sm:$0xff] }
 0x17e   : > { %6594 = vmatprep.mubr.msk.bf16.mxu0 %vm1041_vm14, %v1777_v43  ;;  %v3531_v43 = vld [vmem:[#allocation3 + $0x38] sm:$0xff]  ;;  %v3544_v58 = vld [vmem:[#allocation3 + $0xa0] sm:$0xff] }
 0x17f   : > { %v1521_v48 = vld [vmem:[#allocation3 + $0xf7] sm:$0xff]  ;;  %v3561_v10 = vpack.c.bf16 %v3532_v47, %v3531_v43  ;;  %v2136_v47 = vld [vmem:[#allocation3 + $0xa8] sm:$0xff] }
 0x180   : > { %6711 = vmatmul.mubr.msk.bf16.gmra.mrb[24].mxu1 %vm1041_vm14, %v3187_v34  ;;  %v3157_v38 = vld [vmem:[#allocation3 + $0x10f] sm:$0xff] }
 0x181   : > { %v1522_v25 = vld [vmem:[#allocation3 + $0xff] sm:$0xff]  ;;  %v3156_v44 = vld [vmem:[#allocation3 + $0x107] sm:$0xff]  ;;  %v3943_v45 = vld [vmem:[#allocation3 + $0x111] sm:$0xff] }
 0x182   : > { %v1538_v39 = vpack.c.bf16 %v1522_v25, %v1521_v48  ;;  %v3173_v5 = vpack.c.bf16 %v3157_v38, %v3156_v44  ;;  %v3942_v37 = vld [vmem:[#allocation3 + $0x109] sm:$0xff]  ;;  %v7538_v44 = vld [vmem:[%s7804_s15 + $0xb8] sm:$0xff]  }
 0x183   : > { %v8379_v9 = vpack.c.bf16 %v3943_v45, %v3942_v37  ;;  %v7535_v34 = vld [vmem:[%s7804_s15 + $0xa8] sm:$0xff]   ;;  %v7536_v38 = vld [vmem:[%s7804_s15 + $0xb0] sm:$0xff]  }
 0x184   : > { %v1778_v46 = vsel %vm8364_vm1, %v1538_v39, 0  ;;  %v3188_v33 = vsel %vm8344_vm10, %v1538_v39, 0  ;;  %v3189_v18 = vsel %vm8364_vm1, %v3173_v5, 0  ;;  %v2124_v48 = vld [vmem:[#allocation3 + $0x48] sm:$0xff]  ;;  %v8407_v5 = vld [vmem:[%s7804_s15 + $0x100] sm:$0xff]   ;;  %v2133_v45 = vld [vmem:[#allocation3 + $0x90] sm:$0xff] }
 0x185   : > { %6595 = vmatmul.mubr.msk.bf16.gmra.mrb[60].mxu0 %vm1041_vm14, %v1778_v46  ;;  %6714 = vmatprep.mubr.msk.bf16.mxu1 %vm1041_vm14, %v3188_v33  ;;  %v5161_v26 = vsel %vm8384_vm9, %v8379_v9, 0  ;;  %v2152_v25 = vpack.c.bf16 %v2125_v4, %v2124_v48  ;;  %v8411_v46 = vld [vmem:[%s7804_s15 + $0xc0] sm:$0xff]   ;;  %v2128_v33 = vld [vmem:[#allocation3 + $0x68] sm:$0xff]  ;;  %v2141_v4 = vld [vmem:[#allocation3 + $0xd0] sm:$0xff] }
 0x186   : > { %6606 = vmatprep.mubr.msk.bf16.mxu0 %vm1041_vm14, %v2148_v14  ;;  %v2129_v14 = vld [vmem:[#allocation3 + $0x70] sm:$0xff] }
 0x187   : > { %v2154_v56 = vpack.c.bf16 %v2129_v14, %v2128_v33  ;;  %v3556_v14 = vld [vmem:[#allocation3 + $0x100] sm:$0xff]  ;;  %v3555_v33 = vld [vmem:[#allocation3 + $0xf8] sm:$0xff] }
 0x188   : > { %6715 = vmatmul.mubr.msk.bf16.gmra.mrb[28].mxu1 %vm1041_vm14, %v3189_v18  ;;  %v3540_v18 = vld [vmem:[#allocation3 + $0x80] sm:$0xff] }
 0x189   : > { %6726 = vmatprep.mubr.msk.bf16.mxu1 %vm1041_vm14, %v3559_v20  ;;  %v3565_v37 = vpack.c.bf16 %v3540_v18, %v3539_v57  ;;  %v2502_v18 = vld [vmem:[#allocation3 + $0x11] sm:$0xff]  ;;  %v3573_v57 = vpack.c.bf16 %v3556_v14, %v3555_v33  ;;  %v7543_v14 = vld [vmem:[%s7804_s15 + $0xc8] sm:$0xff]  }
 0x18d   : > { %6607 = vmatmul.mubr.msk.bf16.vlgmr.msra.gmra.mrb[32].mxu0 %vm1041_vm14, %v3559_v20  ;;  %v2132_v20 = vld [vmem:[#allocation3 + $0x88] sm:$0xff] }
 0x18e   : > { %6610 = vmatprep.mubr.msk.bf16.mxu0 %vm1041_vm14, %v2150_v60  ;;  %6639 = vmatpush3.bf16.msra.mxu0 %v8190_v63  ;;  %v7541_v63 = vld [vmem:[%s7804_s15 + $0x58] sm:$0xff]   ;;  %v2156_v11 = vpack.c.bf16 %v2133_v45, %v2132_v20  ;;  %v3913_v20 = vld [vmem:[#allocation3 + $0x21] sm:$0xff] }
 0x18f   : > { %6640 = vmatprep.subr.bf16.mxu0 %v7539_v6  ;;  %v3912_v45 = vld [vmem:[#allocation3 + $0x19] sm:$0xff] }
 0x190   : > { %6727 = vmatmul.mubr.msk.bf16.vlgmr.msra.gmra.mrb[0].mxu1 %vm1041_vm14, %v2150_v60  ;;  %v2137_v60 = vld [vmem:[#allocation3 + $0xb0] sm:$0xff] }
 0x191   : > { %6759 = vmatpush3.bf16.msra.mxu1 %v8203_v16  ;;  %6730 = vmatprep.mubr.msk.bf16.mxu1 %vm1041_vm14, %v3561_v10  ;;  %v3535_v16 = vld [vmem:[#allocation3 + $0x58] sm:$0xff]  ;;  %v2158_v43 = vpack.c.bf16 %v2137_v60, %v2136_v47  ;;  %v3557_v47 = vld [vmem:[#allocation3 + $0x108] sm:$0xff] }
 0x192   : > { %6760 = vmatprep.subr.bf16.mxu1 %v7535_v34  ;;  %6641 = vmatpush3.bf16.msra.mxu0 %v7539_v6  ;;  %v3563_v39 = vpack.c.bf16 %v3536_v27, %v3535_v16  ;;  %v3567_v6 = vpack.c.bf16 %v3544_v58, %v3543_v52  ;;  %v3551_v27 = vld [vmem:[#allocation3 + $0xd8] sm:$0xff]  ;;  %v2145_v16 = vld [vmem:[#allocation3 + $0xf0] sm:$0xff] }
 0x193   : > { %6642 = vmatprep.subr.bf16.mxu0 %v7540_v21  ;;  %v3558_v52 = vld [vmem:[#allocation3 + $0x110] sm:$0xff] }
 0x195   : > { %6611 = vmatmul.mubr.msk.bf16.gmra.mrb[36].mxu0 %vm1041_vm14, %v3561_v10  ;;  %6761 = vmatpush3.bf16.msra.mxu1 %v7535_v34  ;;  %v3548_v34 = vld [vmem:[#allocation3 + $0xc0] sm:$0xff]  ;;  %v3547_v10 = vld [vmem:[#allocation3 + $0xb8] sm:$0xff] }
 0x196   : > { %6614 = vmatprep.mubr.msk.bf16.mxu0 %vm1041_vm14, %v2152_v25  ;;  %6762 = vmatprep.subr.bf16.mxu1 %v7536_v38 }
 0x197   : > { %6643 = vmatpush3.bf16.msra.mxu0 %v7540_v21  ;;  %v3569_v21 = vpack.c.bf16 %v3548_v34, %v3547_v10  ;;  %v2506_v34 = vld [vmem:[#allocation3 + $0x31] sm:$0xff]  ;;  %v2505_v10 = vld [vmem:[#allocation3 + $0x29] sm:$0xff] }
 0x198   : > { %6731 = vmatmul.mubr.msk.bf16.gmra.mrb[4].mxu1 %vm1041_vm14, %v2152_v25  ;;  %6644 = vmatprep.subr.bf16.mxu0 %v7541_v63  ;;  %v3552_v25 = vld [vmem:[#allocation3 + $0xe0] sm:$0xff] }
 0x199   : > { %6734 = vmatprep.mubr.msk.bf16.mxu1 %vm1041_vm14, %v3563_v39  ;;  %6763 = vmatpush3.bf16.msra.mxu1 %v7536_v38  ;;  %v2140_v38 = vld [vmem:[#allocation3 + $0xc8] sm:$0xff] }
 0x19a   : > { %6764 = vmatprep.subr.bf16.mxu1 %v7538_v44  ;;  %v2160_v48 = vpack.c.bf16 %v2141_v4, %v2140_v38  ;;  %v8457_v38 = vpack.c.bf16 %v2506_v34, %v2505_v10  ;;  %v2514_v34 = vld [vmem:[#allocation3 + $0x71] sm:$0xff] }
 0x19b   : > { %6645 = vmatpush3.bf16.msra.mxu0 %v7541_v63  ;;  %v3571_v63 = vpack.c.bf16 %v3552_v25, %v3551_v27  ;;  %v3917_v25 = vld [vmem:[#allocation3 + $0x41] sm:$0xff]  ;;  %v9270_v27 = vcombine.low %v7876_v41, %v7932_v7  ;;  %v2510_v7 = vld [vmem:[#allocation3 + $0x51] sm:$0xff] }
 0x19c   : > { %6878 = vmatprep.subr.bf16.mxu0 %v8407_v5 }
 0x19d   : > { %6615 = vmatmul.mubr.msk.bf16.gmra.mrb[40].mxu0 %vm1041_vm14, %v3563_v39  ;;  %6765 = vmatpush3.bf16.msra.mxu1 %v7538_v44  ;;  %v2144_v44 = vld [vmem:[#allocation3 + $0xe8] sm:$0xff]  ;;  %vm8462_vm8 = vcmp.ne.s16.totalorder %v9270_v27, 0 }
 0x19e   : > { %6618 = vmatprep.mubr.msk.bf16.mxu0 %vm1041_vm14, %v2154_v56  ;;  %6798 = vmatprep.subr.bf16.mxu1 %v8411_v46  ;;  %v2162_v39 = vpack.c.bf16 %v2145_v16, %v2144_v44  ;;  %v8467_v16 = vld [vmem:[%s7804_s15 + $0x108] sm:$0xff]  }
 0x1a0   : > { %6735 = vmatmul.mubr.msk.bf16.gmra.mrb[8].mxu1 %vm1041_vm14, %v2154_v56  ;;  %v2501_v56 = vld [vmem:[#allocation3 + $0x9] sm:$0xff] }
 0x1a1   : > { %6738 = vmatprep.mubr.msk.bf16.mxu1 %vm1041_vm14, %v3565_v37 }
 0x1a5   : > { %6619 = vmatmul.mubr.msk.bf16.gmra.mrb[44].mxu0 %vm1041_vm14, %v3565_v37  ;;  %v2533_v37 = vpack.c.bf16 %v2502_v18, %v2501_v56  ;;  %v8485_v56 = vld [vmem:[%s7804_s15 + $0x110] sm:$0xff]  }
 0x1a6   : > { %6622 = vmatprep.mubr.msk.bf16.mxu0 %vm1041_vm14, %v2156_v11 }
 0x1a8   : > { %6739 = vmatmul.mubr.msk.bf16.gmra.mrb[12].mxu1 %vm1041_vm14, %v2156_v11  ;;  %v9264_v11 = vcombine.low %v7876_v41, %v7914_v59 }
 0x1a9   : > { %6742 = vmatprep.mubr.msk.bf16.mxu1 %vm1041_vm14, %v3567_v6 }
 0x1aa   : > { %vm8438_vm1 = vcmp.ne.s16.totalorder %v9264_v11, 0  ;;  %v3920_v11 = vld [vmem:[#allocation3 + $0x59] sm:$0xff] }
 0x1ab   : > { %v2773_v60 = vsel %vm8438_vm1, %v2533_v37, 0  ;;  %v9273_v37 = vcombine.low %v7876_v41, %v7951_v19 }
 0x1ad   : > { %6623 = vmatmul.mubr.msk.bf16.gmra.mrb[48].mxu0 %vm1041_vm14, %v3567_v6  ;;  %v3944_v6 = vpack.c.bf16 %v3913_v20, %v3912_v45  ;;  %vm8496_vm3 = vcmp.ne.s16.totalorder %v9273_v37, 0  ;;  %v2518_v37 = vld [vmem:[#allocation3 + $0x91] sm:$0xff] }
 0x1ae   : > { %6626 = vmatprep.mubr.msk.bf16.mxu0 %vm1041_vm14, %v2158_v43 }
 0x1af   : > { %v3960_v59 = vsel %vm8438_vm1, %v3944_v6, 0 }
 0x1b0   : > { %6743 = vmatmul.mubr.msk.bf16.gmra.mrb[16].mxu1 %vm1041_vm14, %v2158_v43  ;;  %v3574_v43 = vpack.c.bf16 %v3558_v52, %v3557_v47  ;;  %v3921_v52 = vld [vmem:[#allocation3 + $0x61] sm:$0xff] }
 0x1b1   : > { %6746 = vmatprep.mubr.msk.bf16.mxu1 %vm1041_vm14, %v3569_v21  ;;  %v8515_v47 = vpack.c.bf16 %v3921_v52, %v3920_v11 }
 0x1b3   : > { %v5150_v0 = vsel %vm8496_vm3, %v8515_v47, 0 }
 0x1b5   : > { %6627 = vmatmul.mubr.msk.bf16.gmra.mrb[52].mxu0 %vm1041_vm14, %v3569_v21  ;;  %v9267_v21 = vcombine.low %v7876_v41, %v7920_v61 }
 0x1b6   : > { %6630 = vmatprep.mubr.msk.bf16.mxu0 %vm1041_vm14, %v2160_v48 }
 0x1b7   : > { %vm8453_vm10 = vcmp.ne.s16.totalorder %v9267_v21, 0 }
 0x1b8   : > { %6747 = vmatmul.mubr.msk.bf16.gmra.mrb[20].mxu1 %vm1041_vm14, %v2160_v48  ;;  %v3916_v48 = vld [vmem:[#allocation3 + $0x39] sm:$0xff]  ;;  %v2774_v61 = vsel %vm8453_vm10, %v3944_v6, 0  ;;  %v3961_v33 = vsel %vm8453_vm10, %v8457_v38, 0  ;;  %v9276_v6 = vcombine.low %v7876_v41, %v7969_v31 }
 0x1b9   : > { %6750 = vmatprep.mubr.msk.bf16.mxu1 %vm1041_vm14, %v3571_v63  ;;  %v8471_v44 = vpack.c.bf16 %v3917_v25, %v3916_v48  ;;  %v2513_v48 = vld [vmem:[#allocation3 + $0x69] sm:$0xff]  ;;  %v9279_v25 = vcombine.low %v7876_v41, %v7975_v36 }
 0x1ba   : > { %vm8505_vm2 = vcmp.ne.s16.totalorder %v9276_v6, 0  ;;  %v2517_v6 = vld [vmem:[#allocation3 + $0x89] sm:$0xff] }
 0x1bb   : > { %v3962_v18 = vsel %vm8462_vm8, %v8471_v44, 0  ;;  %v2776_v19 = vsel %vm8496_vm3, %v8471_v44, 0  ;;  %v3964_v21 = vsel %vm8505_vm2, %v8515_v47, 0  ;;  %vm8539_vm12 = vcmp.ne.s16.totalorder %v9279_v25, 0 }
 0x1bc   : > { %v2778_v36 = vsel %vm8539_vm12, %v8515_v47, 0  ;;  %v4324_v47 = vld [vmem:[#allocation3 + $0x7f] sm:$0xff] }
 0x1bd   : > { %6631 = vmatmul.mubr.msk.bf16.gmra.mrb[56].mxu0 %vm1041_vm14, %v3571_v63  ;;  %v4322_v63 = vld [vmem:[#allocation3 + $0x6f] sm:$0xff] }
 0x1be   : > { %6634 = vmatprep.mubr.msk.bf16.mxu0 %vm1041_vm14, %v2162_v39 }
 0x1c0   : > { %6751 = vmatmul.mubr.msk.bf16.gmra.mrb[24].mxu1 %vm1041_vm14, %v2162_v39  ;;  %v2775_v39 = vsel %vm8462_vm8, %v8457_v38, 0 }
 0x1c1   : > { %6754 = vmatprep.mubr.msk.bf16.mxu1 %vm1041_vm14, %v3573_v57 }
 0x1c5   : > { %6635 = vmatmul.mubr.msk.bf16.gmra.mrb[60].mxu0 %vm1041_vm14, %v3573_v57  ;;  %v2509_v57 = vld [vmem:[#allocation3 + $0x49] sm:$0xff] }
 0x1c6   : > { %6646 = vmatprep.mubr.msk.bf16.mxu0 %vm1041_vm14, %v2773_v60  ;;  %v8500_v20 = vpack.c.bf16 %v2510_v7, %v2509_v57  ;;  %v3925_v7 = vld [vmem:[#allocation3 + $0x81] sm:$0xff]  ;;  %v4323_v60 = vld [vmem:[#allocation3 + $0x77] sm:$0xff] }
 0x1c8   : > { %6755 = vmatmul.mubr.msk.bf16.gmra.mrb[28].mxu1 %vm1041_vm14, %v3574_v43  ;;  %v8518_v43 = vld [vmem:[%s7804_s15 + $0x118] sm:$0xff]   ;;  %v2777_v31 = vsel %vm8505_vm2, %v8500_v20, 0  ;;  %v3963_v10 = vsel %vm8496_vm3, %v8500_v20, 0  ;;  %v5149_v55 = vsel %vm8462_vm8, %v8500_v20, 0 }
 0x1c9   : > { %6766 = vmatprep.mubr.msk.bf16.mxu1 %vm1041_vm14, %v3960_v59  ;;  %v7545_v59 = vld [vmem:[%s7804_s15 + $0xd8] sm:$0xff]  }
 0x1ca   : > { %v4319_v20 = vld [vmem:[#allocation3 + $0x57] sm:$0xff] }
 0x1cd   : > { %6647 = vmatmul.mubr.msk.bf16.vlgmr.msra.gmra.mrb[32].mxu0 %vm1041_vm14, %v2774_v61  ;;  %v8543_v61 = vpack.c.bf16 %v2514_v34, %v2513_v48  ;;  %v3928_v34 = vld [vmem:[#allocation3 + $0x99] sm:$0xff] }
 0x1ce   : > { %6650 = vmatprep.mubr.msk.bf16.mxu0 %vm1041_vm14, %v2775_v39  ;;  %6879 = vmatpush3.bf16.msra.mxu0 %v8407_v5  ;;  %v3924_v39 = vld [vmem:[#allocation3 + $0x79] sm:$0xff] }
 0x1cf   : > { %6880 = vmatprep.subr.bf16.mxu0 %v8467_v16  ;;  %v8559_v57 = vpack.c.bf16 %v3925_v7, %v3924_v39  ;;  %v3965_v11 = vsel %vm8539_vm12, %v8543_v61, 0  ;;  %v2522_v39 = vld [vmem:[#allocation3 + $0xb1] sm:$0xff]  ;;  %v5151_v51 = vsel %vm8505_vm2, %v8543_v61, 0  ;;  %vm9315_vm2 = vnez %v9242_v42 }
 0x1d0   : > { %6767 = vmatmul.mubr.msk.bf16.vlgmr.msra.gmra.mrb[0].mxu1 %vm1041_vm14, %v3961_v33  ;;  %v9283_v33 = vmov 0 }
 0x1d1   : > { %6799 = vmatpush3.bf16.msra.mxu1 %v8411_v46  ;;  %6770 = vmatprep.mubr.msk.bf16.mxu1 %vm1041_vm14, %v3962_v18  ;;  %v7544_v46 = vld [vmem:[%s7804_s15 + $0xd0] sm:$0xff]   ;;  %v8553_v18 = vld [vmem:[%s7804_s15 + $0xe0] sm:$0xff]  }
 0x1d2   : > { %6800 = vmatprep.subr.bf16.mxu1 %v7543_v14  ;;  %6881 = vmatpush3.bf16.msra.mxu0 %v8467_v16 }
 0x1d3   : > { %6882 = vmatprep.subr.bf16.mxu0 %v8485_v56 }
 0x1d5   : > { %6651 = vmatmul.mubr.msk.bf16.gmra.mrb[36].mxu0 %vm1041_vm14, %v2776_v19  ;;  %6801 = vmatpush3.bf16.msra.mxu1 %v7543_v14  ;;  %v9282_v14 = vcombine.low %v7876_v41, %v7993_v49  ;;  %v9286_v19 = vmov 0 }
 0x1d6   : > { %6654 = vmatprep.mubr.msk.bf16.mxu0 %vm1041_vm14, %v2777_v31  ;;  %6802 = vmatprep.subr.bf16.mxu1 %v7544_v46  ;;  %v8582_v31 = vpack.c.bf16 %v2518_v37, %v2517_v6  ;;  %v9294_v6 = vcombine.low %v7876_v41, %v8041_v53 }
 0x1d7   : > { %6883 = vmatpush3.bf16.msra.mxu0 %v8485_v56  ;;  %vm8548_vm0 = vcmp.ne.s16.totalorder %v9282_v14, 0  ;;  %v2521_v14 = vld [vmem:[#allocation3 + $0xa9] sm:$0xff] }
 0x1d8   : > { %6771 = vmatmul.mubr.msk.bf16.gmra.mrb[4].mxu1 %vm1041_vm14, %v3963_v10  ;;  %6884 = vmatprep.subr.bf16.mxu0 %v8518_v43  ;;  %v9284_v33 = vsel %vm8548_vm0, 4294967295, %v9283_v33  ;;  %v2779_v49 = vsel %vm8548_vm0, %v8543_v61, 0  ;;  %v3966_v52 = vsel %vm8548_vm0, %v8559_v57, 0  ;;  %v9288_v10 = vcombine.low %v7876_v41, %v8017_v17 }
 0x1d9   : > { %6774 = vmatprep.mubr.msk.bf16.mxu1 %vm1041_vm14, %v3964_v21  ;;  %6803 = vmatpush3.bf16.msra.mxu1 %v7544_v46  ;;  %v9285_v46 = vcombine.low %v7876_v41, %v7999_v62  ;;  %v9289_v21 = vmov 0  ;;  %v8616_v37 = vpack.c.bf16 %v2522_v39, %v2521_v14  ;;  %v9297_v39 = vcombine.low %v7876_v41, %v8047_v15  ;;  %v3936_v14 = vld [vmem:[#allocation3 + $0xd9] sm:$0xff] }
 0x1da   : > { %6804 = vmatprep.subr.bf16.mxu1 %v7545_v59  ;;  %vm8587_vm4 = vcmp.ne.s16.totalorder %v9288_v10, 0  ;;  %v2526_v10 = vld [vmem:[#allocation3 + $0xd1] sm:$0xff]  ;;  %v4350_v61 = vpack.c.bf16 %v4324_v47, %v4323_v60 }
 0x1db   : > { %6885 = vmatpush3.bf16.msra.mxu0 %v8518_v43  ;;  %vm8578_vm5 = vcmp.ne.s16.totalorder %v9285_v46, 0  ;;  %v9290_v21 = vsel %vm8587_vm4, 4294967295, %v9289_v21  ;;  %v2781_v25 = vsel %vm8587_vm4, %v8582_v31, 0  ;;  %v9295_v46 = vmov 0  ;;  %v4719_v60 = vld [vmem:[#allocation3 + $0x50] sm:$0xff] }
 0x1dc   : > { %v9287_v19 = vsel %vm8578_vm5, 4294967295, %v9286_v19  ;;  %v2780_v48 = vsel %vm8578_vm5, %v8559_v57, 0  ;;  %v3967_v17 = vsel %vm8578_vm5, %v8582_v31, 0  ;;  %vm8621_vm5 = vcmp.ne.s16.totalorder %v9294_v6, 0 }
 0x1dd   : > { %6655 = vmatmul.mubr.msk.bf16.gmra.mrb[40].mxu0 %vm1041_vm14, %v2778_v36  ;;  %6805 = vmatpush3.bf16.msra.mxu1 %v7545_v59  ;;  %v3929_v59 = vld [vmem:[#allocation3 + $0xa1] sm:$0xff]  ;;  %v9291_v36 = vcombine.low %v7876_v41, %v8023_v28  ;;  %v9296_v46 = vsel %vm8621_vm5, 4294967295, %v9295_v46 }
 0x1de   : > { %6658 = vmatprep.mubr.msk.bf16.mxu0 %vm1041_vm14, %v2779_v49  ;;  %6838 = vmatprep.subr.bf16.mxu1 %v8553_v18  ;;  %v8594_v62 = vpack.c.bf16 %v3929_v59, %v3928_v34  ;;  %v9292_v49 = vmov 0  ;;  %v2783_v59 = vsel %vm8621_vm5, %v8616_v37, 0  ;;  %vm9317_vm8 = vnez %v9296_v46 }
 0x1df   : > { %vm8612_vm0 = vcmp.ne.s16.totalorder %v9291_v36, 0  ;;  %v3937_v36 = vld [vmem:[#allocation3 + $0xe1] sm:$0xff] }
 0x1e0   : > { %6775 = vmatmul.mubr.msk.bf16.gmra.mrb[8].mxu1 %vm1041_vm14, %v3965_v11  ;;  %v3968_v7 = vsel %vm8587_vm4, %v8594_v62, 0  ;;  %v9293_v49 = vsel %vm8612_vm0, 4294967295, %v9292_v49  ;;  %v3932_v11 = vld [vmem:[#allocation3 + $0xb9] sm:$0xff]  ;;  %v2782_v34 = vsel %vm8612_vm0, %v8594_v62, 0  ;;  %v3969_v53 = vsel %vm8612_vm0, %v8616_v37, 0 }
 0x1e1   : > { %6778 = vmatprep.mubr.msk.bf16.mxu1 %vm1041_vm14, %v3966_v52  ;;  %v3933_v52 = vld [vmem:[#allocation3 + $0xc1] sm:$0xff]  ;;  %vm8646_vm4 = vcmp.ne.s16.totalorder %v9297_v39, 0  ;;  %v8662_v15 = vpack.c.bf16 %v3937_v36, %v3936_v14  ;;  %v3940_v14 = vld [vmem:[#allocation3 + $0xf9] sm:$0xff]  ;;  %vm9316_vm3 = vnez %v9293_v49 }
 0x1e2   : > { %v8628_v28 = vpack.c.bf16 %v3933_v52, %v3932_v11  ;;  %v9300_v11 = vcombine.low %v7876_v41, %v8067_v2  ;;  %v9301_v52 = vmov 0  ;;  %v3941_v36 = vld [vmem:[#allocation3 + $0x101] sm:$0xff] }
 0x1e3   : > { %v4337_v49 = vld [vmem:[#allocation3 + $0xe7] sm:$0xff]  ;;  %v5158_v46 = vsel %vm8646_vm4, %v8662_v15, 0 }
 0x1e4   : > { %vm8655_vm0 = vcmp.ne.s16.totalorder %v9300_v11, 0  ;;  %v2784_v6 = vsel %vm8646_vm4, %v8628_v28, 0 }
 0x1e5   : > { %6659 = vmatmul.mubr.msk.bf16.gmra.mrb[44].mxu0 %vm1041_vm14, %v2780_v48  ;;  %v3970_v48 = vsel %vm8621_vm5, %v8628_v28, 0  ;;  %v9302_v52 = vsel %vm8655_vm0, 4294967295, %v9301_v52 }
 0x1e6   : > { %6662 = vmatprep.mubr.msk.bf16.mxu0 %vm1041_vm14, %v2781_v25  ;;  %v2525_v25 = vld [vmem:[#allocation3 + $0xc9] sm:$0xff] }
 0x1e8   : > { %6779 = vmatmul.mubr.msk.bf16.gmra.mrb[12].mxu1 %vm1041_vm14, %v3967_v17  ;;  %v4341_v17 = vld [vmem:[#allocation3 + $0x107] sm:$0xff] }
 0x1e9   : > { %6782 = vmatprep.mubr.msk.bf16.mxu1 %vm1041_vm14, %v3968_v7  ;;  %v8650_v7 = vpack.c.bf16 %v2526_v10, %v2525_v25  ;;  %v3972_v10 = vsel %vm8655_vm0, %v8662_v15, 0 }
 0x1eb   : > { %v3971_v2 = vsel %vm8646_vm4, %v8650_v7, 0  ;;  %vm9323_vm4 = vnez %v9254_v32  ;;  %v4717_v32 = vld [vmem:[#allocation3 + $0x40] sm:$0xff] }
 0x1ed   : > { %6663 = vmatmul.mubr.msk.bf16.gmra.mrb[48].mxu0 %vm1041_vm14, %v2782_v34  ;;  %v2785_v34 = vsel %vm8655_vm0, %v8650_v7, 0 }
 0x1ee   : > { %6666 = vmatprep.mubr.msk.bf16.mxu0 %vm1041_vm14, %v2783_v59  ;;  %v2530_v59 = vld [vmem:[#allocation3 + $0xf1] sm:$0xff] }
 0x1f0   : > { %6783 = vmatmul.mubr.msk.bf16.gmra.mrb[16].mxu1 %vm1041_vm14, %v3969_v53  ;;  %v2529_v53 = vld [vmem:[#allocation3 + $0xe9] sm:$0xff] }
 0x1f1   : > { %6786 = vmatprep.mubr.msk.bf16.mxu1 %vm1041_vm14, %v3970_v48  ;;  %v9303_v48 = vcombine.low %v7876_v41, %v8074_v22  ;;  %v8684_v39 = vpack.c.bf16 %v2530_v59, %v2529_v53  ;;  %v4313_v53 = vld [vmem:[#allocation3 + $0x27] sm:$0xff] }
 0x1f3   : > { %vm8680_vm5 = vcmp.ne.s16.totalorder %v9303_v48, 0  ;;  %v2787_v22 = vsel %vm8384_vm9, %v8684_v39, 0  ;;  %v4314_v48 = vld [vmem:[#allocation3 + $0x2f] sm:$0xff] }
 0x1f4   : > { %v2786_v11 = vsel %vm8680_vm5, %v8662_v15, 0  ;;  %v4342_v15 = vld [vmem:[#allocation3 + $0x10f] sm:$0xff] }
 0x1f5   : > { %6667 = vmatmul.mubr.msk.bf16.gmra.mrb[52].mxu0 %vm1041_vm14, %v2784_v6  ;;  %v8689_v6 = vpack.c.bf16 %v3941_v36, %v3940_v14  ;;  %v4345_v36 = vpack.c.bf16 %v4314_v48, %v4313_v53  ;;  %v7551_v48 = vld [vmem:[%s7804_s15 + $0xe8] sm:$0xff]  }
 0x1f6   : > { %6670 = vmatprep.mubr.msk.bf16.mxu0 %vm1041_vm14, %v2785_v34  ;;  %v3973_v34 = vsel %vm8680_vm5, %v8684_v39, 0 }
 0x1f7   : > { %v3974_v59 = vsel %vm8384_vm9, %v8689_v6, 0 }
 0x1f8   : > { %6787 = vmatmul.mubr.msk.bf16.gmra.mrb[20].mxu1 %vm1041_vm14, %v3971_v2  ;;  %v9306_v2 = vcombine.low %v7876_v41, %v8090_v30  ;;  %v4361_v30 = vsel %vm7899_vm11, %v4345_v36, 0  ;;  %v4321_v36 = vld [vmem:[#allocation3 + $0x67] sm:$0xff]  ;;  %vm9309_vm11 = vnez %v9284_v33  ;;  %v4327_v33 = vld [vmem:[#allocation3 + $0x97] sm:$0xff] }
 0x1f9   : > { %6790 = vmatprep.mubr.msk.bf16.mxu1 %vm1041_vm14, %v3972_v10  ;;  %v5153_v8 = vsel %vm9309_vm11, %v8582_v31, 0  ;;  %vm9320_vm11 = vnez %v9302_v52  ;;  %v5160_v52 = vsel %vm8680_vm5, %v8689_v6, 0  ;;  %vm9325_vm5 = vnez %v9260_v1  ;;  %v4721_v1 = vld [vmem:[#allocation3 + $0x60] sm:$0xff] }
 0x1fa   : > { %vm8707_vm0 = vcmp.ne.s16.totalorder %v9306_v2, 0  ;;  %v4315_v2 = vld [vmem:[#allocation3 + $0x37] sm:$0xff] }
 0x1fb   : > { %v2788_v14 = vsel %vm8707_vm0, %v8689_v6, 0  ;;  %v3975_v41 = vsel %vm8707_vm0, %v8379_v9, 0 }
 0x1fd   : > { %6671 = vmatmul.mubr.msk.bf16.gmra.mrb[56].mxu0 %vm1041_vm14, %v2786_v11  ;;  %v5147_v11 = vsel %vm8438_vm1, %v8457_v38, 0  ;;  %v5148_v38 = vsel %vm8453_vm10, %v8471_v44, 0  ;;  %v4320_v44 = vld [vmem:[#allocation3 + $0x5f] sm:$0xff]  ;;  %vm9318_vm10 = vnez %v9244_v13  ;;  %vm9319_vm1 = vnez %v9246_v3 }
 0x1fe   : > { %6674 = vmatprep.mubr.msk.bf16.mxu0 %vm1041_vm14, %v2787_v22  ;;  %v4316_v22 = vld [vmem:[#allocation3 + $0x3f] sm:$0xff]  ;;  %v5159_v13 = vsel %vm9320_vm11, %v8684_v39, 0  ;;  %v4359_v39 = vpack.c.bf16 %v4342_v15, %v4341_v17 }
 0x1ff   : > { %v4346_v58 = vpack.c.bf16 %v4316_v22, %v4315_v2  ;;  %v5152_v2 = vsel %vm8539_vm12, %v8559_v57, 0  ;;  %v4328_v57 = vld [vmem:[#allocation3 + $0x9f] sm:$0xff]  ;;  %vm9314_vm12 = vnez %v9240_v40  ;;  %v5157_v40 = vsel %vm9317_vm8, %v8650_v7, 0 }
 0x200   : > { %6791 = vmatmul.mubr.msk.bf16.gmra.mrb[24].mxu1 %vm1041_vm14, %v3973_v34  ;;  %v4317_v34 = vld [vmem:[#allocation3 + $0x47] sm:$0xff]  ;;  %v4352_v31 = vpack.c.bf16 %v4328_v57, %v4327_v33  ;;  %v4724_v33 = vld [vmem:[#allocation3 + $0x78] sm:$0xff] }
 0x201   : > { %6794 = vmatprep.mubr.msk.bf16.mxu1 %vm1041_vm14, %v3974_v59  ;;  %v4318_v59 = vld [vmem:[#allocation3 + $0x4f] sm:$0xff]  ;;  %v5129_v17 = vld [vmem:[#allocation3 + $0x119] sm:$0xff]  ;;  %v5130_v15 = vld [vmem:[#allocation3 + $0x121] sm:$0xff] }
 0x202   : > { %v4347_v53 = vpack.c.bf16 %v4318_v59, %v4317_v34  ;;  %v4325_v34 = vld [vmem:[#allocation3 + $0x87] sm:$0xff]  ;;  %v4326_v59 = vld [vmem:[#allocation3 + $0x8f] sm:$0xff] }
 0x203   : > { %v4351_v29 = vpack.c.bf16 %v4326_v59, %v4325_v34  ;;  %v4715_v34 = vld [vmem:[#allocation3 + $0x30] sm:$0xff]  ;;  %v4714_v59 = vld [vmem:[#allocation3 + $0x28] sm:$0xff] }
 0x204   : > { %v4363_v4 = vsel %vm8127_vm7, %v4347_v53, 0  ;;  %vm9311_vm7 = vnez %v9238_v23  ;;  %v4330_v53 = vld [vmem:[#allocation3 + $0xaf] sm:$0xff]  ;;  %v4368_v23 = vsel %vm9314_vm12, %v4352_v31, 0  ;;  %v4746_v6 = vpack.c.bf16 %v4715_v34, %v4714_v59 }
 0x205   : > { %6675 = vmatmul.mubr.msk.bf16.gmra.mrb[60].mxu0 %vm1041_vm14, %v2788_v14  ;;  %v4362_v14 = vsel %vm8117_vm6, %v4346_v58, 0  ;;  %vm9310_vm6 = vnez %v9236_v50  ;;  %v4367_v27 = vsel %vm9311_vm7, %v4351_v29, 0  ;;  %vm9322_vm7 = vnez %v9251_v35  ;;  %v4722_v57 = vld [vmem:[#allocation3 + $0x68] sm:$0xff] }
 0x206   : > { %6886 = vmatprep.mubr.msk.bf16.mxu0 %vm1041_vm14, %v5147_v11  ;;  %v7552_v11 = vld [vmem:[%s7804_s15 + $0xf0] sm:$0xff]   ;;  %v4366_v58 = vsel %vm9310_vm6, %v4350_v61, 0  ;;  %vm9321_vm6 = vnez %v9248_v12  ;;  %v4716_v61 = vld [vmem:[#allocation3 + $0x38] sm:$0xff] }
 0x208   : > { %6795 = vmatmul.mubr.msk.bf16.gmra.mrb[28].mxu1 %vm1041_vm14, %v3975_v41  ;;  %v4348_v41 = vpack.c.bf16 %v4320_v44, %v4319_v20  ;;  %v4331_v44 = vld [vmem:[#allocation3 + $0xb7] sm:$0xff]  ;;  %v4336_v20 = vld [vmem:[#allocation3 + $0xdf] sm:$0xff] }
 0x209   : > { %6806 = vmatprep.mubr.msk.bf16.mxu1 %vm1041_vm14, %v4361_v30  ;;  %v4349_v30 = vpack.c.bf16 %v4322_v63, %v4321_v36 }
 0x20a   : > { %v4364_v22 = vsel %vm8156_vm13, %v4348_v41, 0  ;;  %vm9312_vm13 = vnez %v9287_v19  ;;  %v4333_v19 = vld [vmem:[#allocation3 + $0xc7] sm:$0xff] }
 0x20b   : > { %v4365_v45 = vsel %vm8167_vm15, %v4349_v30, 0  ;;  %vm9313_vm15 = vnez %v9290_v21  ;;  %v5156_v21 = vsel %vm9316_vm3, %v8628_v28, 0  ;;  %v4338_v28 = vld [vmem:[#allocation3 + $0xef] sm:$0xff]  ;;  %v4340_v30 = vld [vmem:[#allocation3 + $0xff] sm:$0xff] }
 0x20c   : > { %v5155_v50 = vsel %vm9313_vm15, %v8616_v37, 0  ;;  %v4357_v7 = vpack.c.bf16 %v4338_v28, %v4337_v49  ;;  %v4741_v28 = vld [vmem:[#allocation3 + $0x100] sm:$0xff] }
 0x20d   : > { %6887 = vmatmul.mubr.msk.bf16.vlgmr.msra.gmra.mrb[64].mxu0 %vm1041_vm14, %v5148_v38  ;;  %v4329_v38 = vld [vmem:[#allocation3 + $0xa7] sm:$0xff] }
 0x20e   : > { %6890 = vmatprep.mubr.msk.bf16.mxu0 %vm1041_vm14, %v5149_v55  ;;  %v5154_v55 = vsel %vm9312_vm13, %v8594_v62, 0  ;;  %v4334_v62 = vld [vmem:[#allocation3 + $0xcf] sm:$0xff]  ;;  %vm9324_vm13 = vnez %v9257_v24  ;;  %v4747_v24 = vpack.c.bf16 %v4717_v32, %v4716_v61 }
 0x20f   : > { %v4355_v37 = vpack.c.bf16 %v4334_v62, %v4333_v19  ;;  %v4375_v35 = vsel %vm9324_vm13, %v4359_v39, 0  ;;  %v4733_v19 = vld [vmem:[#allocation3 + $0xc0] sm:$0xff]  ;;  %v4735_v62 = vld [vmem:[#allocation3 + $0xd0] sm:$0xff] }
 0x210   : > { %6807 = vmatmul.mubr.msk.bf16.vlgmr.msra.gmra.mrb[0].mxu1 %vm1041_vm14, %v4362_v14 }
 0x211   : > { %6839 = vmatpush3.bf16.msra.mxu1 %v8553_v18  ;;  %6810 = vmatprep.mubr.msk.bf16.mxu1 %vm1041_vm14, %v4363_v4  ;;  %v7553_v18 = vld [vmem:[%s7804_s15 + $0xf8] sm:$0xff]   ;;  %v4371_v63 = vsel %vm9319_vm1, %v4355_v37, 0  ;;  %v4737_v37 = vld [vmem:[#allocation3 + $0xe0] sm:$0xff] }
 0x212   : > { %6840 = vmatprep.subr.bf16.mxu1 %v7551_v48  ;;  %v4332_v4 = vld [vmem:[#allocation3 + $0xbf] sm:$0xff] }
 0x213   : > { %v4354_v36 = vpack.c.bf16 %v4332_v4, %v4331_v44  ;;  %v4730_v4 = vld [vmem:[#allocation3 + $0xa8] sm:$0xff] }
 0x215   : > { %6891 = vmatmul.mubr.msk.bf16.gmra.mrb[68].mxu0 %vm1041_vm14, %v5150_v0  ;;  %6841 = vmatpush3.bf16.msra.mxu1 %v7551_v48  ;;  %v4353_v48 = vpack.c.bf16 %v4330_v53, %v4329_v38  ;;  %v4370_v42 = vsel %vm9318_vm10, %v4354_v36, 0  ;;  %v4373_v0 = vsel %vm9322_vm7, %v4357_v7, 0  ;;  %v4727_v53 = vld [vmem:[#allocation3 + $0x90] sm:$0xff]  ;;  %v4734_v36 = vld [vmem:[#allocation3 + $0xc8] sm:$0xff] }
 0x216   : > { %6894 = vmatprep.mubr.msk.bf16.mxu0 %vm1041_vm14, %v5151_v51  ;;  %6842 = vmatprep.subr.bf16.mxu1 %v7552_v11  ;;  %v4339_v51 = vld [vmem:[#allocation3 + $0xf7] sm:$0xff]  ;;  %v4742_v7 = vld [vmem:[#allocation3 + $0x108] sm:$0xff] }
 0x217   : > { %v4369_v14 = vsel %vm9315_vm2, %v4353_v48, 0  ;;  %v4729_v48 = vld [vmem:[#allocation3 + $0xa0] sm:$0xff] }
 0x218   : > { %6811 = vmatmul.mubr.msk.bf16.gmra.mrb[4].mxu1 %vm1041_vm14, %v4364_v22  ;;  %v4343_v22 = vld [vmem:[#allocation3 + $0x117] sm:$0xff] }
 0x219   : > { %6814 = vmatprep.mubr.msk.bf16.mxu1 %vm1041_vm14, %v4365_v45  ;;  %6843 = vmatpush3.bf16.msra.mxu1 %v7552_v11  ;;  %v4335_v11 = vld [vmem:[#allocation3 + $0xd7] sm:$0xff]  ;;  %v4344_v45 = vld [vmem:[#allocation3 + $0x11f] sm:$0xff] }
 0x21a   : > { %6844 = vmatprep.subr.bf16.mxu1 %v7553_v18  ;;  %v4356_v41 = vpack.c.bf16 %v4336_v20, %v4335_v11  ;;  %v4360_v47 = vpack.c.bf16 %v4344_v45, %v4343_v22  ;;  %v4738_v20 = vld [vmem:[#allocation3 + $0xe8] sm:$0xff]  ;;  %v4743_v11 = vld [vmem:[#allocation3 + $0x110] sm:$0xff] }
 0x21c   : > { %v4372_v3 = vsel %vm9321_vm6, %v4356_v41, 0  ;;  %v4376_v25 = vsel %vm9325_vm5, %v4360_v47, 0  ;;  %v4740_v41 = vld [vmem:[#allocation3 + $0xf8] sm:$0xff] }
 0x21d   : > { %6895 = vmatmul.mubr.msk.bf16.gmra.mrb[72].mxu0 %vm1041_vm14, %v5152_v2  ;;  %6845 = vmatpush3.bf16.msra.mxu1 %v7553_v18  ;;  %v4358_v18 = vpack.c.bf16 %v4340_v30, %v4339_v51  ;;  %v4718_v2 = vld [vmem:[#allocation3 + $0x48] sm:$0xff]  ;;  %v5146_v51 = vpack.c.bf16 %v5130_v15, %v5129_v17  ;;  %v1781_v17 = vld [vmem:[#allocation2 + $0x10] sm:$0xff]  ;;  %v1779_v15 = vld [vmem:[#allocation2] sm:$0xff] }
 0x21e   : > { %6898 = vmatprep.mubr.msk.bf16.mxu0 %vm1041_vm14, %v5153_v8  ;;  %6918 = vmatprep.subr.bf16.mxu1 %v8407_v5  ;;  %v4748_v29 = vpack.c.bf16 %v4719_v60, %v4718_v2  ;;  %v4723_v8 = vld [vmem:[#allocation3 + $0x70] sm:$0xff] }
 0x21f   : > { %v4374_v12 = vsel %vm9323_vm4, %v4358_v18, 0  ;;  %v4750_v38 = vpack.c.bf16 %v4723_v8, %v4722_v57  ;;  %v5162_v18 = vsel %vm8707_vm0, %v5146_v51, 0  ;;  %v1782_v51 = vld [vmem:[#allocation2 + $0x18] sm:$0xff] }
 0x220   : > { %6815 = vmatmul.mubr.msk.bf16.gmra.mrb[8].mxu1 %vm1041_vm14, %v4366_v58  ;;  %v4720_v58 = vld [vmem:[#allocation3 + $0x58] sm:$0xff] }
 0x221   : > { %6818 = vmatprep.mubr.msk.bf16.mxu1 %vm1041_vm14, %v4367_v27  ;;  %v4749_v27 = vpack.c.bf16 %v4721_v1, %v4720_v58 }
 0x225   : > { %6899 = vmatmul.mubr.msk.bf16.gmra.mrb[76].mxu0 %vm1041_vm14, %v5154_v55 }
 0x226   : > { %6902 = vmatprep.mubr.msk.bf16.mxu0 %vm1041_vm14, %v5155_v50  ;;  %v4731_v50 = vld [vmem:[#allocation3 + $0xb0] sm:$0xff] }
 0x228   : > { %6819 = vmatmul.mubr.msk.bf16.gmra.mrb[12].mxu1 %vm1041_vm14, %v4368_v23  ;;  %v4728_v23 = vld [vmem:[#allocation3 + $0x98] sm:$0xff] }
 0x229   : > { %6822 = vmatprep.mubr.msk.bf16.mxu1 %vm1041_vm14, %v4369_v14  ;;  %v4753_v14 = vpack.c.bf16 %v4729_v48, %v4728_v23 }
 0x22d   : > { %6903 = vmatmul.mubr.msk.bf16.gmra.mrb[80].mxu0 %vm1041_vm14, %v5156_v21  ;;  %v4756_v21 = vpack.c.bf16 %v4735_v62, %v4734_v36 }
 0x22e   : > { %6906 = vmatprep.mubr.msk.bf16.mxu0 %vm1041_vm14, %v5157_v40  ;;  %v4739_v40 = vld [vmem:[#allocation3 + $0xf0] sm:$0xff] }
 0x22f   : > { %v4758_v49 = vpack.c.bf16 %v4739_v40, %v4738_v20 }
 0x230   : > { %6823 = vmatmul.mubr.msk.bf16.gmra.mrb[16].mxu1 %vm1041_vm14, %v4370_v42  ;;  %v4736_v42 = vld [vmem:[#allocation3 + $0xd8] sm:$0xff] }
 0x231   : > { %6826 = vmatprep.mubr.msk.bf16.mxu1 %vm1041_vm14, %v4371_v63  ;;  %v4757_v63 = vpack.c.bf16 %v4737_v37, %v4736_v42 }
 0x235   : > { %6907 = vmatmul.mubr.msk.bf16.gmra.mrb[84].mxu0 %vm1041_vm14, %v5158_v46  ;;  %v4759_v46 = vpack.c.bf16 %v4741_v28, %v4740_v41 }
 0x236   : > { %6910 = vmatprep.mubr.msk.bf16.mxu0 %vm1041_vm14, %v5159_v13  ;;  %v4760_v13 = vpack.c.bf16 %v4743_v11, %v4742_v7 }
 0x238   : > { %6827 = vmatmul.mubr.msk.bf16.gmra.mrb[20].mxu1 %vm1041_vm14, %v4372_v3  ;;  %v4744_v3 = vld [vmem:[#allocation3 + $0x118] sm:$0xff] }
 0x239   : > { %6830 = vmatprep.mubr.msk.bf16.mxu1 %vm1041_vm14, %v4373_v0  ;;  %v4745_v0 = vld [vmem:[#allocation3 + $0x120] sm:$0xff] }
 0x23a   : > { %v4761_v30 = vpack.c.bf16 %v4745_v0, %v4744_v3 }
 0x23d   : > { %6911 = vmatmul.mubr.msk.bf16.gmra.mrb[88].mxu0 %vm1041_vm14, %v5160_v52 }
 0x240   : > { %6831 = vmatmul.mubr.msk.bf16.gmra.mrb[24].mxu1 %vm1041_vm14, %v4374_v12 }
 0x241   : > { %6834 = vmatprep.mubr.msk.bf16.mxu1 %vm1041_vm14, %v4375_v35 }
 0x248   : > { %6835 = vmatmul.mubr.msk.bf16.gmra.mrb[28].mxu1 %vm1041_vm14, %v4376_v25 }
 0x249   : > { %6846 = vmatprep.mubr.msk.bf16.mxu1 %vm1041_vm14, %v4746_v6 }
 0x250   : > { %6847 = vmatmul.mubr.msk.bf16.vlgmr.msra.gmra.mrb[0].mxu1 %vm1041_vm14, %v4747_v24 }
 0x251   : > { %6922 = vmatpush3.bf16.msra.mxu1 %v8407_v5  ;;  %6850 = vmatprep.mubr.msk.bf16.mxu1 %vm1041_vm14, %v4748_v29  ;;  %v4725_v5 = vld [vmem:[#allocation3 + $0x80] sm:$0xff] }
 0x252   : > { %6919 = vmatprep.subr.bf16.mxu1 %v8467_v16  ;;  %v4751_v31 = vpack.c.bf16 %v4725_v5, %v4724_v33 }
 0x255   : > { %6923 = vmatpush3.bf16.msra.mxu1 %v8467_v16  ;;  %v4726_v16 = vld [vmem:[#allocation3 + $0x88] sm:$0xff] }
 0x256   : > { %6920 = vmatprep.subr.bf16.mxu1 %v8485_v56  ;;  %v4752_v55 = vpack.c.bf16 %v4727_v53, %v4726_v16 }
 0x258   : > { %6851 = vmatmul.mubr.msk.bf16.gmra.mrb[4].mxu1 %vm1041_vm14, %v4749_v27 }
 0x259   : > { %6854 = vmatprep.mubr.msk.bf16.mxu1 %vm1041_vm14, %v4750_v38  ;;  %6924 = vmatpush3.bf16.msra.mxu1 %v8485_v56  ;;  %v4754_v56 = vpack.c.bf16 %v4731_v50, %v4730_v4 }
 0x25a   : > { %6921 = vmatprep.subr.bf16.mxu1 %v8518_v43 }
 0x25d   : > { %6925 = vmatpush3.bf16.msra.mxu1 %v8518_v43  ;;  %v4732_v43 = vld [vmem:[#allocation3 + $0xb8] sm:$0xff] }
 0x25e   : > { %v4755_v44 = vpack.c.bf16 %v4733_v19, %v4732_v43 }
 0x260   : > { %6855 = vmatmul.mubr.msk.bf16.gmra.mrb[8].mxu1 %vm1041_vm14, %v4751_v31 }
 0x261   : > { %6858 = vmatprep.mubr.msk.bf16.mxu1 %vm1041_vm14, %v4752_v55 }
 0x268   : > { %6859 = vmatmul.mubr.msk.bf16.gmra.mrb[12].mxu1 %vm1041_vm14, %v4753_v14 }
 0x269   : > { %6862 = vmatprep.mubr.msk.bf16.mxu1 %vm1041_vm14, %v4754_v56 }
 0x270   : > { %6863 = vmatmul.mubr.msk.bf16.gmra.mrb[16].mxu1 %vm1041_vm14, %v4755_v44 }
 0x271   : > { %6866 = vmatprep.mubr.msk.bf16.mxu1 %vm1041_vm14, %v4756_v21 }
 0x278   : > { %6867 = vmatmul.mubr.msk.bf16.gmra.mrb[20].mxu1 %vm1041_vm14, %v4757_v63 }
 0x279   : > { %6870 = vmatprep.mubr.msk.bf16.mxu1 %vm1041_vm14, %v4758_v49 }
 0x280   : > { %6871 = vmatmul.mubr.msk.bf16.gmra.mrb[24].mxu1 %vm1041_vm14, %v4759_v46 }
 0x281   : > { %6874 = vmatprep.mubr.msk.bf16.mxu1 %vm1041_vm14, %v4760_v13 }
 0x288   : > { %6875 = vmatmul.mubr.msk.bf16.gmra.mrb[28].mxu1 %vm1041_vm14, %v4761_v30 }
 0x289   : > { %6914 = vmatprep.mubr.msk.bf16.mxu1 %vm1041_vm14, %v5161_v26 }
 0x294   : > { %6915 = vmatmul.mubr.msk.bf16.vlgmr.msra.gmra.mrb[28].mxu1 %vm1041_vm14, %v5162_v18 }
 0x2a0   : > { %v8859_v52 = vpop.f32.mrb[32].mxu0 }
 0x2a1   : > { %v8861_v39 = vpop.f32.mrb[33].mxu0  ;;  %v6928_v18 = vadd.f32 %v8859_v52, %v1781_v17  ;;  %v1786_v17 = vld [vmem:[#allocation2 + $0x38] sm:$0xff] }
 0x2a2   : > { %v8863_v12 = vpop.f32.mrb[34].mxu0 }
 0x2a3   : > { %v8865_v35 = vpop.f32.mrb[35].mxu0 }
 0x2a8   : > { %v8867_v54 = vpop.f32.mrb[36].mxu0 }
 0x2a9   : > { %v8869_v9 = vpop.f32.mrb[37].mxu0 }
 0x2aa   : > { %v8871_v26 = vpop.f32.mrb[38].mxu0 }
 0x2ab   : > { %v8873_v22 = vpop.f32.mrb[39].mxu0 }
 0x2b0   : > { %v8875_v10 = vpop.f32.mrb[40].mxu0 }
 0x2b1   : > { %v8877_v45 = vpop.f32.mrb[41].mxu0 }
 0x2b2   : > { %v8879_v47 = vpop.f32.mrb[42].mxu0 }
 0x2b3   : > { %v8881_v34 = vpop.f32.mrb[43].mxu0 }
 0x2b8   : > { %v8883_v59 = vpop.f32.mrb[44].mxu0 }
 0x2b9   : > { %v8885_v25 = vpop.f32.mrb[45].mxu0 }
 0x2ba   : > { %v8887_v6 = vpop.f32.mrb[46].mxu0 }
 0x2bb   : > { %v8889_v32 = vpop.f32.mrb[47].mxu0 }
 0x2c0   : > { %v8891_v60 = vpop.f32.mrb[48].mxu0 }
 0x2c1   : > { %v8893_v61 = vpop.f32.mrb[49].mxu0 }
 0x2c2   : > { %v8895_v24 = vpop.f32.mrb[50].mxu0 }
 0x2c3   : > { %v8897_v2 = vpop.f32.mrb[51].mxu0 }
 0x2c8   : > { %v8899_v29 = vpop.f32.mrb[52].mxu0 }
 0x2c9   : > { %v8901_v1 = vpop.f32.mrb[53].mxu0 }
 0x2ca   : > { %v8903_v8 = vpop.f32.mrb[54].mxu0 }
 0x2cb   : > { %v8905_v58 = vpop.f32.mrb[55].mxu0 }
 0x2d0   : > { %v8907_v27 = vpop.f32.mrb[56].mxu0 }
 0x2d1   : > { %9326 = vst [vmem:[#allocation15_spill] sm:$0xff] %v8907_v27  ;;  %v8909_v57 = vpop.f32.mrb[57].mxu0 }
 0x2d2   : > { %9327 = vst [vmem:[#allocation16_spill] sm:$0xff] %v8909_v57  ;;  %v8911_v38 = vpop.f32.mrb[58].mxu0 }
 0x2d3   : > { %9328 = vst [vmem:[#allocation17_spill] sm:$0xff] %v8911_v38  ;;  %v8913_v5 = vpop.f32.mrb[59].mxu0 }
 0x2d4   : > { %9329 = vst [vmem:[#allocation18_spill] sm:$0xff] %v8913_v5 }
 0x2d8   : > { %v8915_v53 = vpop.f32.mrb[60].mxu0 }
 0x2d9   : > { %9330 = vst [vmem:[#allocation19_spill] sm:$0xff] %v8915_v53  ;;  %v8917_v33 = vpop.f32.mrb[61].mxu0  ;;  %v6946_v53 = vadd.f32 %v8863_v12, %v1782_v51 }
 0x2da   : > { %9331 = vst [vmem:[#allocation20_spill] sm:$0xff] %v8917_v33  ;;  %v8919_v31 = vpop.f32.mrb[62].mxu0 }
 0x2db   : > { %9332 = vst [vmem:[#allocation21_spill] sm:$0xff] %v8919_v31  ;;  %v8921_v16 = vpop.f32.mrb[63].mxu0  ;;  %v6937_v31 = vadd.f32 %v8861_v39, %v1779_v15 }
 0x2dc   : > { %9333 = vst [vmem:[#allocation22_spill] sm:$0xff] %v8921_v16  ;;  %v1780_v16 = vld [vmem:[#allocation2 + $0x8] sm:$0xff] }
 0x2e0   : > { %v6888_v55 = vpop.f32.mrb[64].mxu0 }
 0x2e1   : > { %v5309_v48 = vpop.f32.mrb[65].mxu0 }
 0x2e2   : > { %v6889_v50 = vpop.f32.mrb[66].mxu0 }
 0x2e3   : > { %v5312_v23 = vpop.f32.mrb[67].mxu0 }
 0x2e8   : > { %v6892_v14 = vpop.f32.mrb[68].mxu0 }
 0x2e9   : > { %v8923_v4 = vpop.f32.mrb[69].mxu0 }
 0x2ea   : > { %v8925_v56 = vpop.f32.mrb[70].mxu0 }
 0x2eb   : > { %v8927_v19 = vpop.f32.mrb[71].mxu0 }
 0x2f0   : > { %v8929_v62 = vpop.f32.mrb[72].mxu0 }
 0x2f1   : > { %v8931_v43 = vpop.f32.mrb[73].mxu0 }
 0x2f2   : > { %v8933_v44 = vpop.f32.mrb[74].mxu0 }
 0x2f3   : > { %v8935_v36 = vpop.f32.mrb[75].mxu0 }
 0x2f8   : > { %v8937_v21 = vpop.f32.mrb[76].mxu0 }
 0x2f9   : > { %v8939_v37 = vpop.f32.mrb[77].mxu0 }
 0x2fa   : > { %v8941_v40 = vpop.f32.mrb[78].mxu0 }
 0x2fb   : > { %v8943_v42 = vpop.f32.mrb[79].mxu0 }
 0x300   : > { %v8945_v63 = vpop.f32.mrb[80].mxu0 }
 0x301   : > { %v8947_v20 = vpop.f32.mrb[81].mxu0 }
 0x302   : > { %v8949_v49 = vpop.f32.mrb[82].mxu0 }
 0x303   : > { %v8951_v28 = vpop.f32.mrb[83].mxu0 }
 0x308   : > { %v8953_v11 = vpop.f32.mrb[84].mxu0 }
 0x309   : > { %9334 = vst [vmem:[#allocation23_spill] sm:$0xff] %v8953_v11  ;;  %v8955_v41 = vpop.f32.mrb[85].mxu0  ;;  %v1783_v11 = vld [vmem:[#allocation2 + $0x20] sm:$0xff] }
 0x30a   : > { %9335 = vst [vmem:[#allocation24_spill] sm:$0xff] %v8955_v41  ;;  %v8957_v46 = vpop.f32.mrb[86].mxu0 }
 0x30b   : > { %9336 = vst [vmem:[#allocation25_spill] sm:$0xff] %v8957_v46  ;;  %v8959_v7 = vpop.f32.mrb[87].mxu0 }
 0x30c   : > { %9337 = vst [vmem:[#allocation26_spill] sm:$0xff] %v8959_v7  ;;  %v1785_v7 = vld [vmem:[#allocation2 + $0x30] sm:$0xff] }
 0x30d   : > { %v6964_v12 = vadd.f32 %v8867_v54, %v1785_v7 }
 0x310   : > { %v8961_v13 = vpop.f32.mrb[88].mxu0 }
 0x311   : > { %9338 = vst [vmem:[#allocation27_spill] sm:$0xff] %v8961_v13  ;;  %v8963_v3 = vpop.f32.mrb[89].mxu0  ;;  %v6955_v13 = vadd.f32 %v8865_v35, %v1780_v16  ;;  %v6973_v35 = vadd.f32 %v8869_v9, %v1783_v11  ;;  %v1790_v11 = vld [vmem:[#allocation2 + $0x58] sm:$0xff] }
 0x312   : > { %9339 = vst [vmem:[#allocation28_spill] sm:$0xff] %v8963_v3  ;;  %v8965_v0 = vpop.f32.mrb[90].mxu0 }
 0x313   : > { %9340 = vst [vmem:[#allocation29_spill] sm:$0xff] %v8965_v0  ;;  %v8967_v30 = vpop.f32.mrb[91].mxu0 }
 0x314   : > { %9341 = vst [vmem:[#allocation30_spill] sm:$0xff] %v8967_v30 }
 0x323   : > { %v6848_v33 = vpop.f32.mrb[0].mxu1 }
 0x324   : > { %v6931_v5 = vadd.f32 %v6928_v18, %v6848_v33  ;;  %v4908_v38 = vpop.f32.mrb[1].mxu1  ;;  %v1784_v33 = vld [vmem:[#allocation2 + $0x28] sm:$0xff] }
 0x325   : > { %v6940_v3 = vadd.f32 %v6937_v31, %v4908_v38  ;;  %v6849_v57 = vpop.f32.mrb[2].mxu1  ;;  %v6991_v31 = vadd.f32 %v8873_v22, %v1784_v33  ;;  %v1788_v22 = vld [vmem:[#allocation2 + $0x48] sm:$0xff] }
 0x326   : > { %v6934_v0 = vadd.f32 %v6931_v5, %v6888_v55  ;;  %v6949_v27 = vadd.f32 %v6946_v53, %v6849_v57  ;;  %v4911_v30 = vpop.f32.mrb[3].mxu1  ;;  %v6982_v57 = vadd.f32 %v8871_v26, %v1786_v17  ;;  %v1792_v33 = vld [vmem:[#allocation2 + $0x68] sm:$0xff] }
 0x327   : > { %v6943_v46 = vadd.f32 %v6940_v3, %v5309_v48  ;;  %v6958_v41 = vadd.f32 %v6955_v13, %v4911_v30  ;;  %v7018_v3 = vadd.f32 %v8879_v47, %v1790_v11  ;;  %v7027_v30 = vadd.f32 %v8881_v34, %v1788_v22  ;;  %v1801_v22 = vld [vmem:[#allocation2 + $0xb0] sm:$0xff] }
 0x328   : > { %5470 = vst [vmem:[#allocation2 + $0x10] sm:$0xff] %v6934_v0  ;;  %v6952_v52 = vadd.f32 %v6949_v27, %v6889_v50 }
 0x329   : > { %5468 = vst [vmem:[#allocation2] sm:$0xff] %v6943_v46  ;;  %v6961_v39 = vadd.f32 %v6958_v41, %v5312_v23  ;;  %v1789_v23 = vld [vmem:[#allocation2 + $0x50] sm:$0xff]  ;;  %v1787_v46 = vld [vmem:[#allocation2 + $0x40] sm:$0xff] }
 0x32a   : > { %5471 = vst [vmem:[#allocation2 + $0x18] sm:$0xff] %v6952_v52  ;;  %v7000_v7 = vadd.f32 %v8875_v10, %v1789_v23  ;;  %v1793_v52 = vld [vmem:[#allocation2 + $0x70] sm:$0xff]  ;;  %v1796_v23 = vld [vmem:[#allocation2 + $0x88] sm:$0xff] }
 0x32b   : > { %5469 = vst [vmem:[#allocation2 + $0x8] sm:$0xff] %v6961_v39  ;;  %v6852_v38 = vpop.f32.mrb[4].mxu1  ;;  %v1791_v39 = vld [vmem:[#allocation2 + $0x60] sm:$0xff]  ;;  %v7036_v34 = vadd.f32 %v8883_v59, %v1793_v52 }
 0x32c   : > { %v6967_v5 = vadd.f32 %v6964_v12, %v6852_v38  ;;  %v4924_v53 = vpop.f32.mrb[5].mxu1  ;;  %v1794_v12 = vld [vmem:[#allocation2 + $0x78] sm:$0xff] }
 0x32d   : > { %v6976_v16 = vadd.f32 %v6973_v35, %v4924_v53  ;;  %v6853_v55 = vpop.f32.mrb[6].mxu1  ;;  %v7054_v38 = vadd.f32 %v8887_v6, %v1794_v12 }
 0x32e   : > { %v6970_v27 = vadd.f32 %v6967_v5, %v6892_v14  ;;  %v6985_v48 = vadd.f32 %v6982_v57, %v6853_v55  ;;  %v4927_v50 = vpop.f32.mrb[7].mxu1  ;;  %v7009_v14 = vadd.f32 %v8877_v45, %v1787_v46  ;;  %v7063_v5 = vadd.f32 %v8889_v32, %v1792_v33  ;;  %v1797_v55 = vld [vmem:[#allocation2 + $0x90] sm:$0xff] }
 0x32f   : > { %v6979_v54 = vadd.f32 %v6976_v16, %v8923_v4  ;;  %v6994_v41 = vadd.f32 %v6991_v31, %v4927_v50  ;;  %v1798_v50 = vld [vmem:[#allocation2 + $0x98] sm:$0xff]  ;;  %v7072_v32 = vadd.f32 %v8891_v60, %v1797_v55  ;;  %v9346_v33 = vld [vmem:[#allocation15_spill] sm:$0xff] }
 0x330   : > { %5474 = vst [vmem:[#allocation2 + $0x30] sm:$0xff] %v6970_v27  ;;  %v6988_v9 = vadd.f32 %v6985_v48, %v8925_v56  ;;  %v1795_v48 = vld [vmem:[#allocation2 + $0x80] sm:$0xff] }
 0x331   : > { %5472 = vst [vmem:[#allocation2 + $0x20] sm:$0xff] %v6979_v54  ;;  %v6997_v26 = vadd.f32 %v6994_v41, %v8927_v19  ;;  %v7090_v41 = vadd.f32 %v8895_v24, %v1798_v50  ;;  %v9351_v50 = vld [vmem:[#allocation28_spill] sm:$0xff] }
 0x332   : > { %5475 = vst [vmem:[#allocation2 + $0x38] sm:$0xff] %v6988_v9  ;;  %v7099_v9 = vadd.f32 %v8897_v2, %v1796_v23  ;;  %v7108_v2 = vadd.f32 %v8899_v29, %v1801_v22  ;;  %v9343_v29 = vld [vmem:[#allocation24_spill] sm:$0xff]  ;;  %v9352_v23 = vld [vmem:[#allocation29_spill] sm:$0xff] }
 0x333   : > { %5473 = vst [vmem:[#allocation2 + $0x28] sm:$0xff] %v6997_v26  ;;  %v6856_v13 = vpop.f32.mrb[8].mxu1 }
 0x334   : > { %v7003_v4 = vadd.f32 %v7000_v7, %v6856_v13  ;;  %v4940_v0 = vpop.f32.mrb[9].mxu1  ;;  %v1799_v13 = vld [vmem:[#allocation2 + $0xa0] sm:$0xff] }
 0x335   : > { %v7012_v15 = vadd.f32 %v7009_v14, %v4940_v0  ;;  %v6857_v56 = vpop.f32.mrb[10].mxu1 }
 0x336   : > { %v7006_v51 = vadd.f32 %v7003_v4, %v8929_v62  ;;  %v7021_v18 = vadd.f32 %v7018_v3, %v6857_v56  ;;  %v4943_v19 = vpop.f32.mrb[11].mxu1  ;;  %v7045_v62 = vadd.f32 %v8885_v25, %v1791_v39  ;;  %v1802_v3 = vld [vmem:[#allocation2 + $0xb8] sm:$0xff]  ;;  %v1800_v4 = vld [vmem:[#allocation2 + $0xa8] sm:$0xff] }
 0x337   : > { %v7015_v10 = vadd.f32 %v7012_v15, %v8931_v43  ;;  %v7030_v17 = vadd.f32 %v7027_v30, %v4943_v19  ;;  %v7126_v30 = vadd.f32 %v8903_v8, %v1802_v3  ;;  %v7135_v56 = vadd.f32 %v8905_v58, %v1800_v4  ;;  %v9345_v8 = vld [vmem:[#allocation26_spill] sm:$0xff] }
 0x338   : > { %5478 = vst [vmem:[#allocation2 + $0x50] sm:$0xff] %v7006_v51  ;;  %v7024_v45 = vadd.f32 %v7021_v18, %v8933_v44  ;;  %v9342_v18 = vld [vmem:[#allocation23_spill] sm:$0xff]  ;;  %v9357_v3 = vld [vmem:[#allocation22_spill] sm:$0xff] }
 0x339   : > { %5476 = vst [vmem:[#allocation2 + $0x40] sm:$0xff] %v7015_v10  ;;  %v7033_v47 = vadd.f32 %v7030_v17, %v8935_v36  ;;  %v1805_v10 = vld [vmem:[#allocation2 + $0xd0] sm:$0xff] }
 0x33a   : > { %5479 = vst [vmem:[#allocation2 + $0x58] sm:$0xff] %v7024_v45  ;;  %v1803_v45 = vld [vmem:[#allocation2 + $0xc0] sm:$0xff]  ;;  %v7144_v58 = vadd.f32 %v9346_v33, %v1805_v10 }
 0x33b   : > { %5477 = vst [vmem:[#allocation2 + $0x48] sm:$0xff] %v7033_v47  ;;  %v6860_v35 = vpop.f32.mrb[12].mxu1  ;;  %v1806_v47 = vld [vmem:[#allocation2 + $0xd8] sm:$0xff] }
 0x33c   : > { %v7039_v43 = vadd.f32 %v7036_v34, %v6860_v35  ;;  %v4956_v57 = vpop.f32.mrb[13].mxu1  ;;  %v9347_v35 = vld [vmem:[#allocation16_spill] sm:$0xff] }
 0x33d   : > { %v7048_v53 = vadd.f32 %v7045_v62, %v4956_v57  ;;  %v6861_v44 = vpop.f32.mrb[14].mxu1  ;;  %v1804_v62 = vld [vmem:[#allocation2 + $0xc8] sm:$0xff]  ;;  %v9348_v57 = vld [vmem:[#allocation17_spill] sm:$0xff] }
 0x33e   : > { %v7042_v31 = vadd.f32 %v7039_v43, %v8937_v21  ;;  %v7057_v16 = vadd.f32 %v7054_v38, %v6861_v44  ;;  %v4959_v36 = vpop.f32.mrb[15].mxu1  ;;  %v7081_v21 = vadd.f32 %v8893_v61, %v1795_v48  ;;  %v7153_v38 = vadd.f32 %v9347_v35, %v1803_v45 }
 0x33f   : > { %v7051_v59 = vadd.f32 %v7048_v53, %v8939_v37  ;;  %v7066_v27 = vadd.f32 %v7063_v5, %v4959_v36  ;;  %v7162_v5 = vadd.f32 %v9348_v57, %v1806_v47 }
 0x340   : > { %5482 = vst [vmem:[#allocation2 + $0x70] sm:$0xff] %v7042_v31  ;;  %v7060_v25 = vadd.f32 %v7057_v16, %v8941_v40  ;;  %v9349_v31 = vld [vmem:[#allocation18_spill] sm:$0xff] }
 0x341   : > { %5480 = vst [vmem:[#allocation2 + $0x60] sm:$0xff] %v7051_v59  ;;  %v7069_v6 = vadd.f32 %v7066_v27, %v8943_v42  ;;  %v7171_v16 = vadd.f32 %v9349_v31, %v1804_v62  ;;  %v9350_v59 = vld [vmem:[#allocation27_spill] sm:$0xff] }
 0x342   : > { %5483 = vst [vmem:[#allocation2 + $0x78] sm:$0xff] %v7060_v25 }
 0x343   : > { %5481 = vst [vmem:[#allocation2 + $0x68] sm:$0xff] %v7069_v6  ;;  %v6864_v54 = vpop.f32.mrb[16].mxu1 }
 0x344   : > { %v7075_v37 = vadd.f32 %v7072_v32, %v6864_v54  ;;  %v4972_v46 = vpop.f32.mrb[17].mxu1  ;;  %v9353_v54 = vld [vmem:[#allocation30_spill] sm:$0xff] }
 0x345   : > { %v7084_v11 = vadd.f32 %v7081_v21, %v4972_v46  ;;  %v6865_v40 = vpop.f32.mrb[18].mxu1  ;;  %v1807_v46 = vld [vmem:[#allocation2 + $0xe0] sm:$0xff] }
 0x346   : > { %v7078_v26 = vadd.f32 %v7075_v37, %v8945_v63  ;;  %v7093_v7 = vadd.f32 %v7090_v41, %v6865_v40  ;;  %v4975_v42 = vpop.f32.mrb[19].mxu1  ;;  %v7117_v63 = vadd.f32 %v8901_v1, %v1799_v13  ;;  %v9344_v1 = vld [vmem:[#allocation25_spill] sm:$0xff]  ;;  %v1809_v37 = vld [vmem:[#allocation2 + $0xf0] sm:$0xff] }
 0x347   : > { %v7087_v60 = vadd.f32 %v7084_v11, %v8947_v20  ;;  %v7102_v14 = vadd.f32 %v7099_v9, %v4975_v42  ;;  %v1810_v9 = vld [vmem:[#allocation2 + $0xf8] sm:$0xff]  ;;  %v9354_v11 = vld [vmem:[#allocation19_spill] sm:$0xff] }
 0x348   : > { %5486 = vst [vmem:[#allocation2 + $0x90] sm:$0xff] %v7078_v26  ;;  %v7096_v61 = vadd.f32 %v7093_v7, %v8949_v49  ;;  %v7180_v40 = vadd.f32 %v9354_v11, %v1809_v37  ;;  %v1808_v26 = vld [vmem:[#allocation2 + $0xe8] sm:$0xff]  ;;  %v9355_v7 = vld [vmem:[#allocation20_spill] sm:$0xff] }
 0x349   : > { %5484 = vst [vmem:[#allocation2 + $0x80] sm:$0xff] %v7087_v60  ;;  %v7105_v24 = vadd.f32 %v7102_v14, %v8951_v28  ;;  %v7186_v42 = vadd.f32 %v9355_v7, %v1807_v46  ;;  %v9356_v60 = vld [vmem:[#allocation21_spill] sm:$0xff] }
 0x34a   : > { %5487 = vst [vmem:[#allocation2 + $0x98] sm:$0xff] %v7096_v61  ;;  %v7192_v14 = vadd.f32 %v9356_v60, %v1810_v9 }
 0x34b   : > { %5485 = vst [vmem:[#allocation2 + $0x88] sm:$0xff] %v7105_v24  ;;  %v6868_v0 = vpop.f32.mrb[20].mxu1  ;;  %v7198_v24 = vadd.f32 %v9357_v3, %v1808_v26 }
 0x34c   : > { %v7111_v20 = vadd.f32 %v7108_v2, %v6868_v0  ;;  %v4988_v15 = vpop.f32.mrb[21].mxu1 }
 0x34d   : > { %v7120_v51 = vadd.f32 %v7117_v63, %v4988_v15  ;;  %v6869_v49 = vpop.f32.mrb[22].mxu1 }
 0x34e   : > { %v7114_v19 = vadd.f32 %v7111_v20, %v9342_v18  ;;  %v7129_v52 = vadd.f32 %v7126_v30, %v6869_v49  ;;  %v4991_v28 = vpop.f32.mrb[23].mxu1 }
 0x34f   : > { %v7123_v17 = vadd.f32 %v7120_v51, %v9343_v29  ;;  %v7138_v39 = vadd.f32 %v7135_v56, %v4991_v28 }
 0x350   : > { %5490 = vst [vmem:[#allocation2 + $0xb0] sm:$0xff] %v7114_v19  ;;  %v7132_v12 = vadd.f32 %v7129_v52, %v9344_v1 }
 0x351   : > { %5488 = vst [vmem:[#allocation2 + $0xa0] sm:$0xff] %v7123_v17  ;;  %v7141_v34 = vadd.f32 %v7138_v39, %v9345_v8 }
 0x352   : > { %5491 = vst [vmem:[#allocation2 + $0xb8] sm:$0xff] %v7132_v12 }
 0x353   : > { %5489 = vst [vmem:[#allocation2 + $0xa8] sm:$0xff] %v7141_v34  ;;  %v6872_v43 = vpop.f32.mrb[24].mxu1 }
 0x354   : > { %v7147_v53 = vadd.f32 %v7144_v58, %v6872_v43  ;;  %v5004_v44 = vpop.f32.mrb[25].mxu1 }
 0x355   : > { %v7156_v36 = vadd.f32 %v7153_v38, %v5004_v44  ;;  %v6873_v55 = vpop.f32.mrb[26].mxu1 }
 0x356   : > { %v7150_v27 = vadd.f32 %v7147_v53, %v9350_v59  ;;  %v7165_v48 = vadd.f32 %v7162_v5, %v6873_v55  ;;  %v5007_v25 = vpop.f32.mrb[27].mxu1 }
 0x357   : > { %v7159_v6 = vadd.f32 %v7156_v36, %v9351_v50  ;;  %v7174_v32 = vadd.f32 %v7171_v16, %v5007_v25 }
 0x358   : > { %5494 = vst [vmem:[#allocation2 + $0xd0] sm:$0xff] %v7150_v27  ;;  %v7168_v21 = vadd.f32 %v7165_v48, %v9352_v23 }
 0x359   : > { %5492 = vst [vmem:[#allocation2 + $0xc0] sm:$0xff] %v7159_v6  ;;  %v7177_v41 = vadd.f32 %v7174_v32, %v9353_v54 }
 0x35a   : > { %5495 = vst [vmem:[#allocation2 + $0xd8] sm:$0xff] %v7168_v21 }
 0x35b   : > { %5493 = vst [vmem:[#allocation2 + $0xc8] sm:$0xff] %v7177_v41 }
 0x367   : > { %v6916_v22 = vpop.f32.mrb[28].mxu1 }
 0x368   : > { %v7183_v13 = vadd.f32 %v7180_v40, %v6916_v22  ;;  %v5421_v61 = vpop.f32.mrb[29].mxu1 }
 0x369   : > { %v7189_v2 = vadd.f32 %v7186_v42, %v5421_v61  ;;  %v6917_v4 = vpop.f32.mrb[30].mxu1 }
 0x36a   : > { %5498 = vst [vmem:[#allocation2 + $0xf0] sm:$0xff] %v7183_v13  ;;  %v7195_v63 = vadd.f32 %v7192_v14, %v6917_v4  ;;  %v5424_v0 = vpop.f32.mrb[31].mxu1 }
 0x36b   : > { %5496 = vst [vmem:[#allocation2 + $0xe0] sm:$0xff] %v7189_v2  ;;  %v7201_v30 = vadd.f32 %v7198_v24, %v5424_v0 }
 0x36c   : > { %5499 = vst [vmem:[#allocation2 + $0xf8] sm:$0xff] %v7195_v63 }
 0x36d   : > { %5497 = vst [vmem:[#allocation2 + $0xe8] sm:$0xff] %v7201_v30 }
 0x36e PF: > { %p6213_p12 = scmp.ne.s32.totalorder %s7640_s21, 2 }
 0x36f   : > { %v5504_v20 = vld [vmem:[#allocation2] sm:$0xff] (!%p6213_p12)  ;;  %v5505_v18 = vld [vmem:[#allocation2 + $0x8] sm:$0xff] (!%p6213_p12)  ;;  %v5506_v52 = vld [vmem:[#allocation2 + $0x10] sm:$0xff] (!%p6213_p12) }
 0x370   : > { %5503 = sbr.rel (%p6213_p12) target bundleno = 933 (0x3a5), region = 52  ;;  %v9028_v15 = vld [vmem:[%s9185_s4] ss:$0 sm:$0xff] (!%p6213_p12)  ;;  %v6291_v28 = vld [vmem:[%s7809_s14 + $0x8] sm:$0xff] (!%p6213_p12)   ;;  %v5507_v39 = vld [vmem:[#allocation2 + $0x18] sm:$0xff] (!%p6213_p12) }
 0x371   : > { %v6228_v56 = vld [vmem:[%s7809_s14] sm:$0xff] (!%p6213_p12)   ;;  %v5543_v51 = vadd.f32 (!%p6213_p12), %v9028_v15, %v5504_v20  ;;  %v5544_v10 = vadd.f32 (!%p6213_p12), %v9028_v15, %v5505_v18  ;;  %v5545_v29 = vadd.f32 (!%p6213_p12), %v9028_v15, %v5506_v52  ;;  %v6233_v17 = vunpack.c.l.bf16 (!%p6213_p12), %v6291_v28  ;;  %v6292_v34 = vld [vmem:[%s7809_s14 + $0x10] sm:$0xff] (!%p6213_p12)   ;;  %v5509_v38 = vld [vmem:[#allocation2 + $0x28] sm:$0xff] (!%p6213_p12) }
 0x372   : > { %v6229_v49 = vunpack.c.l.bf16 (!%p6213_p12), %v6228_v56  ;;  %v6230_v19 = vunpack.c.h.bf16 (!%p6213_p12), %v6228_v56  ;;  %v6234_v45 = vunpack.c.h.bf16 (!%p6213_p12), %v6291_v28  ;;  %v5508_v1 = vld [vmem:[#allocation2 + $0x20] sm:$0xff] (!%p6213_p12)  ;;  %v5546_v47 = vadd.f32 (!%p6213_p12), %v9028_v15, %v5507_v39  ;;  %v5510_v44 = vld [vmem:[#allocation2 + $0x30] sm:$0xff] (!%p6213_p12)  ;;  %v6293_v31 = vld [vmem:[%s7809_s14 + $0x18] sm:$0xff] (!%p6213_p12)  }
 0x373   : > { %vm5575_vm14 = vcmp.ge.f32.partialorder (!%p6213_p12), %v5543_v51, 0.0  ;;  %v5607_v12 = vmul.f32 (!%p6213_p12), 0.1, %v5543_v51  ;;  %v5547_v8 = vadd.f32 (!%p6213_p12), %v9028_v15, %v5508_v1  ;;  %vm5576_vm0 = vcmp.ge.f32.partialorder (!%p6213_p12), %v5544_v10, 0.0  ;;  %v5511_v16 = vld [vmem:[#allocation2 + $0x38] sm:$0xff] (!%p6213_p12)  ;;  %v5512_v48 = vld [vmem:[#allocation2 + $0x40] sm:$0xff] (!%p6213_p12) }
 0x374   : > { %v5608_v33 = vmul.f32 (!%p6213_p12), 0.1, %v5544_v10  ;;  %vm5577_vm9 = vcmp.ge.f32.partialorder (!%p6213_p12), %v5545_v29, 0.0  ;;  %v5609_v58 = vmul.f32 (!%p6213_p12), 0.1, %v5545_v29  ;;  %vm5578_vm15 = vcmp.ge.f32.partialorder (!%p6213_p12), %v5546_v47, 0.0 }
 0x375   : > { %v5639_v62 = vsel (!%p6213_p12), %vm5575_vm14, %v5543_v51, %v5607_v12  ;;  %v5610_v35 = vmul.f32 (!%p6213_p12), 0.1, %v5546_v47  ;;  %vm5579_vm12 = vcmp.ge.f32.partialorder (!%p6213_p12), %v5547_v8, 0.0  ;;  %v5611_v53 = vmul.f32 (!%p6213_p12), 0.1, %v5547_v8  ;;  %v6294_v37 = vld [vmem:[%s7809_s14 + $0x20] sm:$0xff] (!%p6213_p12)  }
 0x376   : > { %v5735_v43 = vadd.f32 (!%p6213_p12), %v6229_v49, %v5639_v62  ;;  %v5640_v57 = vsel (!%p6213_p12), %vm5576_vm0, %v5544_v10, %v5608_v33  ;;  %v5641_v5 = vsel (!%p6213_p12), %vm5577_vm9, %v5545_v29, %v5609_v58  ;;  %v6237_v27 = vunpack.c.l.bf16 (!%p6213_p12), %v6292_v34  ;;  %v5513_v40 = vld [vmem:[#allocation2 + $0x48] sm:$0xff] (!%p6213_p12)  ;;  %v5514_v14 = vld [vmem:[#allocation2 + $0x50] sm:$0xff] (!%p6213_p12)  ;;  %v5515_v4 = vld [vmem:[#allocation2 + $0x58] sm:$0xff] (!%p6213_p12) }
 0x377   : > { %v5736_v36 = vadd.f32 %v6230_v19, %v5640_v57  ;;  %v5737_v55 = vadd.f32 %v6233_v17, %v5641_v5  ;;  %v5642_v59 = vsel %vm5578_vm15, %v5546_v47, %v5610_v35  ;;  %v5643_v50 = vsel %vm5579_vm12, %v5547_v8, %v5611_v53  ;;  %v6295_v2 = vld [vmem:[%s7809_s14 + $0x28] sm:$0xff]   ;;  %v5516_v63 = vld [vmem:[#allocation2 + $0x60] sm:$0xff]  ;;  %v6296_v51 = vld [vmem:[%s7809_s14 + $0x30] sm:$0xff]  }
 0x378   : > { %5767 = vst [vmem:[%s7812_s20] sm:$0xff] %v5735_v43  ;;  %v5738_v25 = vadd.f32 %v6234_v45, %v5642_v59  ;;  %v5548_v6 = vadd.f32 %v9028_v15, %v5509_v38  ;;  %v6238_v32 = vunpack.c.h.bf16 %v6292_v34  ;;  %v5739_v23 = vadd.f32 %v6237_v27, %v5643_v50  ;;  %v5517_v17 = vld [vmem:[#allocation2 + $0x68] sm:$0xff]  ;;  %v5518_v12 = vld [vmem:[#allocation2 + $0x70] sm:$0xff]  ;;  %v6297_v47 = vld [vmem:[%s7809_s14 + $0x38] sm:$0xff]  }
 0x379   : > { %5768 = vst [vmem:[%s7812_s20 + $0x8] sm:$0xff] %v5736_v36  ;;  %5769 = vst [vmem:[%s7812_s20 + $0x10] sm:$0xff] %v5737_v55  ;;  %v5549_v21 = vadd.f32 %v9028_v15, %v5510_v44  ;;  %v6241_v54 = vunpack.c.l.bf16 %v6293_v31  ;;  %v5550_v41 = vadd.f32 %v9028_v15, %v5511_v16  ;;  %v6242_v9 = vunpack.c.h.bf16 %v6293_v31  ;;  %v5519_v38 = vld [vmem:[#allocation2 + $0x78] sm:$0xff]  ;;  %v5520_v44 = vld [vmem:[#allocation2 + $0x80] sm:$0xff] }
 0x37a   : > { %5770 = vst [vmem:[%s7812_s20 + $0x18] sm:$0xff] %v5738_v25  ;;  %vm5580_vm2 = vcmp.ge.f32.partialorder %v5548_v6, 0.0  ;;  %v5612_v46 = vmul.f32 0.1, %v5548_v6  ;;  %v5551_v11 = vadd.f32 %v9028_v15, %v5512_v48  ;;  %5771 = vst [vmem:[%s7812_s20 + $0x20] sm:$0xff] %v5739_v23  ;;  %v6245_v60 = vunpack.c.l.bf16 %v6294_v37  ;;  %v6298_v31 = vld [vmem:[%s7809_s14 + $0x40] sm:$0xff]  }
 0x37b   : > { %vm5581_vm3 = vcmp.ge.f32.partialorder %v5549_v21, 0.0  ;;  %v5613_v26 = vmul.f32 0.1, %v5549_v21  ;;  %vm5582_vm8 = vcmp.ge.f32.partialorder %v5550_v41, 0.0  ;;  %v5614_v7 = vmul.f32 0.1, %v5550_v41 }
 0x37c   : > { %v5644_v42 = vsel %vm5580_vm2, %v5548_v6, %v5612_v46  ;;  %vm5583_vm10 = vcmp.ge.f32.partialorder %v5551_v11, 0.0  ;;  %v5615_v22 = vmul.f32 0.1, %v5551_v11  ;;  %v5552_v24 = vadd.f32 %v9028_v15, %v5513_v40  ;;  %v5521_v25 = vld [vmem:[#allocation2 + $0x88] sm:$0xff] }
 0x37d   : > { %v5740_v13 = vadd.f32 %v6238_v32, %v5644_v42  ;;  %v5645_v61 = vsel %vm5581_vm3, %v5549_v21, %v5613_v26  ;;  %v5646_v3 = vsel %vm5582_vm8, %v5550_v41, %v5614_v7  ;;  %v6246_v56 = vunpack.c.h.bf16 %v6294_v37  ;;  %v5522_v21 = vld [vmem:[#allocation2 + $0x90] sm:$0xff]  ;;  %v5523_v26 = vld [vmem:[#allocation2 + $0x98] sm:$0xff] }
 0x37e   : > { %v5741_v0 = vadd.f32 %v6241_v54, %v5645_v61  ;;  %v5742_v30 = vadd.f32 %v6242_v9, %v5646_v3  ;;  %v5647_v20 = vsel %vm5583_vm10, %v5551_v11, %v5615_v22  ;;  %vm5584_vm1 = vcmp.ge.f32.partialorder %v5552_v24, 0.0  ;;  %v6299_v54 = vld [vmem:[%s7809_s14 + $0x48] sm:$0xff]  }
 0x37f   : > { %5772 = vst [vmem:[%s7812_s20 + $0x28] sm:$0xff] %v5740_v13  ;;  %v5743_v49 = vadd.f32 %v6245_v60, %v5647_v20  ;;  %v5616_v18 = vmul.f32 0.1, %v5552_v24  ;;  %v5553_v19 = vadd.f32 %v9028_v15, %v5514_v14  ;;  %v6249_v52 = vunpack.c.l.bf16 %v6295_v2  ;;  %v5524_v14 = vld [vmem:[#allocation2 + $0xa0] sm:$0xff]  ;;  %v6300_v13 = vld [vmem:[%s7809_s14 + $0x50] sm:$0xff]  }
 0x380   : > { %5773 = vst [vmem:[%s7812_s20 + $0x30] sm:$0xff] %v5741_v0  ;;  %5774 = vst [vmem:[%s7812_s20 + $0x38] sm:$0xff] %v5742_v30  ;;  %v5554_v28 = vadd.f32 %v9028_v15, %v5515_v4  ;;  %v6250_v10 = vunpack.c.h.bf16 %v6295_v2  ;;  %v5555_v29 = vadd.f32 %v9028_v15, %v5516_v63  ;;  %v6253_v1 = vunpack.c.l.bf16 %v6296_v51  ;;  %v5525_v0 = vld [vmem:[#allocation2 + $0xa8] sm:$0xff] }
 0x381   : > { %5775 = vst [vmem:[%s7812_s20 + $0x40] sm:$0xff] %v5743_v49  ;;  %v5648_v39 = vsel %vm5584_vm1, %v5552_v24, %v5616_v18  ;;  %vm5585_vm11 = vcmp.ge.f32.partialorder %v5553_v19, 0.0  ;;  %v5617_v45 = vmul.f32 0.1, %v5553_v19  ;;  %v5556_v62 = vadd.f32 %v9028_v15, %v5517_v17  ;;  %v5526_v49 = vld [vmem:[#allocation2 + $0xb0] sm:$0xff]  ;;  %v6301_v18 = vld [vmem:[%s7809_s14 + $0x58] sm:$0xff]  }
 0x382   : > { %v5744_v8 = vadd.f32 %v6246_v56, %v5648_v39  ;;  %vm5586_vm6 = vcmp.ge.f32.partialorder %v5554_v28, 0.0  ;;  %v5618_v34 = vmul.f32 0.1, %v5554_v28  ;;  %vm5587_vm7 = vcmp.ge.f32.partialorder %v5555_v29, 0.0  ;;  %v5527_v39 = vld [vmem:[#allocation2 + $0xb8] sm:$0xff] }
 0x383   : > { %v5649_v33 = vsel %vm5585_vm11, %v5553_v19, %v5617_v45  ;;  %v5619_v58 = vmul.f32 0.1, %v5555_v29  ;;  %v6254_v35 = vunpack.c.h.bf16 %v6296_v51  ;;  %v5557_v5 = vadd.f32 %v9028_v15, %v5518_v12 }
 0x384   : > { %5776 = vst [vmem:[%s7812_s20 + $0x48] sm:$0xff] %v5744_v8  ;;  %v5745_v43 = vadd.f32 %v6249_v52, %v5649_v33  ;;  %v5650_v57 = vsel %vm5586_vm6, %v5554_v28, %v5618_v34  ;;  %v6257_v53 = vunpack.c.l.bf16 %v6297_v47  ;;  %vm5588_vm4 = vcmp.ge.f32.partialorder %v5556_v62, 0.0  ;;  %v5528_v8 = vld [vmem:[#allocation2 + $0xc0] sm:$0xff] }
 0x385   : > { %v5746_v16 = vadd.f32 %v6250_v10, %v5650_v57  ;;  %v5651_v36 = vsel %vm5587_vm7, %v5555_v29, %v5619_v58  ;;  %v5620_v55 = vmul.f32 0.1, %v5556_v62  ;;  %vm5589_vm13 = vcmp.ge.f32.partialorder %v5557_v5, 0.0  ;;  %v6302_v34 = vld [vmem:[%s7809_s14 + $0x60] sm:$0xff]   ;;  %v5529_v57 = vld [vmem:[#allocation2 + $0xc8] sm:$0xff] }
 0x386   : > { %5777 = vst [vmem:[%s7812_s20 + $0x50] sm:$0xff] %v5745_v43  ;;  %v5747_v59 = vadd.f32 %v6253_v1, %v5651_v36  ;;  %v5621_v27 = vmul.f32 0.1, %v5557_v5  ;;  %v5558_v48 = vadd.f32 %v9028_v15, %v5519_v38  ;;  %v6258_v6 = vunpack.c.h.bf16 %v6297_v47  ;;  %v6303_v36 = vld [vmem:[%s7809_s14 + $0x68] sm:$0xff]  }
 0x387   : > { %5778 = vst [vmem:[%s7812_s20 + $0x58] sm:$0xff] %v5746_v16  ;;  %v5652_v50 = vsel %vm5588_vm4, %v5556_v62, %v5620_v55  ;;  %v5559_v32 = vadd.f32 %v9028_v15, %v5520_v44  ;;  %v6261_v23 = vunpack.c.l.bf16 %v6298_v31  ;;  %v5560_v40 = vadd.f32 %v9028_v15, %v5521_v25  ;;  %v5530_v16 = vld [vmem:[#allocation2 + $0xd0] sm:$0xff] }
 0x388   : > { %5779 = vst [vmem:[%s7812_s20 + $0x60] sm:$0xff] %v5747_v59  ;;  %v5748_v41 = vadd.f32 %v6254_v35, %v5652_v50  ;;  %v5653_v37 = vsel %vm5589_vm13, %v5557_v5, %v5621_v27  ;;  %vm5590_vm5 = vcmp.ge.f32.partialorder %v5558_v48, 0.0  ;;  %v5622_v46 = vmul.f32 0.1, %v5558_v48 }
 0x389   : > { %v5749_v9 = vadd.f32 %v6257_v53, %v5653_v37  ;;  %vm5591_vm14 = vcmp.ge.f32.partialorder %v5559_v32, 0.0  ;;  %v5623_v11 = vmul.f32 0.1, %v5559_v32  ;;  %v6262_v42 = vunpack.c.h.bf16 %v6298_v31  ;;  %v6304_v37 = vld [vmem:[%s7809_s14 + $0x70] sm:$0xff]  }
 0x38a   : > { %5780 = vst [vmem:[%s7812_s20 + $0x68] sm:$0xff] %v5748_v41  ;;  %v5654_v7 = vsel %vm5590_vm5, %v5558_v48, %v5622_v46  ;;  %v5561_v22 = vadd.f32 %v9028_v15, %v5522_v21  ;;  %v6265_v60 = vunpack.c.l.bf16 %v6299_v54  ;;  %vm5592_vm0 = vcmp.ge.f32.partialorder %v5560_v40, 0.0  ;;  %v5532_v41 = vld [vmem:[#allocation2 + $0xe0] sm:$0xff] }
 0x38b   : > { %5781 = vst [vmem:[%s7812_s20 + $0x70] sm:$0xff] %v5749_v9  ;;  %v5750_v61 = vadd.f32 %v6258_v6, %v5654_v7  ;;  %v5655_v3 = vsel %vm5591_vm14, %v5559_v32, %v5623_v11  ;;  %v5624_v24 = vmul.f32 0.1, %v5560_v40  ;;  %v5562_v63 = vadd.f32 %v9028_v15, %v5523_v26  ;;  %v5531_v6 = vld [vmem:[#allocation2 + $0xd8] sm:$0xff] }
 0x38c   : > { %v5751_v2 = vadd.f32 %v6261_v23, %v5655_v3  ;;  %vm5593_vm9 = vcmp.ge.f32.partialorder %v5561_v22, 0.0  ;;  %v5625_v4 = vmul.f32 0.1, %v5561_v22  ;;  %v6266_v20 = vunpack.c.h.bf16 %v6299_v54  ;;  %v6305_v3 = vld [vmem:[%s7809_s14 + $0x78] sm:$0xff]  }
 0x38d   : > { %5782 = vst [vmem:[%s7812_s20 + $0x78] sm:$0xff] %v5750_v61  ;;  %v5656_v30 = vsel %vm5592_vm0, %v5560_v40, %v5624_v24  ;;  %v5563_v56 = vadd.f32 %v9028_v15, %v5524_v14  ;;  %v6269_v51 = vunpack.c.l.bf16 %v6300_v13  ;;  %vm5594_vm15 = vcmp.ge.f32.partialorder %v5562_v63, 0.0  ;;  %v5534_v61 = vld [vmem:[#allocation2 + $0xf0] sm:$0xff] }
 0x38e   : > { %5783 = vst [vmem:[%s7812_s20 + $0x80] sm:$0xff] %v5751_v2  ;;  %v5752_v19 = vadd.f32 %v6262_v42, %v5656_v30  ;;  %v5657_v52 = vsel %vm5593_vm9, %v5561_v22, %v5625_v4  ;;  %v5626_v28 = vmul.f32 0.1, %v5562_v63  ;;  %v5564_v17 = vadd.f32 %v9028_v15, %v5525_v0  ;;  %v5533_v42 = vld [vmem:[#allocation2 + $0xe8] sm:$0xff] }
 0x38f   : > { %v5753_v10 = vadd.f32 %v6265_v60, %v5657_v52  ;;  %vm5595_vm12 = vcmp.ge.f32.partialorder %v5563_v56, 0.0  ;;  %v5627_v29 = vmul.f32 0.1, %v5563_v56  ;;  %v6270_v1 = vunpack.c.h.bf16 %v6300_v13 }
 0x390   : > { %5784 = vst [vmem:[%s7812_s20 + $0x88] sm:$0xff] %v5752_v19  ;;  %v5658_v45 = vsel %vm5594_vm15, %v5562_v63, %v5626_v28  ;;  %v5565_v12 = vadd.f32 %v9028_v15, %v5526_v49  ;;  %v6273_v47 = vunpack.c.l.bf16 %v6301_v18  ;;  %vm5596_vm2 = vcmp.ge.f32.partialorder %v5564_v17, 0.0 }
 0x391   : > { %5785 = vst [vmem:[%s7812_s20 + $0x90] sm:$0xff] %v5753_v10  ;;  %v5754_v33 = vadd.f32 %v6266_v20, %v5658_v45  ;;  %v5659_v58 = vsel %vm5595_vm12, %v5563_v56, %v5627_v29  ;;  %v5628_v62 = vmul.f32 0.1, %v5564_v17  ;;  %v5566_v43 = vadd.f32 %v9028_v15, %v5527_v39  ;;  %v5535_v20 = vld [vmem:[#allocation2 + $0xf8] sm:$0xff] }
 0x392   : > { %v5755_v35 = vadd.f32 %v6269_v51, %v5659_v58  ;;  %vm5597_vm3 = vcmp.ge.f32.partialorder %v5565_v12, 0.0  ;;  %v5629_v38 = vmul.f32 0.1, %v5565_v12  ;;  %v6274_v53 = vunpack.c.h.bf16 %v6301_v18 }
 0x393   : > { %5786 = vst [vmem:[%s7812_s20 + $0x98] sm:$0xff] %v5754_v33  ;;  %v5660_v5 = vsel %vm5596_vm2, %v5564_v17, %v5628_v62  ;;  %v5567_v44 = vadd.f32 %v9028_v15, %v5528_v8  ;;  %v6277_v31 = vunpack.c.l.bf16 %v6302_v34  ;;  %vm5598_vm8 = vcmp.ge.f32.partialorder %v5566_v43, 0.0 }
 0x394   : > { %5787 = vst [vmem:[%s7812_s20 + $0xa0] sm:$0xff] %v5755_v35  ;;  %v5756_v55 = vadd.f32 %v6270_v1, %v5660_v5  ;;  %v5661_v59 = vsel %vm5597_vm3, %v5565_v12, %v5629_v38  ;;  %v5630_v27 = vmul.f32 0.1, %v5566_v43  ;;  %v5568_v50 = vadd.f32 %v9028_v15, %v5529_v57 }
 0x395   : > { %v5757_v48 = vadd.f32 %v6273_v47, %v5661_v59  ;;  %vm5599_vm10 = vcmp.ge.f32.partialorder %v5567_v44, 0.0  ;;  %v5631_v25 = vmul.f32 0.1, %v5567_v44  ;;  %v6278_v23 = vunpack.c.h.bf16 %v6302_v34 }
 0x396   : > { %5788 = vst [vmem:[%s7812_s20 + $0xa8] sm:$0xff] %v5756_v55  ;;  %v5662_v32 = vsel %vm5598_vm8, %v5566_v43, %v5630_v27  ;;  %v5569_v21 = vadd.f32 %v9028_v15, %v5530_v16  ;;  %v6281_v54 = vunpack.c.l.bf16 %v6303_v36  ;;  %vm5600_vm1 = vcmp.ge.f32.partialorder %v5568_v50, 0.0 }
 0x397   : > { %5789 = vst [vmem:[%s7812_s20 + $0xb0] sm:$0xff] %v5757_v48  ;;  %v5758_v46 = vadd.f32 %v6274_v53, %v5662_v32  ;;  %v5663_v9 = vsel %vm5599_vm10, %v5567_v44, %v5631_v25  ;;  %v5632_v11 = vmul.f32 0.1, %v5568_v50  ;;  %v5570_v7 = vadd.f32 %v9028_v15, %v5531_v6 }
 0x398   : > { %v5759_v40 = vadd.f32 %v6277_v31, %v5663_v9  ;;  %vm5601_vm11 = vcmp.ge.f32.partialorder %v5569_v21, 0.0  ;;  %v5633_v26 = vmul.f32 0.1, %v5569_v21  ;;  %v6282_v60 = vunpack.c.h.bf16 %v6303_v36 }
 0x399   : > { %5790 = vst [vmem:[%s7812_s20 + $0xb8] sm:$0xff] %v5758_v46  ;;  %v5664_v22 = vsel %vm5600_vm1, %v5568_v50, %v5632_v11  ;;  %v5571_v14 = vadd.f32 %v9028_v15, %v5532_v41  ;;  %v6285_v13 = vunpack.c.l.bf16 %v6304_v37  ;;  %vm5602_vm6 = vcmp.ge.f32.partialorder %v5570_v7, 0.0 }
 0x39a   : > { %5791 = vst [vmem:[%s7812_s20 + $0xc0] sm:$0xff] %v5759_v40  ;;  %v5760_v24 = vadd.f32 %v6278_v23, %v5664_v22  ;;  %v5665_v2 = vsel %vm5601_vm11, %v5569_v21, %v5633_v26  ;;  %v5634_v4 = vmul.f32 0.1, %v5570_v7  ;;  %v5572_v30 = vadd.f32 %v9028_v15, %v5533_v42 }
 0x39b   : > { %v5761_v63 = vadd.f32 %v6281_v54, %v5665_v2  ;;  %vm5603_vm7 = vcmp.ge.f32.partialorder %v5571_v14, 0.0  ;;  %v5635_v0 = vmul.f32 0.1, %v5571_v14  ;;  %v6286_v51 = vunpack.c.h.bf16 %v6304_v37 }
 0x39c   : > { %5792 = vst [vmem:[%s7812_s20 + $0xc8] sm:$0xff] %v5760_v24  ;;  %v5666_v56 = vsel %vm5602_vm6, %v5570_v7, %v5634_v4  ;;  %v5573_v49 = vadd.f32 %v9028_v15, %v5534_v61  ;;  %v6289_v18 = vunpack.c.l.bf16 %v6305_v3  ;;  %vm5604_vm4 = vcmp.ge.f32.partialorder %v5572_v30, 0.0 }
 0x39d   : > { %5793 = vst [vmem:[%s7812_s20 + $0xd0] sm:$0xff] %v5761_v63  ;;  %v5762_v19 = vadd.f32 %v6282_v60, %v5666_v56  ;;  %v5667_v52 = vsel %vm5603_vm7, %v5571_v14, %v5635_v0  ;;  %v5636_v28 = vmul.f32 0.1, %v5572_v30  ;;  %v5574_v17 = vadd.f32 %v9028_v15, %v5535_v20 }
 0x39e   : > { %v5763_v10 = vadd.f32 %v6285_v13, %v5667_v52  ;;  %vm5605_vm13 = vcmp.ge.f32.partialorder %v5573_v49, 0.0  ;;  %v5637_v29 = vmul.f32 0.1, %v5573_v49  ;;  %v6290_v45 = vunpack.c.h.bf16 %v6305_v3 }
 0x39f   : > { %5794 = vst [vmem:[%s7812_s20 + $0xd8] sm:$0xff] %v5762_v19  ;;  %v5668_v39 = vsel %vm5604_vm4, %v5572_v30, %v5636_v28  ;;  %vm5606_vm5 = vcmp.ge.f32.partialorder %v5574_v17, 0.0  ;;  %v5638_v47 = vmul.f32 0.1, %v5574_v17 }
 0x3a0   : > { %5795 = vst [vmem:[%s7812_s20 + $0xe0] sm:$0xff] %v5763_v10  ;;  %v5764_v1 = vadd.f32 %v6286_v51, %v5668_v39  ;;  %v5669_v12 = vsel %vm5605_vm13, %v5573_v49, %v5637_v29 }
 0x3a1   : > { %v5765_v8 = vadd.f32 %v6289_v18, %v5669_v12  ;;  %v5670_v34 = vsel %vm5606_vm5, %v5574_v17, %v5638_v47 }
 0x3a2   : > { %5796 = vst [vmem:[%s7812_s20 + $0xe8] sm:$0xff] %v5764_v1  ;;  %v5766_v33 = vadd.f32 %v6290_v45, %v5670_v34 }
 0x3a3   : > { %5797 = vst [vmem:[%s7812_s20 + $0xf0] sm:$0xff] %v5765_v8 }
 0x3a4   : > { %5798 = vst [vmem:[%s7812_s20 + $0xf8] sm:$0xff] %v5766_v33 }
 0x3a5 PF: > { %s6216_s21 = sshll.u32 %s7644_s22, 5  ;;  %s6217_s14 = sshll.u32 %s7648_s23, 8 }
 0x3a6   : > { %s5815_s12 = sshll.u32 %s7812_s20, 4  ;;  %s5812_s6 = sadd.s32 %s6217_s14, %s6216_s21  ;;  %s9114_s12 = int_to_ptr.vmem [resolvable:$true] %s5815_s12 }
 0x3a7   : > { %s6218_s13 = sshll.u32 %s5812_s6, 7  ;;  %s9358_s10 = sand.u32 1, %s7632_s19  }
 0x3a8   : > { %s9119_s29 = scalar_lea.hbm %s9186_s5, %s6218_s13  ;;  %s9123_s11 = scalar_lea.sflag [#allocation5], %s9358_s10 }
 0x3a9   : > { %s7554_s7 = scalar_lea.vmem %s9114_s12, 4096  ;;  %s7669_s20 = smov [#allocation4]  }
 0x3aa   : > { %p7555_p13 = scmp.ne.s32.totalorder %s9114_s12, %s7554_s7  ;;  %s7558_s22 = sshll.u32 %s7669_s20, 4  ;;  %s7559_s22 = int_to_ptr.vmem [resolvable:$false] %s7558_s22 }
 0x3ab   : > { %s7560_s23 = scalar_lea.vmem %s7559_s22, 8192  ;;  %p7561_p2 = scmp.lt.s32.totalorder %s9114_s12, %s7559_s22 }
 0x3ac   : > { %p7556_p0 = pnand %p7555_p13, %p7764_p6  ;;  %p7562_p3 = scmp.lt.s32.totalorder %s7560_s23, %s7554_s7 }
 0x3ae   : > { %p7557_p1 = pneg %p7556_p0  ;;  %p7563_p4 = por %p7562_p3, %p7561_p2 }
 0x3b0   : > { %p7564_p5 = pnand %p7563_p4, %p7557_p1 }
 0x3b2   : > { %7567 = shalt.err (!%p7564_p5)
}
 0x3b3   : > { %s7568_s24 = scalar_lea.hbm %s9119_s29, 4096  ;;  %s7572_s30 = scalar_lea.hbm %s9186_s5, 65536 }
 0x3b4   : > { %p7569_p8 = scmp.ne.s32.totalorder %s9119_s29, %s7568_s24  ;;  %p7573_p11 = scmp.lt.u32.totalorder %s9119_s29, %s9186_s5 }
 0x3b5   : > { %p7574_p12 = scmp.lt.u32.totalorder %s7572_s30, %s7568_s24  ;;  %p7576_p0 = scmp.lt.u32.totalorder %s7568_s24, %s9119_s29 }
 0x3b6   : > { %p7570_p9 = pnand %p7569_p8, %p7764_p6 }
 0x3b7   : > { %p7575_p13 = por %p7574_p12, %p7573_p11 }
 0x3b8   : > { %p7571_p10 = pneg %p7570_p9 }
 0x3b9   : > { %p7577_p1 = por %p7576_p0, %p7575_p13 }
 0x3bb   : > { %p7578_p2 = pnand %p7577_p1, %p7571_p10 }
 0x3bd   : > { %7581 = shalt.err (!%p7578_p2)
}
 0x3be   : > { %s7670_s21 = smov 128   ;;  %s7671_s14 = smov 8  }
 0x3bf   : > { %7399 = dma.vmem_to_hbm [thread:$0]  (%p7764_p6), %s9114_s12, 4096, %s9119_s29, %s9123_s11, %s7670_s21, %s7670_s21, %s7671_s14  }
 0x3c0 PF: > { %p7405_p3 = scmp.ge.s32.totalorder %s7664_s27, 2  ;;  %s5830_s6 = sand.u32 1, %s7628_s18  }
 0x3c1   : > { %s5831_s13 = scalar_lea.sflag [#allocation5], %s5830_s6 }
 0x3c2   : > { %p7402_p4 = pnand %p7405_p3, %p7771_p7 }
 0x3c4   : > { %7623 = dma.done.wait (!%p7402_p4), %s5831_s13, 4096  }
 0x3c5   : > { %7625 = vsyncadd (!%p7402_p4), %s5831_s13, 4294963200  ;;  %s18_s27 = sadd.s32 1, %s7664_s27   ;;  %s9359_s16 = sld [smem:[#allocation7_spill]] }
 0x3c6   : > { %p15_p5 = scmp.ge.s32.totalorder %s18_s27, 50   ;;  %s9360_s20 = sld [smem:[#allocation14_spill]] }
 0x3c7   : > { %s9361_s21 = sld [smem:[#allocation8_spill]]  ;;  %s9362_s22 = sld [smem:[#allocation9_spill]] }
 0x3c8   : > { %s9363_s23 = sld [smem:[#allocation10_spill]]  ;;  %s9364_s24 = sld [smem:[#allocation11_spill]] }
 0x3c9   : > { %s9365_s25 = sld [smem:[#allocation12_spill]]  ;;  %s9366_s26 = sld [smem:[#allocation13_spill]] }
 0x3ca   : > { %s9367_s18 = smov %s7632_s19  ;;  %17 = sbr.rel (!%p15_p5) target bundleno = 6 (0x6), region = 90 }
 0x3cb   : > { %s9368_s19 = smov %s9359_s16 }
 0x3d1   :  { %5836 = vsyncpa [#allocation5], 1 }
 0x3d2   :  { %5838 = vsyncpa [#allocation5 + $0x1], 1 }

</bundles_post_ra>
